<compile_context>
chip_gen: v5e
topology: v5e:2x2
jax: 0.10.0
libtpu: 0.0.40
codegen_flags: <defaults>
</compile_context>

<pallas_src>
import jax
import jax.numpy as jnp
from jax.experimental import pallas as pl
from jax.experimental.pallas import tpu as pltpu

HIDDEN = 400        # logical hidden width of the PyTorch module
HIDDEN_PAD = 512    # padded to a 128-lane multiple (zero padding => exact)


def _round_up(n, m):
    return ((n + m - 1) // m) * m


def _vmem_capacity_bytes():
    """Physical VMEM of the current TPU generation (conservative fallback)."""
    try:
        info = pltpu.get_tpu_info()
        cap = getattr(info, "vmem_capacity_bytes", None)
        if cap:
            return int(cap)
    except Exception:
        pass
    return 64 << 20   # v7x per-TensorCore VMEM (smallest of the generations)


def _generator_kernel(x_ref,
                      w1_ref, b1_ref,
                      w2_ref, b2_ref,
                      w3_ref, b3_ref,
                      w4_ref, b4_ref,
                      w5_ref, b5_ref,
                      o_ref, h4_ref):
    """One (batch-tile, output-block) step of the fused 5-layer MLP.

    Grid = (batch tiles, output/item blocks). Layers 1-4 run only at the first
    output block of each batch tile (pl.when) and cache h4 (bf16) in VMEM
    scratch; every step then computes one N-block of layer 5 + sigmoid.
    Weights are bf16, activations bf16, accumulation f32 on the MXU; bias add
    and ReLU execute in f32 on the VPU.
    """
    n = pl.program_id(1)

    @pl.when(n == 0)
    def _():
        def linear_relu(h_bf16, w_ref, b_ref):
            z = jnp.dot(h_bf16, w_ref[...], preferred_element_type=jnp.float32)
            return jnp.maximum(z + b_ref[...], 0.0).astype(jnp.bfloat16)

        h = linear_relu(x_ref[...], w1_ref, b1_ref)      # x already bf16
        h = linear_relu(h, w2_ref, b2_ref)
        h = linear_relu(h, w3_ref, b3_ref)
        h4_ref[...] = linear_relu(h, w4_ref, b4_ref)

    z = jnp.dot(h4_ref[...], w5_ref[...],
                preferred_element_type=jnp.float32) + b5_ref[...]
    # sigmoid = 1 / (1 + exp(-z)); exp + approx reciprocal both run on the EUP
    # so the epilogue stays off the VALU slots.
    o_ref[...] = pl.reciprocal(1.0 + jnp.exp(-z), approx=True).astype(o_ref.dtype)


def _choose_item_tiling(item_count, max_tn):
    """Pick (item_pad, tn): single block for small itemCount, else N-blocked."""
    assert max_tn % 128 == 0
    if item_count <= max_tn:
        item_pad = _round_up(item_count, 128)
        return item_pad, item_pad
    tn = max_tn
    return _round_up(item_count, tn), tn


def prepare_padded_params(params, item_pad):
    """Zero-pad weights/biases to lane-friendly shapes; weights in bf16.

    params: 5 pairs (w_t, b) with w_t of shape (in, out) == W.T of the PyTorch
    (out, in) weight, b of shape (1, out). Zero padding keeps the forward pass
    numerically identical (ReLU(0)=0; padded output columns are sliced off).
    """
    def pad_to(a, shape):
        pads = [(0, t - s) for s, t in zip(a.shape, shape)]
        if all(p == (0, 0) for p in pads):
            return a
        return jnp.pad(a, pads)

    (w1, b1), (w2, b2), (w3, b3), (w4, b4), (w5, b5) = params
    return (
        pad_to(w1, (item_pad, HIDDEN_PAD)).astype(jnp.bfloat16),
        pad_to(b1, (1, HIDDEN_PAD)).astype(jnp.float32),
        pad_to(w2, (HIDDEN_PAD, HIDDEN_PAD)).astype(jnp.bfloat16),
        pad_to(b2, (1, HIDDEN_PAD)).astype(jnp.float32),
        pad_to(w3, (HIDDEN_PAD, HIDDEN_PAD)).astype(jnp.bfloat16),
        pad_to(b3, (1, HIDDEN_PAD)).astype(jnp.float32),
        pad_to(w4, (HIDDEN_PAD, HIDDEN_PAD)).astype(jnp.bfloat16),
        pad_to(b4, (1, HIDDEN_PAD)).astype(jnp.float32),
        pad_to(w5, (HIDDEN_PAD, item_pad)).astype(jnp.bfloat16),
        pad_to(b5, (1, item_pad)).astype(jnp.float32),
    )


def generator_forward(x, params, *, tile_m=None, max_tn=4096,
                      out_dtype=jnp.float32):
    """x: (B, itemCount). params: 5 pairs (W_t (in,out) f32, b (1,out) f32)."""
    B, item_count = x.shape
    item_pad, tn = _choose_item_tiling(item_count, max_tn)
    flat = prepare_padded_params(params, item_pad)
    (w1, b1, w2, b2, w3, b3, w4, b4, w5, b5) = flat

    cap = _vmem_capacity_bytes()

    if tile_m is None:
        # Larger batch tiles amortize per-grid-step overhead on the 128 MiB
        # VMEM generations (v5e/v6e); stay at 256 on v7x's 64 MiB budget.
        tile_m = 512 if (cap >= (100 << 20) and item_pad <= 4096) else 256
    if B <= tile_m:
        tm = _round_up(max(B, 8), 8)
    else:
        tm = tile_m
    b_pad = _round_up(B, tm)

    # Fused cast+pad of x to bf16 (skip the pad entirely when already aligned).
    x_bf16 = x.astype(jnp.bfloat16)
    if b_pad == B and item_pad == item_count:
        x_p = x_bf16
    else:
        x_p = jnp.pad(x_bf16, ((0, b_pad - B), (0, item_pad - item_count)))

    grid = (b_pad // tm, item_pad // tn)

    def resident(arr):
        # Constant index_map + single buffer: DMA'd once, VMEM-resident,
        # no wasted second copy.
        return pl.BlockSpec(arr.shape, lambda i, n: (0, 0),
                            pipeline_mode=pl.Buffered(1))

    in_specs = [
        pl.BlockSpec((tm, item_pad), lambda i, n: (i, 0)),    # x (bf16)
        resident(w1), resident(b1),
        resident(w2), resident(b2),
        resident(w3), resident(b3),
        resident(w4), resident(b4),
        pl.BlockSpec((HIDDEN_PAD, tn), lambda i, n: (0, n)),  # w5, N-blocked
        pl.BlockSpec((1, tn), lambda i, n: (0, n)),           # b5, N-blocked
    ]
    out_spec = pl.BlockSpec((tm, tn), lambda i, n: (i, n))

    out_itemsize = jnp.dtype(out_dtype).itemsize

    # ---- VMEM budget (never exceed this generation's physical VMEM) ----
    res_bytes = sum(int(a.size) * a.dtype.itemsize
                    for a in (w1, b1, w2, b2, w3, b3, w4, b4))   # 1x buffered
    w5_blk_bytes = 2 * (HIDDEN_PAD * tn * 2 + tn * 4)            # 2x buffered
    x_tile_bytes = 2 * tm * item_pad * 2
    out_tile_bytes = 2 * tm * tn * out_itemsize
    scratch_bytes = tm * HIDDEN_PAD * 2
    temp_bytes = 6 * tm * HIDDEN_PAD * 4 + 2 * tm * tn * 4
    est = (res_bytes + w5_blk_bytes + x_tile_bytes + out_tile_bytes
           + scratch_bytes + temp_bytes + (4 << 20))
    budget = int(cap * 0.85)                    # leave compiler-scratch headroom
    vmem_limit = int(min(budget, max(est, min(32 << 20, budget))))

    # ---- advisory cost estimate ----
    weight_bytes = sum(int(a.size) * a.dtype.itemsize for a in flat)
    nb = b_pad // tm
    flops = 2 * b_pad * (item_pad * HIDDEN_PAD
                         + 3 * HIDDEN_PAD * HIDDEN_PAD
                         + HIDDEN_PAD * item_pad)
    bytes_accessed = (weight_bytes
                      + (nb - 1) * int(w5.size) * 2   # W5 blocks refetched per batch tile
                      + int(x_p.size) * 2
                      + b_pad * item_pad * out_itemsize)
    cost = pl.CostEstimate(flops=flops,
                           transcendentals=b_pad * item_pad,
                           bytes_accessed=bytes_accessed)

    out_p = pl.pallas_call(
        _generator_kernel,
        out_shape=jax.ShapeDtypeStruct((b_pad, item_pad), out_dtype),
        grid=grid,
        in_specs=in_specs,
        out_specs=out_spec,
        scratch_shapes=[pltpu.VMEM((tm, HIDDEN_PAD), jnp.bfloat16)],
        compiler_params=pltpu.CompilerParams(
            # Batch axis parallel (megacore); item/output axis carries the h4
            # scratch so it must stay sequential ("arbitrary").
            # TODO(synk): on v7x consider pltpu.CORE_PARALLEL on the batch axis
            # if plain "parallel" is not split across the two TensorCores.
            dimension_semantics=("parallel", "arbitrary"),
            vmem_limit_bytes=vmem_limit),
        cost_estimate=cost,
    )(x_p, *flat)

    return out_p[:B, :item_count]


def init_generator_params(key, item_count, hidden=HIDDEN):
    """Mimics PyTorch nn.Linear default init: U(-1/sqrt(fan_in), 1/sqrt(fan_in))."""
    dims = [(item_count, hidden), (hidden, hidden), (hidden, hidden),
            (hidden, hidden), (hidden, item_count)]
    params = []
    for fan_in, fan_out in dims:
        key, kw, kb = jax.random.split(key, 3)
        bound = 1.0 / jnp.sqrt(jnp.float32(fan_in))
        # Stored directly as (in, out) == W.T of the PyTorch (out, in) weight.
        w_t = jax.random.uniform(kw, (fan_in, fan_out), jnp.float32,
                                 minval=-bound, maxval=bound)
        b = jax.random.uniform(kb, (1, fan_out), jnp.float32,
                               minval=-bound, maxval=bound)
        params.append((w_t, b))
    return params


def generator_reference_bf16(x, params):
    """Pure-JAX reference on the kernel's bf16 weight/activation path
    (exact sigmoid; isolates kernel correctness from bf16 quantization)."""
    h = x.astype(jnp.bfloat16)
    for i, (w_t, b) in enumerate(params):
        z = jnp.dot(h, w_t.astype(jnp.bfloat16),
                    preferred_element_type=jnp.float32) + b
        if i < len(params) - 1:
            h = jnp.maximum(z, 0.0).astype(jnp.bfloat16)
        else:
            h = jax.nn.sigmoid(z)
    return h


def generator_reference_f32(x, params):
    """Full-precision reference of the original PyTorch module."""
    h = x.astype(jnp.float32)
    for i, (w_t, b) in enumerate(params):
        h = h @ w_t + b
        h = jnp.maximum(h, 0.0) if i < len(params) - 1 else jax.nn.sigmoid(h)
    return h


if __name__ == "__main__":
    key = jax.random.PRNGKey(0)
    key, kx1, kp1, kx2, kp2 = jax.random.split(key, 5)

    # ---- Test 1: common path (single item block, single batch tile), f32 out.
    item_count, batch = 64, 8
    x = jax.random.normal(kx1, (batch, item_count), jnp.float32)
    params = init_generator_params(kp1, item_count)

    out = jax.block_until_ready(generator_forward(x, params))
    assert out.shape == (batch, item_count)

    ref_bf16 = generator_reference_bf16(x, params)
    assert jnp.allclose(out, ref_bf16, atol=1e-2, rtol=0.0), \
        "mismatch vs bf16 reference"
    ref_f32 = generator_reference_f32(x, params)
    assert float(jnp.max(jnp.abs(out - ref_f32))) < 5e-2, \
        "mismatch vs f32 reference"

    # ---- bf16-output path (halves output writeback traffic); looser check.
    out_bf16 = jax.block_until_ready(
        generator_forward(x, params, out_dtype=jnp.bfloat16))
    assert jnp.allclose(out_bf16.astype(jnp.float32), ref_bf16,
                        atol=2e-2, rtol=0.0), "mismatch on bf16 output path"

    # ---- Test 2: exercises the tiled path (multiple batch tiles and multiple
    # item/output blocks) with deliberately tiny tiles.
    item_count2, batch2 = 300, 20
    x2 = jax.random.normal(kx2, (batch2, item_count2), jnp.float32)
    params2 = init_generator_params(kp2, item_count2)
    out2 = jax.block_until_ready(
        generator_forward(x2, params2, tile_m=8, max_tn=128))
    assert out2.shape == (batch2, item_count2)
    ref2 = generator_reference_bf16(x2, params2)
    assert jnp.allclose(out2, ref2, atol=1e-2, rtol=0.0), \
        "mismatch on tiled (multi-block) path"

    print("KERNEL_OK")
</pallas_src>

<mosaic_0001>
module attributes {stable_mosaic.version = 11 : i64} {
  func.func @_generator_kernel(%arg0: i32, %arg1: i32, %arg2: memref<8x128xbf16, #tpu.memory_space<vmem>>, %arg3: memref<128x512xbf16, #tpu.memory_space<vmem>>, %arg4: memref<1x512xf32, #tpu.memory_space<vmem>>, %arg5: memref<512x512xbf16, #tpu.memory_space<vmem>>, %arg6: memref<1x512xf32, #tpu.memory_space<vmem>>, %arg7: memref<512x512xbf16, #tpu.memory_space<vmem>>, %arg8: memref<1x512xf32, #tpu.memory_space<vmem>>, %arg9: memref<512x512xbf16, #tpu.memory_space<vmem>>, %arg10: memref<1x512xf32, #tpu.memory_space<vmem>>, %arg11: memref<512x128xbf16, #tpu.memory_space<vmem>>, %arg12: memref<1x128xf32, #tpu.memory_space<vmem>>, %arg13: memref<8x128xf32, #tpu.memory_space<vmem>>, %arg14: memref<8x512xbf16, #tpu.memory_space<vmem>>) attributes {dimension_semantics = [#tpu.dimension_semantics<parallel>, #tpu.dimension_semantics<arbitrary>], iteration_bounds = array<i64: 1, 1>, scalar_prefetch = 0 : i64, scratch_operands = 1 : i64, tpu.core_type = #tpu.core_type<tc>, window_params = [{transform_indices = @transform_0, window_bounds = array<i64: 8, 128>}, {pipeline_mode = #tpu.pipeline_mode<synchronous>, transform_indices = @transform_1, window_bounds = array<i64: 128, 512>}, {pipeline_mode = #tpu.pipeline_mode<synchronous>, transform_indices = @transform_2, window_bounds = array<i64: 1, 512>}, {pipeline_mode = #tpu.pipeline_mode<synchronous>, transform_indices = @transform_3, window_bounds = array<i64: 512, 512>}, {pipeline_mode = #tpu.pipeline_mode<synchronous>, transform_indices = @transform_4, window_bounds = array<i64: 1, 512>}, {pipeline_mode = #tpu.pipeline_mode<synchronous>, transform_indices = @transform_5, window_bounds = array<i64: 512, 512>}, {pipeline_mode = #tpu.pipeline_mode<synchronous>, transform_indices = @transform_6, window_bounds = array<i64: 1, 512>}, {pipeline_mode = #tpu.pipeline_mode<synchronous>, transform_indices = @transform_7, window_bounds = array<i64: 512, 512>}, {pipeline_mode = #tpu.pipeline_mode<synchronous>, transform_indices = @transform_8, window_bounds = array<i64: 1, 512>}, {transform_indices = @transform_9, window_bounds = array<i64: 512, 128>}, {transform_indices = @transform_10, window_bounds = array<i64: 1, 128>}, {transform_indices = @transform_11, window_bounds = array<i64: 8, 128>}]} {
    %c0_i32 = arith.constant 0 : i32
    %0 = arith.cmpi eq, %arg1, %c0_i32 : i32
    %1 = arith.extui %0 : i1 to i32
    %c0_i32_0 = arith.constant 0 : i32
    %2 = arith.cmpi ne, %1, %c0_i32_0 : i32
    scf.if %2 {
      %c0_10 = arith.constant 0 : index
      %c0_11 = arith.constant 0 : index
      %16 = vector.load %arg2[%c0_10, %c0_11] : memref<8x128xbf16, #tpu.memory_space<vmem>>, vector<8x128xbf16>
      %c0_12 = arith.constant 0 : index
      %c0_13 = arith.constant 0 : index
      %17 = vector.load %arg3[%c0_12, %c0_13] : memref<128x512xbf16, #tpu.memory_space<vmem>>, vector<128x512xbf16>
      %cst_14 = arith.constant dense<0.000000e+00> : vector<8x512xf32>
      %18 = tpu.matmul %16, %17, %cst_14 {dimension_numbers = #tpu.dot_dimension_numbers<[1], [0], [0], [1], [0, 0, 1, 1], [], []>} : vector<8x128xbf16>, vector<128x512xbf16>, vector<8x512xf32> -> vector<8x512xf32>
      %c0_15 = arith.constant 0 : index
      %c0_16 = arith.constant 0 : index
      %19 = vector.load %arg4[%c0_15, %c0_16] : memref<1x512xf32, #tpu.memory_space<vmem>>, vector<1x512xf32>
      %20 = vector.broadcast %19 : vector<1x512xf32> to vector<8x512xf32>
      %21 = arith.addf %18, %20 : vector<8x512xf32>
      %cst_17 = arith.constant 0.000000e+00 : f32
      %22 = vector.broadcast %cst_17 : f32 to vector<8x512xf32>
      %23 = arith.maximumf %21, %22 : vector<8x512xf32>
      %24 = arith.truncf %23 : vector<8x512xf32> to vector<8x512xbf16>
      %c0_18 = arith.constant 0 : index
      %c0_19 = arith.constant 0 : index
      %25 = vector.load %arg5[%c0_18, %c0_19] : memref<512x512xbf16, #tpu.memory_space<vmem>>, vector<512x512xbf16>
      %cst_20 = arith.constant dense<0.000000e+00> : vector<8x512xf32>
      %26 = tpu.matmul %24, %25, %cst_20 {dimension_numbers = #tpu.dot_dimension_numbers<[1], [0], [0], [1], [0, 0, 1, 1], [], []>} : vector<8x512xbf16>, vector<512x512xbf16>, vector<8x512xf32> -> vector<8x512xf32>
      %c0_21 = arith.constant 0 : index
      %c0_22 = arith.constant 0 : index
      %27 = vector.load %arg6[%c0_21, %c0_22] : memref<1x512xf32, #tpu.memory_space<vmem>>, vector<1x512xf32>
      %28 = vector.broadcast %27 : vector<1x512xf32> to vector<8x512xf32>
      %29 = arith.addf %26, %28 : vector<8x512xf32>
      %cst_23 = arith.constant 0.000000e+00 : f32
      %30 = vector.broadcast %cst_23 : f32 to vector<8x512xf32>
      %31 = arith.maximumf %29, %30 : vector<8x512xf32>
      %32 = arith.truncf %31 : vector<8x512xf32> to vector<8x512xbf16>
      %c0_24 = arith.constant 0 : index
      %c0_25 = arith.constant 0 : index
      %33 = vector.load %arg7[%c0_24, %c0_25] : memref<512x512xbf16, #tpu.memory_space<vmem>>, vector<512x512xbf16>
      %cst_26 = arith.constant dense<0.000000e+00> : vector<8x512xf32>
      %34 = tpu.matmul %32, %33, %cst_26 {dimension_numbers = #tpu.dot_dimension_numbers<[1], [0], [0], [1], [0, 0, 1, 1], [], []>} : vector<8x512xbf16>, vector<512x512xbf16>, vector<8x512xf32> -> vector<8x512xf32>
      %c0_27 = arith.constant 0 : index
      %c0_28 = arith.constant 0 : index
      %35 = vector.load %arg8[%c0_27, %c0_28] : memref<1x512xf32, #tpu.memory_space<vmem>>, vector<1x512xf32>
      %36 = vector.broadcast %35 : vector<1x512xf32> to vector<8x512xf32>
      %37 = arith.addf %34, %36 : vector<8x512xf32>
      %cst_29 = arith.constant 0.000000e+00 : f32
      %38 = vector.broadcast %cst_29 : f32 to vector<8x512xf32>
      %39 = arith.maximumf %37, %38 : vector<8x512xf32>
      %40 = arith.truncf %39 : vector<8x512xf32> to vector<8x512xbf16>
      %c0_30 = arith.constant 0 : index
      %c0_31 = arith.constant 0 : index
      %41 = vector.load %arg9[%c0_30, %c0_31] : memref<512x512xbf16, #tpu.memory_space<vmem>>, vector<512x512xbf16>
      %cst_32 = arith.constant dense<0.000000e+00> : vector<8x512xf32>
      %42 = tpu.matmul %40, %41, %cst_32 {dimension_numbers = #tpu.dot_dimension_numbers<[1], [0], [0], [1], [0, 0, 1, 1], [], []>} : vector<8x512xbf16>, vector<512x512xbf16>, vector<8x512xf32> -> vector<8x512xf32>
      %c0_33 = arith.constant 0 : index
      %c0_34 = arith.constant 0 : index
      %43 = vector.load %arg10[%c0_33, %c0_34] : memref<1x512xf32, #tpu.memory_space<vmem>>, vector<1x512xf32>
      %44 = vector.broadcast %43 : vector<1x512xf32> to vector<8x512xf32>
      %45 = arith.addf %42, %44 : vector<8x512xf32>
      %cst_35 = arith.constant 0.000000e+00 : f32
      %46 = vector.broadcast %cst_35 : f32 to vector<8x512xf32>
      %47 = arith.maximumf %45, %46 : vector<8x512xf32>
      %48 = arith.truncf %47 : vector<8x512xf32> to vector<8x512xbf16>
      %c0_36 = arith.constant 0 : index
      %c0_37 = arith.constant 0 : index
      %49 = vector.load %arg14[%c0_36, %c0_37] : memref<8x512xbf16, #tpu.memory_space<vmem>>, vector<8x512xbf16>
      tpu.vector_store %arg14[%c0_36, %c0_37], %48 {strides = array<i32>} : memref<8x512xbf16, #tpu.memory_space<vmem>>, vector<8x512xbf16>,
    } else {
    }
    %c0 = arith.constant 0 : index
    %c0_1 = arith.constant 0 : index
    %3 = vector.load %arg14[%c0, %c0_1] : memref<8x512xbf16, #tpu.memory_space<vmem>>, vector<8x512xbf16>
    %c0_2 = arith.constant 0 : index
    %c0_3 = arith.constant 0 : index
    %4 = vector.load %arg11[%c0_2, %c0_3] : memref<512x128xbf16, #tpu.memory_space<vmem>>, vector<512x128xbf16>
    %cst = arith.constant dense<0.000000e+00> : vector<8x128xf32>
    %5 = tpu.matmul %3, %4, %cst {dimension_numbers = #tpu.dot_dimension_numbers<[1], [0], [0], [1], [0, 0, 1, 1], [], []>} : vector<8x512xbf16>, vector<512x128xbf16>, vector<8x128xf32> -> vector<8x128xf32>
    %c0_4 = arith.constant 0 : index
    %c0_5 = arith.constant 0 : index
    %6 = vector.load %arg12[%c0_4, %c0_5] : memref<1x128xf32, #tpu.memory_space<vmem>>, vector<1x128xf32>
    %7 = vector.broadcast %6 : vector<1x128xf32> to vector<8x128xf32>
    %8 = arith.addf %5, %7 : vector<8x128xf32>
    %cst_6 = arith.constant 0.000000e+00 : f32
    %9 = vector.broadcast %cst_6 : f32 to vector<8x128xf32>
    %10 = arith.subf %9, %8 : vector<8x128xf32>
    %11 = math.exp %10 : vector<8x128xf32>
    %cst_7 = arith.constant 1.000000e+00 : f32
    %12 = vector.broadcast %cst_7 : f32 to vector<8x128xf32>
    %13 = arith.addf %12, %11 : vector<8x128xf32>
    %14 = tpu.reciprocal %13 {approx = true} : vector<8x128xf32> -> vector<8x128xf32>
    %c0_8 = arith.constant 0 : index
    %c0_9 = arith.constant 0 : index
    %15 = vector.load %arg13[%c0_8, %c0_9] : memref<8x128xf32, #tpu.memory_space<vmem>>, vector<8x128xf32>
    tpu.vector_store %arg13[%c0_8, %c0_9], %14 {strides = array<i32>} : memref<8x128xf32, #tpu.memory_space<vmem>>, vector<8x128xf32>,
    return
  }
  func.func @transform_0(%arg0: i32, %arg1: i32) -> (i32, i32) {
    %c0_i32 = arith.constant 0 : i32
    %c0_i32_0 = arith.constant 0 : i32
    return %arg0, %c0_i32 : i32, i32
  }
  func.func @transform_1(%arg0: i32, %arg1: i32) -> (i32, i32) {
    %c0_i32 = arith.constant 0 : i32
    %c0_i32_0 = arith.constant 0 : i32
    %c0_i32_1 = arith.constant 0 : i32
    return %c0_i32, %c0_i32_0 : i32, i32
  }
  func.func @transform_2(%arg0: i32, %arg1: i32) -> (i32, i32) {
    %c0_i32 = arith.constant 0 : i32
    %c0_i32_0 = arith.constant 0 : i32
    %c0_i32_1 = arith.constant 0 : i32
    return %c0_i32, %c0_i32_0 : i32, i32
  }
  func.func @transform_3(%arg0: i32, %arg1: i32) -> (i32, i32) {
    %c0_i32 = arith.constant 0 : i32
    %c0_i32_0 = arith.constant 0 : i32
    %c0_i32_1 = arith.constant 0 : i32
    return %c0_i32, %c0_i32_0 : i32, i32
  }
  func.func @transform_4(%arg0: i32, %arg1: i32) -> (i32, i32) {
    %c0_i32 = arith.constant 0 : i32
    %c0_i32_0 = arith.constant 0 : i32
    %c0_i32_1 = arith.constant 0 : i32
    return %c0_i32, %c0_i32_0 : i32, i32
  }
  func.func @transform_5(%arg0: i32, %arg1: i32) -> (i32, i32) {
    %c0_i32 = arith.constant 0 : i32
    %c0_i32_0 = arith.constant 0 : i32
    %c0_i32_1 = arith.constant 0 : i32
    return %c0_i32, %c0_i32_0 : i32, i32
  }
  func.func @transform_6(%arg0: i32, %arg1: i32) -> (i32, i32) {
    %c0_i32 = arith.constant 0 : i32
    %c0_i32_0 = arith.constant 0 : i32
    %c0_i32_1 = arith.constant 0 : i32
    return %c0_i32, %c0_i32_0 : i32, i32
  }
  func.func @transform_7(%arg0: i32, %arg1: i32) -> (i32, i32) {
    %c0_i32 = arith.constant 0 : i32
    %c0_i32_0 = arith.constant 0 : i32
    %c0_i32_1 = arith.constant 0 : i32
    return %c0_i32, %c0_i32_0 : i32, i32
  }
  func.func @transform_8(%arg0: i32, %arg1: i32) -> (i32, i32) {
    %c0_i32 = arith.constant 0 : i32
    %c0_i32_0 = arith.constant 0 : i32
    %c0_i32_1 = arith.constant 0 : i32
    return %c0_i32, %c0_i32_0 : i32, i32
  }
  func.func @transform_9(%arg0: i32, %arg1: i32) -> (i32, i32) {
    %c0_i32 = arith.constant 0 : i32
    %c0_i32_0 = arith.constant 0 : i32
    return %c0_i32, %arg1 : i32, i32
  }
  func.func @transform_10(%arg0: i32, %arg1: i32) -> (i32, i32) {
    %c0_i32 = arith.constant 0 : i32
    %c0_i32_0 = arith.constant 0 : i32
    return %c0_i32, %arg1 : i32, i32
  }
  func.func @transform_11(%arg0: i32, %arg1: i32) -> (i32, i32) {
    %c0_i32 = arith.constant 0 : i32
    return %arg0, %arg1 : i32, i32
  }
}

</mosaic_0001>

<bundles_post_ra>
// kernel: tpu_custom_call.1
= control target key start
LH: loop header
LB: loop body
LE: loop exit
PB: predicated region body
PF: predicated region fallthrough
CT: control target
= control target key end

     0   :  { %16 = vsyncpa [#allocation4], 0  ;;  %s6549_s0 = inlined_call_operand.hbm [shape: bf16[8,128], index: 0, kind: input, shape index: {}]   ;;  %s6550_s1 = inlined_call_operand.hbm [shape: bf16[128,512], index: 1, kind: input, shape index: {}]   ;;  %s6551_s2 = inlined_call_operand.hbm [shape: f32[1,512], index: 2, kind: input, shape index: {}]   ;;  %s6552_s3 = inlined_call_operand.hbm [shape: bf16[512,512], index: 3, kind: input, shape index: {}]   ;;  %s6553_s4 = inlined_call_operand.hbm [shape: f32[1,512], index: 4, kind: input, shape index: {}]   ;;  %s6554_s5 = inlined_call_operand.hbm [shape: bf16[512,512], index: 5, kind: input, shape index: {}]   ;;  %s6555_s6 = inlined_call_operand.vmem [shape: f32[1,512], index: 6, kind: input, shape index: {}]   ;;  %s6556_s7 = inlined_call_operand.hbm [shape: bf16[512,512], index: 7, kind: input, shape index: {}]   ;;  %s6557_s8 = inlined_call_operand.hbm [shape: f32[1,512], index: 8, kind: input, shape index: {}]   ;;  %s6558_s9 = inlined_call_operand.hbm [shape: bf16[512,128], index: 9, kind: input, shape index: {}]   ;;  %s6559_s10 = inlined_call_operand.vmem [shape: f32[1,128], index: 10, kind: input, shape index: {}]   ;;  %s6560_s11 = inlined_call_operand.hbm [shape: f32[8,128], index: 11, kind: output, shape index: {}]  }
   0x1   :  { %17 = vsyncpa [#allocation7], 0 }
   0x2   :  { %18 = vsyncpa [#allocation10], 0 }
   0x3   :  { %19 = vsyncpa [#allocation13], 0 }
   0x4   :  { %20 = vsyncpa [#allocation16], 0  ;;  %s37_s19 = sshll.u32 %s6550_s1, 4  ;;  %s38_s19 = int_to_ptr.hbm [resolvable:$true] %s37_s19 }
   0x5   :  { %21 = vsyncpa [#allocation5], 0  ;;  %s6286_s20 = smov [#allocation6]   ;;  %s61_s24 = sshll.u32 %s6552_s3, 4  ;;  %s62_s24 = int_to_ptr.hbm [resolvable:$true] %s61_s24 }
   0x6   :  { %s39_s21 = sshll.u32 %s6286_s20, 4  ;;  %s6287_s25 = smov 256   ;;  %s40_s21 = int_to_ptr.vmem [resolvable:$true] %s39_s21 }
   0x7   :  { %s6288_s26 = smov 16   ;;  %s6289_s27 = smov [#allocation9]  }
   0x8   :  { %45 = dma.hbm_to_vmem [thread:$0]  %s38_s19, 4096, %s40_s21, [#allocation7], %s6287_s25, %s6287_s25, %s6288_s26  }
   0x9   :  { %s63_s28 = sshll.u32 %s6289_s27, 4  ;;  %s85_s30 = sshll.u32 %s6554_s5, 4  ;;  %s64_s28 = int_to_ptr.vmem [resolvable:$true] %s63_s28  ;;  %s86_s30 = int_to_ptr.hbm [resolvable:$true] %s85_s30 }
   0xa   :  { %69 = dma.hbm_to_vmem [thread:$0]  %s62_s24, 16384, %s64_s28, [#allocation10], %s6287_s25, %s6287_s25, %s6288_s26  }
   0xb   :  { %s114_s13 = sshll.u32 %s6557_s8, 4  ;;  %s6290_s14 = smov [#allocation12]   ;;  %s115_s13 = int_to_ptr.hbm [resolvable:$true] %s114_s13 }
   0xc   :  { %s87_s15 = sshll.u32 %s6290_s14, 4  ;;  %s6291_s16 = smov [#allocation15]   ;;  %s88_s15 = int_to_ptr.vmem [resolvable:$true] %s87_s15 }
   0xd   :  { %93 = dma.hbm_to_vmem [thread:$0]  %s86_s30, 16384, %s88_s15, [#allocation13], %s6287_s25, %s6287_s25, %s6288_s26  }
   0xe   :  { %s116_s5 = sshll.u32 %s6291_s16, 4  ;;  %s27_s19 = sshll.u32 %s6549_s0, 4  ;;  %s117_s5 = int_to_ptr.vmem [resolvable:$true] %s116_s5  ;;  %s28_s19 = int_to_ptr.hbm [resolvable:$true] %s27_s19 }
   0xf   :  { %119 = dma.hbm_to_vmem [thread:$0]  %s115_s13, 64, %s117_s5, [#allocation16]  }
  0x10   :  { %s51_s8 = sshll.u32 %s6551_s2, 4  ;;  %s6292_s22 = smov [#allocation3]   ;;  %s52_s8 = int_to_ptr.hbm [resolvable:$true] %s51_s8 }
  0x11   :  { %s29_s23 = sshll.u32 %s6292_s22, 4  ;;  %s6293_s24 = smov [#allocation8]   ;;  %s30_s23 = int_to_ptr.vmem [resolvable:$true] %s29_s23 }
  0x12   :  { %32 = dma.hbm_to_vmem [thread:$0]  %s28_s19, 64, %s30_s23, [#allocation4]  }
  0x13   :  { %s53_s27 = sshll.u32 %s6293_s24, 4  ;;  %s75_s1 = sshll.u32 %s6553_s4, 4  ;;  %s54_s27 = int_to_ptr.vmem [resolvable:$true] %s53_s27  ;;  %s76_s1 = int_to_ptr.hbm [resolvable:$true] %s75_s1 }
  0x14   :  { %56 = dma.hbm_to_vmem [thread:$0]  %s52_s8, 64, %s54_s27, [#allocation7]  }
  0x15   :  { %s100_s3 = sshll.u32 %s6556_s7, 4  ;;  %s6294_s12 = smov [#allocation11]   ;;  %s101_s3 = int_to_ptr.hbm [resolvable:$true] %s100_s3 }
  0x16   :  { %s77_s2 = sshll.u32 %s6294_s12, 4  ;;  %s6295_s13 = smov [#allocation14]   ;;  %s78_s2 = int_to_ptr.vmem [resolvable:$true] %s77_s2 }
  0x17   :  { %80 = dma.hbm_to_vmem [thread:$0]  %s76_s1, 64, %s78_s2, [#allocation10]  }
  0x18   :  { %s102_s14 = sshll.u32 %s6295_s13, 4  ;;  %s124_s5 = sshll.u32 %s6558_s9, 4  ;;  %s103_s14 = int_to_ptr.vmem [resolvable:$true] %s102_s14  ;;  %s125_s5 = int_to_ptr.hbm [resolvable:$true] %s124_s5 }
  0x19   :  { %108 = dma.hbm_to_vmem [thread:$0]  %s101_s3, 16384, %s103_s14, [#allocation13], %s6287_s25, %s6287_s25, %s6288_s26  }
  0x1a   :  { %s6296_s4 = smov [#allocation17]   ;;  %s6297_s7 = smov 64  }
  0x1b   :  { %s126_s17 = sshll.u32 %s6296_s4, 4  ;;  %s6298_s18 = smov 4   ;;  %s127_s17 = int_to_ptr.vmem [resolvable:$true] %s126_s17 }
  0x1c   :  { %132 = dma.hbm_to_vmem [thread:$0]  %s125_s5, 4096, %s127_s17, [#allocation16], %s6297_s7, %s6297_s7, %s6298_s18  }
  0x1d   :  { %6274 = dma.done.wait [#allocation4], 64  }
  0x1e   :  { %6275 = vsyncadd [#allocation4], 4294967232 }
  0x1f   :  { %6276 = dma.done.wait [#allocation7], 4160  }
  0x20   :  { %6277 = vsyncadd [#allocation7], 4294963136 }
  0x21   :  { %6278 = dma.done.wait [#allocation10], 16448  }
  0x22   :  { %6279 = vsyncadd [#allocation10], 4294950848 }
  0x23   :  { %6280 = dma.done.wait [#allocation13], 32768  }
  0x24   :  { %6281 = vsyncadd [#allocation13], 4294934528 }
  0x25   :  { %6282 = dma.done.wait [#allocation16], 4160  }
  0x26   :  { %6283 = vsyncadd [#allocation16], 4294963136  ;;  %v3889_v0 = vld [vmem:[#allocation6 + $0xe0] sm:$0xf]  ;;  %v5597_v1 = vld [vmem:[#allocation6 + $0xec] sm:$0xf0] }
  0x27   :  { %v5595_v2 = vld [vmem:[#allocation6 + $0xe4] sm:$0xf]  ;;  %v3890_v3 = vor.u32 %v5597_v1, %v3889_v0  ;;  %v3891_v4 = vld [vmem:[#allocation6 + $0xf0] sm:$0xf0]  ;;  %v3897_v5 = vld [vmem:[#allocation6 + $0xe8] sm:$0xf] }
  0x28   :  { %v5598_v6 = vld [vmem:[#allocation6 + $0xf4] sm:$0xf0]  ;;  %v3894_v7 = vor.u32 %v5595_v2, %v3891_v4  ;;  %v5596_v9 = vld [vmem:[#allocation6 + $0xec] sm:$0xf]  ;;  %v3899_v10 = vld [vmem:[#allocation6 + $0xf8] sm:$0xf0] }
  0x29   :  { %v3898_v8 = vor.u32 %v5598_v6, %v3897_v5  ;;  %v3873_v11 = vld [vmem:[#allocation6 + $0xc0] sm:$0xf]  ;;  %378 = vmatpush.bf16.msra.mxu0 %v3890_v3  ;;  %v3902_v12 = vor.u32 %v5596_v9, %v3899_v10  ;;  %v5593_v13 = vld [vmem:[#allocation6 + $0xcc] sm:$0xf0]  ;;  %v5591_v14 = vld [vmem:[#allocation6 + $0xc4] sm:$0xf] }
  0x2a   :  { %v3875_v15 = vld [vmem:[#allocation6 + $0xd0] sm:$0xf0]  ;;  %391 = vmatpush.bf16.msra.mxu1 %v3894_v7  ;;  %v3874_v16 = vor.u32 %v5593_v13, %v3873_v11  ;;  %v3881_v18 = vld [vmem:[#allocation6 + $0xc8] sm:$0xf]  ;;  %v5594_v19 = vld [vmem:[#allocation6 + $0xd4] sm:$0xf0] }
  0x2b   :  { %404 = vmatpush.bf16.msra.mxu2 %v3898_v8  ;;  %v3878_v17 = vor.u32 %v5591_v14, %v3875_v15  ;;  %v5592_v20 = vld [vmem:[#allocation6 + $0xcc] sm:$0xf]  ;;  %417 = vmatpush.bf16.msra.mxu3 %v3902_v12  ;;  %v3882_v21 = vor.u32 %v5594_v19, %v3881_v18  ;;  %v3883_v22 = vld [vmem:[#allocation6 + $0xd8] sm:$0xf0]  ;;  %v3857_v23 = vld [vmem:[#allocation6 + $0xa0] sm:$0xf] }
  0x2c   :  { %v5589_v24 = vld [vmem:[#allocation6 + $0xac] sm:$0xf0]  ;;  %v3886_v25 = vor.u32 %v5592_v20, %v3883_v22  ;;  %v5587_v26 = vld [vmem:[#allocation6 + $0xa4] sm:$0xf]  ;;  %v3859_v27 = vld [vmem:[#allocation6 + $0xb0] sm:$0xf0] }
  0x2d   :  { %v3865_v28 = vld [vmem:[#allocation6 + $0xa8] sm:$0xf]  ;;  %379 = vmatpush.bf16.msra.mxu0 %v3874_v16  ;;  %v3858_v29 = vor.u32 %v5589_v24, %v3857_v23  ;;  %v5590_v30 = vld [vmem:[#allocation6 + $0xb4] sm:$0xf0]  ;;  %v5588_v31 = vld [vmem:[#allocation6 + $0xac] sm:$0xf]  ;;  %v3862_v33 = vor.u32 %v5587_v26, %v3859_v27 }
  0x2e   :  { %v3867_v32 = vld [vmem:[#allocation6 + $0xb8] sm:$0xf0]  ;;  %392 = vmatpush.bf16.msra.mxu1 %v3878_v17  ;;  %v3866_v34 = vor.u32 %v5590_v30, %v3865_v28  ;;  %v3841_v35 = vld [vmem:[#allocation6 + $0x80] sm:$0xf]  ;;  %v5585_v36 = vld [vmem:[#allocation6 + $0x8c] sm:$0xf0] }
  0x2f   :  { %405 = vmatpush.bf16.msra.mxu2 %v3882_v21  ;;  %v5583_v37 = vld [vmem:[#allocation6 + $0x84] sm:$0xf]  ;;  %418 = vmatpush.bf16.msra.mxu3 %v3886_v25  ;;  %v3870_v38 = vor.u32 %v5588_v31, %v3867_v32  ;;  %v3843_v39 = vld [vmem:[#allocation6 + $0x90] sm:$0xf0]  ;;  %v3849_v40 = vld [vmem:[#allocation6 + $0x88] sm:$0xf]  ;;  %v3842_v44 = vor.u32 %v5585_v36, %v3841_v35 }
  0x30   :  { %v5586_v41 = vld [vmem:[#allocation6 + $0x94] sm:$0xf0]  ;;  %v5584_v42 = vld [vmem:[#allocation6 + $0x8c] sm:$0xf]  ;;  %v3851_v43 = vld [vmem:[#allocation6 + $0x98] sm:$0xf0]  ;;  %v3846_v45 = vor.u32 %v5583_v37, %v3843_v39 }
  0x31   :  { %380 = vmatpush.bf16.msra.mxu0 %v3858_v29  ;;  %v3850_v46 = vor.u32 %v5586_v41, %v3849_v40  ;;  %v3825_v47 = vld [vmem:[#allocation6 + $0x60] sm:$0xf]  ;;  %v5581_v48 = vld [vmem:[#allocation6 + $0x6c] sm:$0xf0]  ;;  %v5579_v49 = vld [vmem:[#allocation6 + $0x64] sm:$0xf]  ;;  %v3854_v50 = vor.u32 %v5584_v42, %v3851_v43 }
  0x32   :  { %393 = vmatpush.bf16.msra.mxu1 %v3862_v33  ;;  %v3827_v51 = vld [vmem:[#allocation6 + $0x70] sm:$0xf0]  ;;  %v3833_v52 = vld [vmem:[#allocation6 + $0x68] sm:$0xf]  ;;  %v5582_v53 = vld [vmem:[#allocation6 + $0x74] sm:$0xf0]  ;;  %v3826_v56 = vor.u32 %v5581_v48, %v3825_v47 }
  0x33   :  { %406 = vmatpush.bf16.msra.mxu2 %v3866_v34  ;;  %419 = vmatpush.bf16.msra.mxu3 %v3870_v38  ;;  %v5580_v54 = vld [vmem:[#allocation6 + $0x6c] sm:$0xf]  ;;  %v3835_v55 = vld [vmem:[#allocation6 + $0x78] sm:$0xf0]  ;;  %v3830_v57 = vor.u32 %v5579_v49, %v3827_v51  ;;  %v3834_v58 = vor.u32 %v5582_v53, %v3833_v52  ;;  %v3809_v59 = vld [vmem:[#allocation6 + $0x40] sm:$0xf] }
  0x34   :  { %v5577_v60 = vld [vmem:[#allocation6 + $0x4c] sm:$0xf0]  ;;  %v5575_v61 = vld [vmem:[#allocation6 + $0x44] sm:$0xf]  ;;  %v3838_v62 = vor.u32 %v5580_v54, %v3835_v55  ;;  %v3811_v63 = vld [vmem:[#allocation6 + $0x50] sm:$0xf0] }
  0x35   :  { %381 = vmatpush.bf16.msra.mxu0 %v3842_v44  ;;  %v3817_v0 = vld [vmem:[#allocation6 + $0x48] sm:$0xf]  ;;  %v5578_v1 = vld [vmem:[#allocation6 + $0x54] sm:$0xf0]  ;;  %v5576_v2 = vld [vmem:[#allocation6 + $0x4c] sm:$0xf]  ;;  %v3810_v4 = vor.u32 %v5577_v60, %v3809_v59  ;;  %v3814_v5 = vor.u32 %v5575_v61, %v3811_v63 }
  0x36   :  { %394 = vmatpush.bf16.msra.mxu1 %v3846_v45  ;;  %v3819_v3 = vld [vmem:[#allocation6 + $0x58] sm:$0xf0]  ;;  %v3818_v6 = vor.u32 %v5578_v1, %v3817_v0  ;;  %v3793_v7 = vld [vmem:[#allocation6 + $0x20] sm:$0xf]  ;;  %v5573_v8 = vld [vmem:[#allocation6 + $0x2c] sm:$0xf0] }
  0x37   :  { %407 = vmatpush.bf16.msra.mxu2 %v3850_v46  ;;  %420 = vmatpush.bf16.msra.mxu3 %v3854_v50  ;;  %v5571_v9 = vld [vmem:[#allocation6 + $0x24] sm:$0xf]  ;;  %v3822_v10 = vor.u32 %v5576_v2, %v3819_v3  ;;  %v3795_v11 = vld [vmem:[#allocation6 + $0x30] sm:$0xf0]  ;;  %v3801_v12 = vld [vmem:[#allocation6 + $0x28] sm:$0xf]  ;;  %v3794_v16 = vor.u32 %v5573_v8, %v3793_v7 }
  0x38   :  { %v5574_v13 = vld [vmem:[#allocation6 + $0x34] sm:$0xf0]  ;;  %v5572_v14 = vld [vmem:[#allocation6 + $0x2c] sm:$0xf]  ;;  %v3803_v15 = vld [vmem:[#allocation6 + $0x38] sm:$0xf0]  ;;  %v3798_v18 = vor.u32 %v5571_v9, %v3795_v11 }
  0x39   :  { %382 = vmatpush.bf16.msra.mxu0 %v3826_v56  ;;  %v3777_v17 = vld [vmem:[#allocation6] sm:$0xf]  ;;  %v3802_v19 = vor.u32 %v5574_v13, %v3801_v12  ;;  %v5569_v20 = vld [vmem:[#allocation6 + $0xc] sm:$0xf0]  ;;  %v5567_v21 = vld [vmem:[#allocation6 + $0x4] sm:$0xf]  ;;  %v3806_v23 = vor.u32 %v5572_v14, %v3803_v15 }
  0x3a   :  { %395 = vmatpush.bf16.msra.mxu1 %v3830_v57  ;;  %v3779_v22 = vld [vmem:[#allocation6 + $0x10] sm:$0xf0]  ;;  %v3785_v24 = vld [vmem:[#allocation6 + $0x8] sm:$0xf]  ;;  %v5570_v25 = vld [vmem:[#allocation6 + $0x14] sm:$0xf0]  ;;  %v3778_v30 = vor.u32 %v5569_v20, %v3777_v17 }
  0x3b   :  { %408 = vmatpush.bf16.msra.mxu2 %v3834_v58  ;;  %421 = vmatpush.bf16.msra.mxu3 %v3838_v62  ;;  %v5568_v26 = vld [vmem:[#allocation6 + $0xc] sm:$0xf]  ;;  %v3787_v27 = vld [vmem:[#allocation6 + $0x18] sm:$0xf0]  ;;  %v4017_v28 = vld [vmem:[#allocation9 + $0xe0] sm:$0xf]  ;;  %v3782_v33 = vor.u32 %v5567_v21, %v3779_v22  ;;  %v3786_v34 = vor.u32 %v5570_v25, %v3785_v24 }
  0x3c   :  { %v5629_v29 = vld [vmem:[#allocation9 + $0xec] sm:$0xf0]  ;;  %v4145_v31 = vld [vmem:[#allocation9 + $0x1e0] sm:$0xf]  ;;  %v3790_v35 = vor.u32 %v5568_v26, %v3787_v27  ;;  %v175_v44 = vld [vmem:[#allocation3] sm:$0xf] }
  0x3d   :  { %383 = vmatpush.bf16.msra.mxu0 %v3810_v4  ;;  %v5661_v32 = vld [vmem:[#allocation9 + $0x1ec] sm:$0xf0]  ;;  %v4018_v36 = vor.u32 %v5629_v29, %v4017_v28  ;;  %v4001_v37 = vld [vmem:[#allocation9 + $0xc0] sm:$0xf]  ;;  %s6299_s19 = smov [#allocation18]  }
  0x3e   :  { %396 = vmatpush.bf16.msra.mxu1 %v3814_v5  ;;  %v4273_v38 = vld [vmem:[#allocation9 + $0x2e0] sm:$0xf]  ;;  %v5693_v39 = vld [vmem:[#allocation9 + $0x2ec] sm:$0xf0]  ;;  %v4146_v40 = vor.u32 %v5661_v32, %v4145_v31  ;;  %s3759_s20 = sshll.u32 %s6299_s19, 4  ;;  %s3760_s20 = int_to_ptr.vmem [resolvable:$true] %s3759_s20 }
  0x3f   :  { %409 = vmatpush.bf16.msra.mxu2 %v3818_v6  ;;  %422 = vmatpush.bf16.msra.mxu3 %v3822_v10  ;;  %v5625_v41 = vld [vmem:[#allocation9 + $0xcc] sm:$0xf0]  ;;  %v4401_v42 = vld [vmem:[#allocation9 + $0x3e0] sm:$0xf]  ;;  %v4274_v47 = vor.u32 %v5693_v39, %v4273_v38 }
  0x40   :  { %v5725_v43 = vld [vmem:[#allocation9 + $0x3ec] sm:$0xf0]  ;;  %v4129_v45 = vld [vmem:[#allocation9 + $0x1c0] sm:$0xf]  ;;  %v4002_v48 = vor.u32 %v5625_v41, %v4001_v37 }
  0x41   :  { %384 = vmatpush.bf16.msra.mxu0 %v3794_v16  ;;  %v5657_v46 = vld [vmem:[#allocation9 + $0x1cc] sm:$0xf0]  ;;  %v4402_v49 = vor.u32 %v5725_v43, %v4401_v42  ;;  %v3985_v50 = vld [vmem:[#allocation9 + $0xa0] sm:$0xf] }
  0x42   :  { %397 = vmatpush.bf16.msra.mxu1 %v3798_v18  ;;  %v4257_v51 = vld [vmem:[#allocation9 + $0x2c0] sm:$0xf]  ;;  %v5689_v52 = vld [vmem:[#allocation9 + $0x2cc] sm:$0xf0]  ;;  %v4130_v53 = vor.u32 %v5657_v46, %v4129_v45 }
  0x43   :  { %410 = vmatpush.bf16.msra.mxu2 %v3802_v19  ;;  %423 = vmatpush.bf16.msra.mxu3 %v3806_v23  ;;  %v5621_v54 = vld [vmem:[#allocation9 + $0xac] sm:$0xf0]  ;;  %v4385_v55 = vld [vmem:[#allocation9 + $0x3c0] sm:$0xf]  ;;  %v4258_v59 = vor.u32 %v5689_v52, %v4257_v51 }
  0x44   :  { %v5721_v56 = vld [vmem:[#allocation9 + $0x3cc] sm:$0xf0]  ;;  %v4113_v57 = vld [vmem:[#allocation9 + $0x1a0] sm:$0xf]  ;;  %v3986_v60 = vor.u32 %v5621_v54, %v3985_v50 }
  0x45   :  { %385 = vmatpush.bf16.msra.mxu0 %v3778_v30  ;;  %v5653_v58 = vld [vmem:[#allocation9 + $0x1ac] sm:$0xf0]  ;;  %v4386_v61 = vor.u32 %v5721_v56, %v4385_v55  ;;  %v3969_v62 = vld [vmem:[#allocation9 + $0x80] sm:$0xf]  ;;  %v5627_v55 = vld [vmem:[#allocation9 + $0xe4] sm:$0xf] }
  0x46   :  { %398 = vmatpush.bf16.msra.mxu1 %v3782_v33  ;;  %v4241_v63 = vld [vmem:[#allocation9 + $0x2a0] sm:$0xf]  ;;  %v5685_v0 = vld [vmem:[#allocation9 + $0x2ac] sm:$0xf0]  ;;  %v4114_v1 = vor.u32 %v5653_v58, %v4113_v57  ;;  %v4019_v56 = vld [vmem:[#allocation9 + $0xf0] sm:$0xf0] }
  0x47   :  { %411 = vmatpush.bf16.msra.mxu2 %v3786_v34  ;;  %424 = vmatpush.bf16.msra.mxu3 %v3790_v35  ;;  %v5617_v2 = vld [vmem:[#allocation9 + $0x8c] sm:$0xf0]  ;;  %v4369_v3 = vld [vmem:[#allocation9 + $0x3a0] sm:$0xf]  ;;  %v4242_v7 = vor.u32 %v5685_v0, %v4241_v63  ;;  %v5659_v57 = vld [vmem:[#allocation9 + $0x1e4] sm:$0xf] }
  0x48   :  { %386 = vmatmul.bf16.vlgmr.msra.gmra.mxu0 %v175_v44  ;;  %v5717_v4 = vld [vmem:[#allocation9 + $0x3ac] sm:$0xf0]  ;;  %v4097_v5 = vld [vmem:[#allocation9 + $0x180] sm:$0xf]  ;;  %v3970_v8 = vor.u32 %v5617_v2, %v3969_v62  ;;  %v4147_v58 = vld [vmem:[#allocation9 + $0x1f0] sm:$0xf0] }
  0x49   :  { %1216 = vmatpush.bf16.msrb.mxu0 %v4018_v36  ;;  %399 = vmatmul.bf16.vlgmr.msra.gmra.mxu1 %v175_v44  ;;  %v5649_v6 = vld [vmem:[#allocation9 + $0x18c] sm:$0xf0]  ;;  %v4370_v9 = vor.u32 %v5717_v4, %v4369_v3  ;;  %v3953_v10 = vld [vmem:[#allocation9 + $0x60] sm:$0xf]  ;;  %v5623_v62 = vld [vmem:[#allocation9 + $0xc4] sm:$0xf]  ;;  %v4022_v3 = vor.u32 %v5627_v55, %v4019_v56 }
  0x4a   :  { %1229 = vmatpush.bf16.msrb.mxu1 %v4146_v40  ;;  %412 = vmatmul.bf16.vlgmr.msra.gmra.mxu2 %v175_v44  ;;  %v4225_v11 = vld [vmem:[#allocation9 + $0x280] sm:$0xf]  ;;  %v5681_v12 = vld [vmem:[#allocation9 + $0x28c] sm:$0xf0]  ;;  %v4098_v13 = vor.u32 %v5649_v6, %v4097_v5  ;;  %v5691_v5 = vld [vmem:[#allocation9 + $0x2e4] sm:$0xf] }
  0x4b   :  { %425 = vmatmul.bf16.vlgmr.msra.gmra.mxu3 %v175_v44  ;;  %1242 = vmatpush.bf16.msrb.mxu2 %v4274_v47  ;;  %v5613_v14 = vld [vmem:[#allocation9 + $0x6c] sm:$0xf0]  ;;  %v4353_v15 = vld [vmem:[#allocation9 + $0x380] sm:$0xf]  ;;  %v4226_v19 = vor.u32 %v5681_v12, %v4225_v11  ;;  %v4275_v6 = vld [vmem:[#allocation9 + $0x2f0] sm:$0xf0] }
  0x4c   :  { %1255 = vmatpush.bf16.msrb.mxu3 %v4402_v49  ;;  %v5713_v16 = vld [vmem:[#allocation9 + $0x38c] sm:$0xf0]  ;;  %v4081_v17 = vld [vmem:[#allocation9 + $0x160] sm:$0xf]  ;;  %v3954_v20 = vor.u32 %v5613_v14, %v3953_v10  ;;  %v4403_v10 = vld [vmem:[#allocation9 + $0x3f0] sm:$0xf0] }
  0x4d   :  { %1217 = vmatpush.bf16.msrb.mxu0 %v4002_v48  ;;  %v5645_v18 = vld [vmem:[#allocation9 + $0x16c] sm:$0xf0]  ;;  %v4354_v21 = vor.u32 %v5713_v16, %v4353_v15  ;;  %v3937_v22 = vld [vmem:[#allocation9 + $0x40] sm:$0xf]  ;;  %v5655_v11 = vld [vmem:[#allocation9 + $0x1c4] sm:$0xf]  ;;  %v4278_v15 = vor.u32 %v5691_v5, %v4275_v6 }
  0x4e   :  { %1230 = vmatpush.bf16.msrb.mxu1 %v4130_v53  ;;  %v4209_v23 = vld [vmem:[#allocation9 + $0x260] sm:$0xf]  ;;  %v5677_v24 = vld [vmem:[#allocation9 + $0x26c] sm:$0xf0]  ;;  %v4082_v25 = vor.u32 %v5645_v18, %v4081_v17  ;;  %v4131_v12 = vld [vmem:[#allocation9 + $0x1d0] sm:$0xf0] }
  0x4f   :  { %1243 = vmatpush.bf16.msrb.mxu2 %v4258_v59  ;;  %v5609_v26 = vld [vmem:[#allocation9 + $0x4c] sm:$0xf0]  ;;  %v4337_v27 = vld [vmem:[#allocation9 + $0x360] sm:$0xf]  ;;  %v4210_v31 = vor.u32 %v5677_v24, %v4209_v23  ;;  %v5619_v18 = vld [vmem:[#allocation9 + $0xa4] sm:$0xf] }
  0x50   :  { %1256 = vmatpush.bf16.msrb.mxu3 %v4386_v61  ;;  %v5709_v28 = vld [vmem:[#allocation9 + $0x36c] sm:$0xf0]  ;;  %v4065_v29 = vld [vmem:[#allocation9 + $0x140] sm:$0xf]  ;;  %v3938_v32 = vor.u32 %v5609_v26, %v3937_v22  ;;  %v3987_v22 = vld [vmem:[#allocation9 + $0xb0] sm:$0xf0] }
  0x51   :  { %1218 = vmatpush.bf16.msrb.mxu0 %v3986_v60  ;;  %v5641_v30 = vld [vmem:[#allocation9 + $0x14c] sm:$0xf0]  ;;  %v4338_v33 = vor.u32 %v5709_v28, %v4337_v27  ;;  %v3921_v34 = vld [vmem:[#allocation9 + $0x20] sm:$0xf]  ;;  %v5719_v23 = vld [vmem:[#allocation9 + $0x3c4] sm:$0xf]  ;;  %v3990_v28 = vor.u32 %v5619_v18, %v3987_v22 }
  0x52   :  { %1231 = vmatpush.bf16.msrb.mxu1 %v4114_v1  ;;  %v4193_v35 = vld [vmem:[#allocation9 + $0x240] sm:$0xf]  ;;  %v5673_v36 = vld [vmem:[#allocation9 + $0x24c] sm:$0xf0]  ;;  %v4066_v37 = vor.u32 %v5641_v30, %v4065_v29  ;;  %v4387_v24 = vld [vmem:[#allocation9 + $0x3d0] sm:$0xf0] }
  0x53   :  { %1244 = vmatpush.bf16.msrb.mxu2 %v4242_v7  ;;  %v5605_v38 = vld [vmem:[#allocation9 + $0x2c] sm:$0xf0]  ;;  %v4321_v39 = vld [vmem:[#allocation9 + $0x340] sm:$0xf]  ;;  %v4194_v43 = vor.u32 %v5673_v36, %v4193_v35  ;;  %v4150_v7 = vor.u32 %v5659_v57, %v4147_v58  ;;  %v4115_v26 = vld [vmem:[#allocation9 + $0x1b0] sm:$0xf0]  ;;  %v4390_v29 = vor.u32 %v5719_v23, %v4387_v24 }
  0x54   :  { %1257 = vmatpush.bf16.msrb.mxu3 %v4370_v9  ;;  %v5705_v40 = vld [vmem:[#allocation9 + $0x34c] sm:$0xf0]  ;;  %v4049_v41 = vld [vmem:[#allocation9 + $0x120] sm:$0xf]  ;;  %v3922_v45 = vor.u32 %v5605_v38, %v3921_v34  ;;  %v5723_v9 = vld [vmem:[#allocation9 + $0x3e4] sm:$0xf] }
  0x55   :  { %1219 = vmatpush.bf16.msrb.mxu0 %v3970_v8  ;;  %v5637_v42 = vld [vmem:[#allocation9 + $0x12c] sm:$0xf0]  ;;  %v3905_v44 = vld [vmem:[#allocation9] sm:$0xf]  ;;  %v4322_v46 = vor.u32 %v5705_v40, %v4321_v39  ;;  %v4003_v8 = vld [vmem:[#allocation9 + $0xd0] sm:$0xf0]  ;;  %v4406_v17 = vor.u32 %v5723_v9, %v4403_v10 }
  0x56   :  { %1232 = vmatpush.bf16.msrb.mxu1 %v4098_v13  ;;  %v5601_v47 = vld [vmem:[#allocation9 + $0xc] sm:$0xf0]  ;;  %v4177_v48 = vld [vmem:[#allocation9 + $0x220] sm:$0xf]  ;;  %v4050_v50 = vor.u32 %v5637_v42, %v4049_v41  ;;  %v4006_v16 = vor.u32 %v5623_v62, %v4003_v8  ;;  %v5615_v30 = vld [vmem:[#allocation9 + $0x84] sm:$0xf] }
  0x57   :  { %1245 = vmatpush.bf16.msrb.mxu2 %v4226_v19  ;;  %v5669_v49 = vld [vmem:[#allocation9 + $0x22c] sm:$0xf0]  ;;  %v4033_v51 = vld [vmem:[#allocation9 + $0x100] sm:$0xf]  ;;  %v3906_v60 = vor.u32 %v5601_v47, %v3905_v44  ;;  %v5687_v19 = vld [vmem:[#allocation9 + $0x2c4] sm:$0xf] }
  0x58   :  { %1258 = vmatpush.bf16.msrb.mxu3 %v4354_v21  ;;  %v4305_v52 = vld [vmem:[#allocation9 + $0x320] sm:$0xf]  ;;  %v5701_v53 = vld [vmem:[#allocation9 + $0x32c] sm:$0xf0]  ;;  %v4178_v59 = vor.u32 %v5669_v49, %v4177_v48  ;;  %v4134_v21 = vor.u32 %v5655_v11, %v4131_v12  ;;  %v3971_v34 = vld [vmem:[#allocation9 + $0x90] sm:$0xf0] }
  0x59   :  { %1220 = vmatpush.bf16.msrb.mxu0 %v3954_v20  ;;  %v5633_v54 = vld [vmem:[#allocation9 + $0x10c] sm:$0xf0]  ;;  %v4306_v61 = vor.u32 %v5701_v53, %v4305_v52  ;;  %v4161_v63 = vld [vmem:[#allocation9 + $0x200] sm:$0xf]  ;;  %v4259_v20 = vld [vmem:[#allocation9 + $0x2d0] sm:$0xf0]  ;;  %v3974_v40 = vor.u32 %v5615_v30, %v3971_v34 }
  0x5a   :  { %1233 = vmatpush.bf16.msrb.mxu1 %v4082_v25  ;;  %v5665_v0 = vld [vmem:[#allocation9 + $0x20c] sm:$0xf0]  ;;  %v4289_v1 = vld [vmem:[#allocation9 + $0x300] sm:$0xf]  ;;  %v4034_v2 = vor.u32 %v5633_v54, %v4033_v51  ;;  %v5651_v25 = vld [vmem:[#allocation9 + $0x1a4] sm:$0xf]  ;;  %v4262_v27 = vor.u32 %v5687_v19, %v4259_v20 }
  0x5b   :  { %1246 = vmatpush.bf16.msrb.mxu2 %v4210_v31  ;;  %v5697_v4 = vld [vmem:[#allocation9 + $0x30c] sm:$0xf0]  ;;  %v4162_v13 = vor.u32 %v5665_v0, %v4161_v63  ;;  %v5683_v31 = vld [vmem:[#allocation9 + $0x2a4] sm:$0xf]  ;;  %v4371_v36 = vld [vmem:[#allocation9 + $0x3b0] sm:$0xf0] }
  0x5c   :  { %1259 = vmatpush.bf16.msrb.mxu3 %v4338_v33  ;;  %v4290_v14 = vor.u32 %v5697_v4, %v4289_v1  ;;  %v4118_v33 = vor.u32 %v5651_v25, %v4115_v26  ;;  %v5715_v35 = vld [vmem:[#allocation9 + $0x3a4] sm:$0xf]  ;;  %v4099_v38 = vld [vmem:[#allocation9 + $0x190] sm:$0xf0] }
  0x5d   :  { %1221 = vmatpush.bf16.msrb.mxu0 %v3938_v32  ;;  %v4243_v32 = vld [vmem:[#allocation9 + $0x2b0] sm:$0xf0]  ;;  %v4374_v41 = vor.u32 %v5715_v35, %v4371_v36  ;;  %v5611_v42 = vld [vmem:[#allocation9 + $0x64] sm:$0xf] }
  0x5e   :  { %1234 = vmatpush.bf16.msrb.mxu1 %v4066_v37  ;;  %v5647_v37 = vld [vmem:[#allocation9 + $0x184] sm:$0xf]  ;;  %v4246_v39 = vor.u32 %v5683_v31, %v4243_v32  ;;  %v4227_v44 = vld [vmem:[#allocation9 + $0x290] sm:$0xf0] }
  0x5f   :  { %1247 = vmatpush.bf16.msrb.mxu2 %v4194_v43  ;;  %v5679_v43 = vld [vmem:[#allocation9 + $0x284] sm:$0xf]  ;;  %v4355_v48 = vld [vmem:[#allocation9 + $0x390] sm:$0xf0] }
  0x60   :  { %1260 = vmatpush.bf16.msrb.mxu3 %v4322_v46  ;;  %v3955_v46 = vld [vmem:[#allocation9 + $0x70] sm:$0xf0]  ;;  %v5711_v47 = vld [vmem:[#allocation9 + $0x384] sm:$0xf]  ;;  %v4230_v51 = vor.u32 %v5679_v43, %v4227_v44  ;;  %v5662_v43 = vld [vmem:[#allocation9 + $0x1f4] sm:$0xf0] }
  0x61   :  { %1222 = vmatpush.bf16.msrb.mxu0 %v3922_v45  ;;  %v4102_v45 = vor.u32 %v5647_v37, %v4099_v38  ;;  %v5643_v49 = vld [vmem:[#allocation9 + $0x164] sm:$0xf]  ;;  %v3958_v52 = vor.u32 %v5611_v42, %v3955_v46  ;;  %v4358_v53 = vor.u32 %v5711_v47, %v4355_v48  ;;  %v3939_v56 = vld [vmem:[#allocation9 + $0x50] sm:$0xf0]  ;;  %v4153_v42 = vld [vmem:[#allocation9 + $0x1e8] sm:$0xf] }
  0x62   :  { %1235 = vmatpush.bf16.msrb.mxu1 %v4050_v50  ;;  %v4083_v50 = vld [vmem:[#allocation9 + $0x170] sm:$0xf0]  ;;  %v5607_v55 = vld [vmem:[#allocation9 + $0x44] sm:$0xf] }
  0x63   :  { %1248 = vmatpush.bf16.msrb.mxu2 %v4178_v59  ;;  %v4086_v54 = vor.u32 %v5643_v49, %v4083_v50  ;;  %v5639_v57 = vld [vmem:[#allocation9 + $0x144] sm:$0xf]  ;;  %v4067_v58 = vld [vmem:[#allocation9 + $0x150] sm:$0xf0]  ;;  %v3942_v59 = vor.u32 %v5607_v55, %v3939_v56  ;;  %v4154_v50 = vor.u32 %v5662_v43, %v4153_v42  ;;  %v5658_v55 = vld [vmem:[#allocation9 + $0x1d4] sm:$0xf0] }
  0x64   :  { %1261 = vmatpush.bf16.msrb.mxu3 %v4306_v61  ;;  %v5675_v61 = vld [vmem:[#allocation9 + $0x264] sm:$0xf]  ;;  %v4211_v62 = vld [vmem:[#allocation9 + $0x270] sm:$0xf0] }
  0x65   :  { %1223 = vmatpush.bf16.msrb.mxu0 %v3906_v60  ;;  %v4070_v60 = vor.u32 %v5639_v57, %v4067_v58  ;;  %v5707_v63 = vld [vmem:[#allocation9 + $0x364] sm:$0xf]  ;;  %v4214_v0 = vor.u32 %v5675_v61, %v4211_v62  ;;  %v4339_v1 = vld [vmem:[#allocation9 + $0x370] sm:$0xf0]  ;;  %v4281_v61 = vld [vmem:[#allocation9 + $0x2e8] sm:$0xf] }
  0x66   :  { %1236 = vmatpush.bf16.msrb.mxu1 %v4034_v2  ;;  %v4342_v2 = vor.u32 %v5707_v63, %v4339_v1  ;;  %v3923_v4 = vld [vmem:[#allocation9 + $0x30] sm:$0xf0]  ;;  %v5635_v6 = vld [vmem:[#allocation9 + $0x124] sm:$0xf]  ;;  %v5694_v62 = vld [vmem:[#allocation9 + $0x2f4] sm:$0xf0] }
  0x67   :  { %1249 = vmatpush.bf16.msrb.mxu2 %v4162_v13  ;;  %v5671_v9 = vld [vmem:[#allocation9 + $0x244] sm:$0xf]  ;;  %v4195_v10 = vld [vmem:[#allocation9 + $0x250] sm:$0xf0]  ;;  %v4409_v63 = vld [vmem:[#allocation9 + $0x3e8] sm:$0xf] }
  0x68   :  { %1262 = vmatpush.bf16.msrb.mxu3 %v4290_v14  ;;  %v5703_v11 = vld [vmem:[#allocation9 + $0x344] sm:$0xf]  ;;  %v4198_v12 = vor.u32 %v5671_v9, %v4195_v10  ;;  %v4323_v13 = vld [vmem:[#allocation9 + $0x350] sm:$0xf0]  ;;  %v4282_v10 = vor.u32 %v5694_v62, %v4281_v61  ;;  %v5606_v61 = vld [vmem:[#allocation9 + $0x34] sm:$0xf0] }
  0x69   :  { %1268 = vmatpush.bf16.msra.mxu0 %v4022_v3  ;;  %v5603_v3 = vld [vmem:[#allocation9 + $0x24] sm:$0xf]  ;;  %v4326_v14 = vor.u32 %v5703_v11, %v4323_v13  ;;  %v4035_v19 = vld [vmem:[#allocation9 + $0x110] sm:$0xf0]  ;;  %v4057_v62 = vld [vmem:[#allocation9 + $0x128] sm:$0xf] }
  0x6a   :  { %1281 = vmatpush.bf16.msra.mxu1 %v4150_v7  ;;  %v3926_v5 = vor.u32 %v5603_v3, %v3923_v4  ;;  %v4051_v7 = vld [vmem:[#allocation9 + $0x130] sm:$0xf0]  ;;  %v5699_v24 = vld [vmem:[#allocation9 + $0x324] sm:$0xf]  ;;  %v5726_v3 = vld [vmem:[#allocation9 + $0x3f4] sm:$0xf0] }
  0x6b   :  { %1294 = vmatpush.bf16.msra.mxu2 %v4278_v15  ;;  %v4054_v8 = vor.u32 %v5635_v6, %v4051_v7  ;;  %v5599_v15 = vld [vmem:[#allocation9 + $0x4] sm:$0xf]  ;;  %v4179_v22 = vld [vmem:[#allocation9 + $0x230] sm:$0xf0]  ;;  %v3993_v4 = vld [vmem:[#allocation9 + $0xa8] sm:$0xf] }
  0x6c   :  { %1307 = vmatpush.bf16.msra.mxu3 %v4406_v17  ;;  %v5631_v17 = vld [vmem:[#allocation9 + $0x104] sm:$0xf]  ;;  %v4307_v25 = vld [vmem:[#allocation9 + $0x330] sm:$0xf0]  ;;  %v4121_v7 = vld [vmem:[#allocation9 + $0x1a8] sm:$0xf] }
  0x6d   :  { %1269 = vmatpush.bf16.msra.mxu0 %v4006_v16  ;;  %v3907_v16 = vld [vmem:[#allocation9 + $0x10] sm:$0xf0]  ;;  %v4038_v20 = vor.u32 %v5631_v17, %v4035_v19  ;;  %v4310_v26 = vor.u32 %v5699_v24, %v4307_v25  ;;  %v5695_v30 = vld [vmem:[#allocation9 + $0x304] sm:$0xf]  ;;  %v5722_v19 = vld [vmem:[#allocation9 + $0x3d4] sm:$0xf0] }
  0x6e   :  { %1282 = vmatpush.bf16.msra.mxu1 %v4134_v21  ;;  %v3910_v18 = vor.u32 %v5599_v15, %v3907_v16  ;;  %v5667_v21 = vld [vmem:[#allocation9 + $0x224] sm:$0xf]  ;;  %v4291_v31 = vld [vmem:[#allocation9 + $0x310] sm:$0xf0]  ;;  %v5690_v15 = vld [vmem:[#allocation9 + $0x2d4] sm:$0xf0] }
  0x6f   :  { %1295 = vmatpush.bf16.msra.mxu2 %v4262_v27  ;;  %v4182_v23 = vor.u32 %v5667_v21, %v4179_v22  ;;  %v5663_v27 = vld [vmem:[#allocation9 + $0x204] sm:$0xf]  ;;  %v4294_v32 = vor.u32 %v5695_v30, %v4291_v31  ;;  %v4393_v16 = vld [vmem:[#allocation9 + $0x3c8] sm:$0xf]  ;;  %v5618_v21 = vld [vmem:[#allocation9 + $0x94] sm:$0xf0] }
  0x70   :  { %1308 = vmatpush.bf16.msra.mxu3 %v4390_v29  ;;  %v4105_v22 = vld [vmem:[#allocation9 + $0x188] sm:$0xf]  ;;  %v5686_v30 = vld [vmem:[#allocation9 + $0x2b4] sm:$0xf0] }
  0x71   :  { %1270 = vmatpush.bf16.msra.mxu0 %v3990_v28  ;;  %v4163_v28 = vld [vmem:[#allocation9 + $0x210] sm:$0xf0] }
  0x72   :  { %1283 = vmatpush.bf16.msra.mxu1 %v4118_v33  ;;  %v4166_v29 = vor.u32 %v5663_v27, %v4163_v28  ;;  %v208_v33 = vld [vmem:[#allocation8] sm:$0xf]  ;;  %v4394_v27 = vor.u32 %v5722_v19, %v4393_v16  ;;  %v5660_v16 = vld [vmem:[#allocation9 + $0x1ec] sm:$0xf] }
  0x73   :  { %1296 = vmatpush.bf16.msra.mxu2 %v4246_v39  ;;  %v210_v34 = vperm.slane %v208_v33, 0  ;;  %v211_v35 = vperm.slane %v208_v33, 1  ;;  %v4025_v39 = vld [vmem:[#allocation9 + $0xe8] sm:$0xf]  ;;  %v212_v46 = vperm.slane %v208_v33, 2  ;;  %v213_v49 = vperm.slane %v208_v33, 3 }
  0x74   :  { %1309 = vmatpush.bf16.msra.mxu3 %v4374_v41  ;;  %v5718_v33 = vld [vmem:[#allocation9 + $0x3b4] sm:$0xf0] }
  0x75   :  { %1271 = vmatpush.bf16.msra.mxu0 %v3974_v40  ;;  %v5630_v40 = vld [vmem:[#allocation9 + $0xf4] sm:$0xf0] }
  0x76   :  { %1284 = vmatpush.bf16.msra.mxu1 %v4102_v45  ;;  %v4026_v47 = vor.u32 %v5630_v40, %v4025_v39  ;;  %v4233_v40 = vld [vmem:[#allocation9 + $0x288] sm:$0xf] }
  0x77   :  { %1297 = vmatpush.bf16.msra.mxu2 %v4230_v51  ;;  %v4009_v51 = vld [vmem:[#allocation9 + $0xc8] sm:$0xf] }
  0x78   :  { %1310 = vmatpush.bf16.msra.mxu3 %v4358_v53 }
  0x79   :  { %1272 = vmatpush.bf16.msra.mxu0 %v3958_v52  ;;  %v5626_v52 = vld [vmem:[#allocation9 + $0xd4] sm:$0xf0] }
  0x7a   :  { %1285 = vmatpush.bf16.msra.mxu1 %v4086_v54  ;;  %v4137_v54 = vld [vmem:[#allocation9 + $0x1c8] sm:$0xf] }
  0x7b   :  { %1298 = vmatpush.bf16.msra.mxu2 %v4214_v0 }
  0x7c   :  { %1311 = vmatpush.bf16.msra.mxu3 %v4342_v2  ;;  %v4138_v2 = vor.u32 %v5658_v55, %v4137_v54  ;;  %v4217_v54 = vld [vmem:[#allocation9 + $0x268] sm:$0xf]  ;;  %v5678_v55 = vld [vmem:[#allocation9 + $0x274] sm:$0xf0] }
  0x7d   :  { %1273 = vmatpush.bf16.msra.mxu0 %v3942_v59 }
  0x7e   :  { %1286 = vmatpush.bf16.msra.mxu1 %v4070_v60  ;;  %v4010_v60 = vor.u32 %v5626_v52, %v4009_v51 }
  0x7f   :  { %1299 = vmatpush.bf16.msra.mxu2 %v4198_v12  ;;  %v4410_v12 = vor.u32 %v5726_v3, %v4409_v63  ;;  %v5638_v63 = vld [vmem:[#allocation9 + $0x134] sm:$0xf0] }
  0x80   :  { %1312 = vmatpush.bf16.msra.mxu3 %v4326_v14  ;;  %v4265_v14 = vld [vmem:[#allocation9 + $0x2c8] sm:$0xf]  ;;  %v5674_v3 = vld [vmem:[#allocation9 + $0x254] sm:$0xf0] }
  0x81   :  { %1274 = vmatpush.bf16.msra.mxu0 %v3926_v5  ;;  %v5622_v5 = vld [vmem:[#allocation9 + $0xb4] sm:$0xf0]  ;;  %v4266_v25 = vor.u32 %v5690_v15, %v4265_v14  ;;  %v4027_v15 = vld [vmem:[#allocation9 + $0xf8] sm:$0xf0] }
  0x82   :  { %1287 = vmatpush.bf16.msra.mxu1 %v4054_v8  ;;  %v5654_v8 = vld [vmem:[#allocation9 + $0x1b4] sm:$0xf0]  ;;  %v3994_v13 = vor.u32 %v5622_v5, %v3993_v4  ;;  %v4329_v4 = vld [vmem:[#allocation9 + $0x348] sm:$0xf] }
  0x83   :  { %1300 = vmatpush.bf16.msra.mxu2 %v4182_v23  ;;  %v5650_v23 = vld [vmem:[#allocation9 + $0x194] sm:$0xf0] }
  0x84   :  { %1313 = vmatpush.bf16.msra.mxu3 %v4310_v26  ;;  %v4106_v31 = vor.u32 %v5650_v23, %v4105_v22 }
  0x85   :  { %1275 = vmatpush.bf16.msra.mxu0 %v3910_v18  ;;  %v4122_v18 = vor.u32 %v5654_v8, %v4121_v7  ;;  %v5706_v7 = vld [vmem:[#allocation9 + $0x354] sm:$0xf0]  ;;  %v3913_v8 = vld [vmem:[#allocation9 + $0x8] sm:$0xf] }
  0x86   :  { %1288 = vmatpush.bf16.msra.mxu1 %v4038_v20  ;;  %v3977_v20 = vld [vmem:[#allocation9 + $0x88] sm:$0xf]  ;;  %v4330_v19 = vor.u32 %v5706_v7, %v4329_v4  ;;  %v4379_v7 = vld [vmem:[#allocation9 + $0x3b8] sm:$0xf0] }
  0x87   :  { %1301 = vmatpush.bf16.msra.mxu2 %v4166_v29  ;;  %v3978_v28 = vor.u32 %v5618_v21, %v3977_v20  ;;  %v4249_v29 = vld [vmem:[#allocation9 + $0x2a8] sm:$0xf]  ;;  %v5670_v21 = vld [vmem:[#allocation9 + $0x234] sm:$0xf0] }
  0x88   :  { %1314 = vmatpush.bf16.msra.mxu3 %v4294_v32  ;;  %v4377_v32 = vld [vmem:[#allocation9 + $0x3a8] sm:$0xf] }
  0x89   :  { %v4378_v39 = vor.u32 %v5718_v33, %v4377_v32  ;;  %v4185_v20 = vld [vmem:[#allocation9 + $0x228] sm:$0xf]  ;;  %v4139_v32 = vld [vmem:[#allocation9 + $0x1d8] sm:$0xf0] }
  0xc5   :  { %v387_v36 = vpop.f32.mrf.mxu0 }
  0xc6   :  { %v388_v37 = vadd.f32 %v387_v36, %v210_v34  ;;  %v400_v38 = vpop.f32.mrf.mxu1  ;;  %v3961_v34 = vld [vmem:[#allocation9 + $0x68] sm:$0xf] }
  0xc7   :  { %v401_v41 = vadd.f32 %v400_v38, %v211_v35  ;;  %v5614_v35 = vld [vmem:[#allocation9 + $0x74] sm:$0xf0]  ;;  %v4089_v36 = vld [vmem:[#allocation9 + $0x168] sm:$0xf]  ;;  %v4250_v38 = vor.u32 %v5686_v30, %v4249_v29  ;;  %v4186_v29 = vor.u32 %v5670_v21, %v4185_v20  ;;  %v4011_v30 = vld [vmem:[#allocation9 + $0xd8] sm:$0xf0] }
  0xc8   :  { %v430_v44 = vmax.f32 %v388_v37, 0.0  ;;  %v5646_v37 = vld [vmem:[#allocation9 + $0x174] sm:$0xf0]  ;;  %v3962_v42 = vor.u32 %v5614_v35, %v3961_v34  ;;  %v4169_v34 = vld [vmem:[#allocation9 + $0x208] sm:$0xf] }
  0xc9   :  { %v431_v45 = vmax.f32 %v401_v41, 0.0  ;;  %v5682_v41 = vld [vmem:[#allocation9 + $0x294] sm:$0xf0]  ;;  %v4090_v43 = vor.u32 %v5646_v37, %v4089_v36  ;;  %v4297_v36 = vld [vmem:[#allocation9 + $0x308] sm:$0xf] }
  0xca   :  { %v6399_v48 = vpack.c.bf16 %v430_v44, %v430_v44  ;;  %v4361_v44 = vld [vmem:[#allocation9 + $0x388] sm:$0xf]  ;;  %v4234_v51 = vor.u32 %v5682_v41, %v4233_v40  ;;  %v5666_v35 = vld [vmem:[#allocation9 + $0x214] sm:$0xf0]  ;;  %v5712_v20 = vld [vmem:[#allocation9 + $0x38c] sm:$0xf] }
  0xcb   :  { %v6401_v53 = vpack.c.bf16 %v431_v45, %v431_v45  ;;  %v5714_v45 = vld [vmem:[#allocation9 + $0x394] sm:$0xf0]  ;;  %v4363_v21 = vld [vmem:[#allocation9 + $0x398] sm:$0xf0] }
  0xcc   :  { %1224 = vmatmul.bf16.vlgmr.msrb.gmra.mxu0 %v6399_v48  ;;  %v4362_v52 = vor.u32 %v5714_v45, %v4361_v44  ;;  %v5698_v37 = vld [vmem:[#allocation9 + $0x314] sm:$0xf0]  ;;  %v5620_v44 = vld [vmem:[#allocation9 + $0xac] sm:$0xf]  ;;  %v4170_v45 = vor.u32 %v5666_v35, %v4169_v34  ;;  %v3931_v35 = vld [vmem:[#allocation9 + $0x38] sm:$0xf0] }
  0xcd   :  { %v413_v56 = vpop.f32.mrf.mxu2  ;;  %1237 = vmatmul.bf16.vlgmr.msrb.gmra.mxu1 %v6401_v53  ;;  %1320 = vmatpush.bf16.msrb.mxu0 %v4026_v47  ;;  %v389_v59 = vpop.f32.mrf.mxu0  ;;  %v5610_v47 = vld [vmem:[#allocation9 + $0x54] sm:$0xf0]  ;;  %v5604_v34 = vld [vmem:[#allocation9 + $0x2c] sm:$0xf] }
  0xce   :  { %v414_v57 = vadd.f32 %v413_v56, %v212_v46  ;;  %v426_v58 = vpop.f32.mrf.mxu3  ;;  %1333 = vmatpush.bf16.msrb.mxu1 %v4154_v50  ;;  %v402_v1 = vpop.f32.mrf.mxu1  ;;  %v3945_v46 = vld [vmem:[#allocation9 + $0x48] sm:$0xf]  ;;  %v5642_v50 = vld [vmem:[#allocation9 + $0x154] sm:$0xf0] }
  0xcf   :  { %v427_v0 = vadd.f32 %v426_v58, %v213_v49  ;;  %v4073_v49 = vld [vmem:[#allocation9 + $0x148] sm:$0xf]  ;;  %v3946_v56 = vor.u32 %v5610_v47, %v3945_v46  ;;  %v5710_v59 = vld [vmem:[#allocation9 + $0x374] sm:$0xf0]  ;;  %v3995_v46 = vld [vmem:[#allocation9 + $0xb8] sm:$0xf0] }
  0xd0   :  { %v432_v6 = vmax.f32 %v414_v57, 0.0  ;;  %v4074_v57 = vor.u32 %v5642_v50, %v4073_v49  ;;  %v4345_v58 = vld [vmem:[#allocation9 + $0x368] sm:$0xf]  ;;  %v5652_v47 = vld [vmem:[#allocation9 + $0x1ac] sm:$0xf]  ;;  %v4298_v50 = vor.u32 %v5698_v37, %v4297_v36 }
  0xd1   :  { %v433_v9 = vmax.f32 %v427_v0, 0.0  ;;  %1321 = vmatpush.bf16.msrb.mxu0 %v4010_v60  ;;  %v3929_v60 = vld [vmem:[#allocation9 + $0x28] sm:$0xf]  ;;  %v4218_v0 = vor.u32 %v5678_v55, %v4217_v54  ;;  %v4346_v1 = vor.u32 %v5710_v59, %v4345_v58  ;;  %v4123_v49 = vld [vmem:[#allocation9 + $0x1b8] sm:$0xf0] }
  0xd2   :  { %v6405_v11 = vpack.c.bf16 %v432_v6, %v432_v6  ;;  %1334 = vmatpush.bf16.msrb.mxu1 %v4138_v2  ;;  %v4201_v2 = vld [vmem:[#allocation9 + $0x248] sm:$0xf]  ;;  %v3930_v5 = vor.u32 %v5606_v61, %v3929_v60  ;;  %v4058_v6 = vor.u32 %v5638_v63, %v4057_v62  ;;  %v5688_v54 = vld [vmem:[#allocation9 + $0x2cc] sm:$0xf]  ;;  %v4267_v55 = vld [vmem:[#allocation9 + $0x2d8] sm:$0xf0] }
  0xd3   :  { %v6407_v17 = vpack.c.bf16 %v433_v9, %v433_v9  ;;  %v5602_v9 = vld [vmem:[#allocation9 + $0x14] sm:$0xf0]  ;;  %v4202_v14 = vor.u32 %v5674_v3, %v4201_v2  ;;  %v5720_v58 = vld [vmem:[#allocation9 + $0x3cc] sm:$0xf]  ;;  %v4395_v59 = vld [vmem:[#allocation9 + $0x3d8] sm:$0xf0] }
  0xd4   :  { %1250 = vmatmul.bf16.vlgmr.msrb.gmra.mxu2 %v6405_v11  ;;  %v3914_v22 = vor.u32 %v5602_v9, %v3913_v8  ;;  %v5616_v60 = vld [vmem:[#allocation9 + $0x8c] sm:$0xf]  ;;  %v3979_v61 = vld [vmem:[#allocation9 + $0x98] sm:$0xf0] }
  0xd5   :  { %1263 = vmatmul.bf16.vlgmr.msrb.gmra.mxu3 %v6407_v17  ;;  %1346 = vmatpush.bf16.msrb.mxu2 %v4282_v10  ;;  %v415_v24 = vpop.f32.mrf.mxu2  ;;  %v4041_v10 = vld [vmem:[#allocation9 + $0x108] sm:$0xf]  ;;  %v5648_v62 = vld [vmem:[#allocation9 + $0x18c] sm:$0xf]  ;;  %v4107_v63 = vld [vmem:[#allocation9 + $0x198] sm:$0xf0]  ;;  %v3982_v4 = vor.u32 %v5616_v60, %v3979_v61 }
  0xd6   :  { %1359 = vmatpush.bf16.msrb.mxu3 %v4410_v12  ;;  %v428_v26 = vpop.f32.mrf.mxu3  ;;  %1322 = vmatpush.bf16.msrb.mxu0 %v3994_v13  ;;  %v5634_v12 = vld [vmem:[#allocation9 + $0x114] sm:$0xf0]  ;;  %v5628_v13 = vld [vmem:[#allocation9 + $0xec] sm:$0xf]  ;;  %v4313_v24 = vld [vmem:[#allocation9 + $0x328] sm:$0xf] }
  0xd7   :  { %1335 = vmatpush.bf16.msrb.mxu1 %v4122_v18  ;;  %v4155_v18 = vld [vmem:[#allocation9 + $0x1f8] sm:$0xf0]  ;;  %v4042_v23 = vor.u32 %v5634_v12, %v4041_v10  ;;  %v4030_v26 = vor.u32 %v5628_v13, %v4027_v15  ;;  %v5684_v2 = vld [vmem:[#allocation9 + $0x2ac] sm:$0xf] }
  0xd8   :  { %v4251_v3 = vld [vmem:[#allocation9 + $0x2b8] sm:$0xf0]  ;;  %v5612_v8 = vld [vmem:[#allocation9 + $0x6c] sm:$0xf] }
  0xd9   :  { %1347 = vmatpush.bf16.msrb.mxu2 %v4266_v25  ;;  %v5702_v25 = vld [vmem:[#allocation9 + $0x334] sm:$0xf0]  ;;  %v3963_v9 = vld [vmem:[#allocation9 + $0x78] sm:$0xf0]  ;;  %v5644_v10 = vld [vmem:[#allocation9 + $0x16c] sm:$0xf]  ;;  %v4254_v13 = vor.u32 %v5684_v2, %v4251_v3 }
  0xda   :  { %1360 = vmatpush.bf16.msrb.mxu3 %v4394_v27  ;;  %1323 = vmatpush.bf16.msrb.mxu0 %v3978_v28  ;;  %v4158_v27 = vor.u32 %v5660_v16, %v4155_v18  ;;  %v5624_v28 = vld [vmem:[#allocation9 + $0xcc] sm:$0xf]  ;;  %v4314_v33 = vor.u32 %v5702_v25, %v4313_v24  ;;  %v4091_v12 = vld [vmem:[#allocation9 + $0x178] sm:$0xf0]  ;;  %v3966_v18 = vor.u32 %v5612_v8, %v3963_v9 }
  0xdb   :  { %1336 = vmatpush.bf16.msrb.mxu1 %v4106_v31  ;;  %v5656_v31 = vld [vmem:[#allocation9 + $0x1cc] sm:$0xf]  ;;  %v4014_v40 = vor.u32 %v5624_v28, %v4011_v30  ;;  %v4235_v16 = vld [vmem:[#allocation9 + $0x298] sm:$0xf0] }
  0xdc   :  { %1276 = vmatmul.bf16.vlgmr.msra.gmra.mxu0 %v6399_v48  ;;  %v4142_v41 = vor.u32 %v5656_v31, %v4139_v32  ;;  %v5680_v15 = vld [vmem:[#allocation9 + $0x28c] sm:$0xf]  ;;  %v4075_v25 = vld [vmem:[#allocation9 + $0x158] sm:$0xf0] }
  0xdd   :  { %1348 = vmatpush.bf16.msrb.mxu2 %v4250_v38  ;;  %1289 = vmatmul.bf16.vlgmr.msra.gmra.mxu1 %v6401_v53  ;;  %v5692_v38 = vld [vmem:[#allocation9 + $0x2ec] sm:$0xf]  ;;  %v4059_v37 = vld [vmem:[#allocation9 + $0x138] sm:$0xf0] }
  0xde   :  { %1361 = vmatpush.bf16.msrb.mxu3 %v4378_v39  ;;  %1324 = vmatpush.bf16.msrb.mxu0 %v3962_v42  ;;  %v4283_v39 = vld [vmem:[#allocation9 + $0x2f8] sm:$0xf0]  ;;  %v5724_v42 = vld [vmem:[#allocation9 + $0x3ec] sm:$0xf] }
  0xdf   :  { %1337 = vmatpush.bf16.msrb.mxu1 %v4090_v43  ;;  %v4411_v43 = vld [vmem:[#allocation9 + $0x3f8] sm:$0xf0]  ;;  %v5640_v24 = vld [vmem:[#allocation9 + $0x14c] sm:$0xf] }
  0xe0   :  { %v5676_v28 = vld [vmem:[#allocation9 + $0x26c] sm:$0xf]  ;;  %v4078_v31 = vor.u32 %v5640_v24, %v4075_v25  ;;  %v4171_v9 = vld [vmem:[#allocation9 + $0x218] sm:$0xf0]  ;;  %v4769_v25 = vld [vmem:[#allocation12 + $0x2c0] sm:$0xf] }
  0xe1   :  { %1349 = vmatpush.bf16.msrb.mxu2 %v4234_v51  ;;  %v4286_v51 = vor.u32 %v5692_v38, %v4283_v39  ;;  %v5708_v32 = vld [vmem:[#allocation9 + $0x36c] sm:$0xf] }
  0xe2   :  { %1362 = vmatpush.bf16.msrb.mxu3 %v4362_v52  ;;  %1325 = vmatpush.bf16.msrb.mxu0 %v3946_v56  ;;  %v4414_v52 = vor.u32 %v5724_v42, %v4411_v43  ;;  %v3998_v56 = vor.u32 %v5620_v44, %v3995_v46  ;;  %v5636_v36 = vld [vmem:[#allocation9 + $0x12c] sm:$0xf]  ;;  %v3934_v43 = vor.u32 %v5604_v34, %v3931_v35  ;;  %v5741_v34 = vld [vmem:[#allocation12 + $0x6c] sm:$0xf0] }
  0xe3   :  { %1338 = vmatpush.bf16.msrb.mxu1 %v4074_v57  ;;  %v4126_v57 = vor.u32 %v5652_v47, %v4123_v49  ;;  %v5704_v42 = vld [vmem:[#allocation9 + $0x34c] sm:$0xf]  ;;  %v4062_v44 = vor.u32 %v5636_v36, %v4059_v37  ;;  %v3915_v47 = vld [vmem:[#allocation9 + $0x18] sm:$0xf0]  ;;  %v4593_v36 = vld [vmem:[#allocation12 + $0x160] sm:$0xf] }
  0xe4   :  { %1302 = vmatmul.bf16.vlgmr.msra.gmra.mxu2 %v6405_v11  ;;  %v5600_v46 = vld [vmem:[#allocation9 + $0xc] sm:$0xf]  ;;  %v5773_v37 = vld [vmem:[#allocation12 + $0x16c] sm:$0xf0] }
  0xe5   :  { %1315 = vmatmul.bf16.vlgmr.msra.gmra.mxu3 %v6407_v17  ;;  %1350 = vmatpush.bf16.msrb.mxu2 %v4218_v0  ;;  %v4270_v0 = vor.u32 %v5688_v54, %v4267_v55  ;;  %v5632_v49 = vld [vmem:[#allocation9 + $0x10c] sm:$0xf]  ;;  %v5757_v54 = vld [vmem:[#allocation12 + $0xec] sm:$0xf0]  ;;  %v4657_v55 = vld [vmem:[#allocation12 + $0x1e0] sm:$0xf]  ;;  %v3918_v60 = vor.u32 %v5600_v46, %v3915_v47 }
  0xe6   :  { %1363 = vmatpush.bf16.msrb.mxu3 %v4346_v1  ;;  %1326 = vmatpush.bf16.msrb.mxu0 %v3930_v5  ;;  %v4398_v1 = vor.u32 %v5720_v58, %v4395_v59  ;;  %v4110_v5 = vor.u32 %v5648_v62, %v4107_v63  ;;  %v5668_v58 = vld [vmem:[#allocation9 + $0x22c] sm:$0xf]  ;;  %v4187_v59 = vld [vmem:[#allocation9 + $0x238] sm:$0xf0]  ;;  %v4417_v47 = vld [vmem:[#allocation12] sm:$0xf] }
  0xe7   :  { %1339 = vmatpush.bf16.msrb.mxu1 %v4058_v6  ;;  %v5716_v6 = vld [vmem:[#allocation9 + $0x3ac] sm:$0xf]  ;;  %v4315_v63 = vld [vmem:[#allocation9 + $0x338] sm:$0xf0]  ;;  %v4190_v3 = vor.u32 %v5668_v58, %v4187_v59  ;;  %v5747_v58 = vld [vmem:[#allocation12 + $0xa4] sm:$0xf] }
  0xe8   :  { %v5700_v62 = vld [vmem:[#allocation9 + $0x32c] sm:$0xf]  ;;  %v4499_v59 = vld [vmem:[#allocation12 + $0xb0] sm:$0xf0] }
  0xe9   :  { %1351 = vmatpush.bf16.msrb.mxu2 %v4202_v14  ;;  %v4382_v14 = vor.u32 %v5716_v6, %v4379_v7  ;;  %v5785_v6 = vld [vmem:[#allocation12 + $0x1cc] sm:$0xf0]  ;;  %v4318_v7 = vor.u32 %v5700_v62, %v4315_v63  ;;  %v5664_v8 = vld [vmem:[#allocation9 + $0x20c] sm:$0xf]  ;;  %v4753_v63 = vld [vmem:[#allocation12 + $0x2a0] sm:$0xf] }
  0xea   :  { %1364 = vmatpush.bf16.msrb.mxu3 %v4330_v19  ;;  %1327 = vmatpush.bf16.msrb.mxu0 %v3914_v22  ;;  %v4094_v19 = vor.u32 %v5644_v10, %v4091_v12  ;;  %v5608_v22 = vld [vmem:[#allocation9 + $0x4c] sm:$0xf]  ;;  %v4299_v12 = vld [vmem:[#allocation9 + $0x318] sm:$0xf0]  ;;  %v5765_v62 = vld [vmem:[#allocation12 + $0x12c] sm:$0xf0] }
  0xeb   :  { %1340 = vmatpush.bf16.msrb.mxu1 %v4042_v23  ;;  %v3947_v23 = vld [vmem:[#allocation9 + $0x58] sm:$0xf0]  ;;  %v5696_v10 = vld [vmem:[#allocation9 + $0x30c] sm:$0xf] }
  0xec   :  { %v3950_v30 = vor.u32 %v5608_v22, %v3947_v23  ;;  %v4625_v22 = vld [vmem:[#allocation12 + $0x1a0] sm:$0xf]  ;;  %v5781_v23 = vld [vmem:[#allocation12 + $0x1ac] sm:$0xf0] }
  0xed   :  { %1352 = vmatpush.bf16.msrb.mxu2 %v4186_v29  ;;  %1328 = vmatmul.bf16.vlgmr.msrb.gmra.mxu0 %v6399_v48  ;;  %v4219_v29 = vld [vmem:[#allocation9 + $0x278] sm:$0xf0] }
  0xee   :  { %1372 = vmatpush.bf16.msra.mxu0 %v4030_v26  ;;  %1365 = vmatpush.bf16.msrb.mxu3 %v4314_v33  ;;  %v4238_v26 = vor.u32 %v5680_v15, %v4235_v16  ;;  %v4347_v33 = vld [vmem:[#allocation9 + $0x378] sm:$0xf0]  ;;  %v4222_v38 = vor.u32 %v5676_v28, %v4219_v29  ;;  %v4481_v28 = vld [vmem:[#allocation12 + $0x80] sm:$0xf]  ;;  %v5745_v29 = vld [vmem:[#allocation12 + $0x8c] sm:$0xf0] }
  0xef   :  { %1385 = vmatpush.bf16.msra.mxu1 %v4158_v27  ;;  %v4366_v27 = vor.u32 %v5712_v20, %v4363_v21  ;;  %v4350_v39 = vor.u32 %v5708_v32, %v4347_v33  ;;  %v5749_v20 = vld [vmem:[#allocation12 + $0xac] sm:$0xf0]  ;;  %v4302_v21 = vor.u32 %v5696_v10, %v4299_v12  ;;  %v4482_v33 = vor.u32 %v5745_v29, %v4481_v28  ;;  %v4705_v29 = vld [vmem:[#allocation12 + $0x240] sm:$0xf] }
  0xf0   :  { %1341 = vmatmul.bf16.vlgmr.msrb.gmra.mxu1 %v6401_v53  ;;  %v5777_v32 = vld [vmem:[#allocation12 + $0x18c] sm:$0xf0] }
  0xf1   :  { %1353 = vmatpush.bf16.msrb.mxu2 %v4170_v45  ;;  %v4331_v45 = vld [vmem:[#allocation9 + $0x358] sm:$0xf0]  ;;  %v5809_v10 = vld [vmem:[#allocation12 + $0x28c] sm:$0xf0] }
  0xf2   :  { %1373 = vmatpush.bf16.msra.mxu0 %v4014_v40  ;;  %1366 = vmatpush.bf16.msrb.mxu3 %v4298_v50  ;;  %v5672_v40 = vld [vmem:[#allocation9 + $0x24c] sm:$0xf]  ;;  %v4043_v50 = vld [vmem:[#allocation9 + $0x118] sm:$0xf0] }
  0xf3   :  { %1386 = vmatpush.bf16.msra.mxu1 %v4142_v41  ;;  %v4203_v41 = vld [vmem:[#allocation9 + $0x258] sm:$0xf0]  ;;  %v4046_v61 = vor.u32 %v5632_v49, %v4043_v50  ;;  %v5729_v49 = vld [vmem:[#allocation12 + $0xc] sm:$0xf0]  ;;  %v5755_v50 = vld [vmem:[#allocation12 + $0xe4] sm:$0xf] }
  0xf4   :  { %1354 = vmatmul.bf16.vlgmr.msrb.gmra.mxu2 %v6405_v11 }
  0xf5   :  { %1398 = vmatpush.bf16.msra.mxu2 %v4286_v51  ;;  %1367 = vmatmul.bf16.vlgmr.msrb.gmra.mxu3 %v6407_v17  ;;  %v4529_v51 = vld [vmem:[#allocation12 + $0xe0] sm:$0xf] }
  0xf6   :  { %1411 = vmatpush.bf16.msra.mxu3 %v4414_v52  ;;  %1374 = vmatpush.bf16.msra.mxu0 %v3998_v56  ;;  %v4206_v52 = vor.u32 %v5672_v40, %v4203_v41  ;;  %v5789_v56 = vld [vmem:[#allocation12 + $0x1ec] sm:$0xf0]  ;;  %v4594_v41 = vor.u32 %v5773_v37, %v4593_v36  ;;  %v4689_v36 = vld [vmem:[#allocation12 + $0x220] sm:$0xf] }
  0xf7   :  { %1387 = vmatpush.bf16.msra.mxu1 %v4126_v57  ;;  %v4334_v57 = vor.u32 %v5704_v42, %v4331_v45  ;;  %v4658_v2 = vor.u32 %v5789_v56, %v4657_v55  ;;  %v5737_v40 = vld [vmem:[#allocation12 + $0x4c] sm:$0xf0]  ;;  %v4577_v42 = vld [vmem:[#allocation12 + $0x140] sm:$0xf]  ;;  %v5751_v55 = vld [vmem:[#allocation12 + $0xc4] sm:$0xf] }
  0xf8   :  { %v5733_v45 = vld [vmem:[#allocation12 + $0x2c] sm:$0xf0]  ;;  %v4515_v56 = vld [vmem:[#allocation12 + $0xd0] sm:$0xf0] }
  0xf9   :  { %1399 = vmatpush.bf16.msra.mxu2 %v4270_v0  ;;  %v4530_v0 = vor.u32 %v5757_v54, %v4529_v51  ;;  %v4531_v51 = vld [vmem:[#allocation12 + $0xf0] sm:$0xf0]  ;;  %v5797_v37 = vld [vmem:[#allocation12 + $0x22c] sm:$0xf0] }
  0xfa   :  { %1412 = vmatpush.bf16.msra.mxu3 %v4398_v1  ;;  %1375 = vmatpush.bf16.msra.mxu0 %v3982_v4  ;;  %v4513_v1 = vld [vmem:[#allocation12 + $0xc0] sm:$0xf]  ;;  %v5753_v4 = vld [vmem:[#allocation12 + $0xcc] sm:$0xf0]  ;;  %v4534_v54 = vor.u32 %v5755_v50, %v4531_v51  ;;  %v4595_v50 = vld [vmem:[#allocation12 + $0x170] sm:$0xf0] }
  0xfb   :  { %1388 = vmatpush.bf16.msra.mxu1 %v4110_v5  ;;  %v4641_v5 = vld [vmem:[#allocation12 + $0x1c0] sm:$0xf]  ;;  %v4514_v15 = vor.u32 %v5753_v4, %v4513_v1  ;;  %v5813_v1 = vld [vmem:[#allocation12 + $0x2ac] sm:$0xf0] }
  0xfc   :  { %v4642_v16 = vor.u32 %v5785_v6, %v4641_v5  ;;  %v4754_v4 = vor.u32 %v5813_v1, %v4753_v63  ;;  %v4545_v6 = vld [vmem:[#allocation12 + $0x100] sm:$0xf] }
  0xfd   :  { %1400 = vmatpush.bf16.msra.mxu2 %v4254_v13  ;;  %v4785_v13 = vld [vmem:[#allocation12 + $0x2e0] sm:$0xf] }
  0xfe   :  { %1413 = vmatpush.bf16.msra.mxu3 %v4382_v14  ;;  %1376 = vmatpush.bf16.msra.mxu0 %v3966_v18  ;;  %v5821_v14 = vld [vmem:[#allocation12 + $0x2ec] sm:$0xf0]  ;;  %v4174_v18 = vor.u32 %v5664_v8, %v4171_v9  ;;  %v4737_v8 = vld [vmem:[#allocation12 + $0x280] sm:$0xf] }
  0xff   :  { %1389 = vmatpush.bf16.msra.mxu1 %v4094_v19  ;;  %v4497_v19 = vld [vmem:[#allocation12 + $0xa0] sm:$0xf]  ;;  %v4786_v24 = vor.u32 %v5821_v14, %v4785_v13  ;;  %v4738_v12 = vor.u32 %v5809_v10, %v4737_v8  ;;  %v5739_v13 = vld [vmem:[#allocation12 + $0x64] sm:$0xf]  ;;  %v4467_v14 = vld [vmem:[#allocation12 + $0x70] sm:$0xf0] }
 0x100   :  { %v4563_v8 = vld [vmem:[#allocation12 + $0x130] sm:$0xf0] }
 0x101   :  { %1401 = vmatpush.bf16.msra.mxu2 %v4238_v26  ;;  %v5817_v26 = vld [vmem:[#allocation12 + $0x2cc] sm:$0xf0] }
 0x102   :  { %1414 = vmatpush.bf16.msra.mxu3 %v4366_v27  ;;  %1377 = vmatpush.bf16.msra.mxu0 %v3950_v30  ;;  %v4498_v27 = vor.u32 %v5749_v20, %v4497_v19  ;;  %v4626_v30 = vor.u32 %v5781_v23, %v4625_v22  ;;  %v4721_v19 = vld [vmem:[#allocation12 + $0x260] sm:$0xf]  ;;  %v5805_v20 = vld [vmem:[#allocation12 + $0x26c] sm:$0xf0]  ;;  %v5735_v23 = vld [vmem:[#allocation12 + $0x44] sm:$0xf] }
 0x103   :  { %1390 = vmatpush.bf16.msra.mxu1 %v4078_v31  ;;  %v4609_v31 = vld [vmem:[#allocation12 + $0x180] sm:$0xf]  ;;  %v4722_v22 = vor.u32 %v5805_v20, %v4721_v19  ;;  %v5759_v20 = vld [vmem:[#allocation12 + $0x104] sm:$0xf] }
 0x104   :  { %v4610_v35 = vor.u32 %v5777_v32, %v4609_v31  ;;  %v5731_v32 = vld [vmem:[#allocation12 + $0x24] sm:$0xf] }
 0x105   :  { %1402 = vmatpush.bf16.msra.mxu2 %v4222_v38 }
 0x106   :  { %1415 = vmatpush.bf16.msra.mxu3 %v4350_v39  ;;  %1378 = vmatpush.bf16.msra.mxu0 %v3934_v43  ;;  %v4449_v39 = vld [vmem:[#allocation12 + $0x40] sm:$0xf]  ;;  %v5769_v43 = vld [vmem:[#allocation12 + $0x14c] sm:$0xf0] }
 0x107   :  { %1391 = vmatpush.bf16.msra.mxu1 %v4062_v44  ;;  %v4433_v44 = vld [vmem:[#allocation12 + $0x20] sm:$0xf] }
 0x108   :  { %v4434_v46 = vor.u32 %v5733_v45, %v4433_v44  ;;  %v4673_v44 = vld [vmem:[#allocation12 + $0x200] sm:$0xf]  ;;  %v5793_v45 = vld [vmem:[#allocation12 + $0x20c] sm:$0xf0] }
 0x109   :  { %1403 = vmatpush.bf16.msra.mxu2 %v4206_v52  ;;  %v4418_v52 = vor.u32 %v5729_v49, %v4417_v47  ;;  %v5853_v47 = vld [vmem:[#allocation12 + $0x3ec] sm:$0xf0]  ;;  %v5771_v49 = vld [vmem:[#allocation12 + $0x164] sm:$0xf] }
 0x10a   :  { %1416 = vmatpush.bf16.msra.mxu3 %v4334_v57  ;;  %1379 = vmatpush.bf16.msra.mxu0 %v3918_v60  ;;  %v4518_v57 = vor.u32 %v5751_v55, %v4515_v56  ;;  %v4502_v60 = vor.u32 %v5747_v58, %v4499_v59  ;;  %v4787_v55 = vld [vmem:[#allocation12 + $0x2f0] sm:$0xf0]  ;;  %v5849_v58 = vld [vmem:[#allocation12 + $0x3cc] sm:$0xf0] }
 0x10b   :  { %1392 = vmatpush.bf16.msra.mxu1 %v4046_v61  ;;  %v4561_v61 = vld [vmem:[#allocation12 + $0x120] sm:$0xf] }
 0x10d   :  { %1404 = vmatpush.bf16.msra.mxu2 %v4190_v3  ;;  %1380 = vmatmul.bf16.vlgmr.msra.gmra.mxu0 %v6399_v48  ;;  %v4770_v48 = vor.u32 %v5817_v26, %v4769_v25  ;;  %v4483_v3 = vld [vmem:[#allocation12 + $0x90] sm:$0xf0]  ;;  %v5783_v25 = vld [vmem:[#allocation12 + $0x1c4] sm:$0xf] }
 0x10e   :  { %2210 = vmatpush.bf16.msrb.mxu0 %v4530_v0  ;;  %1417 = vmatpush.bf16.msra.mxu3 %v4318_v7  ;;  %v4562_v0 = vor.u32 %v5765_v62, %v4561_v61  ;;  %v5761_v7 = vld [vmem:[#allocation12 + $0x10c] sm:$0xf0]  ;;  %v4579_v61 = vld [vmem:[#allocation12 + $0x150] sm:$0xf0]  ;;  %v5815_v62 = vld [vmem:[#allocation12 + $0x2c4] sm:$0xf] }
 0x10f   :  { %2223 = vmatpush.bf16.msrb.mxu1 %v4658_v2  ;;  %v5743_v2 = vld [vmem:[#allocation12 + $0x84] sm:$0xf]  ;;  %v4546_v9 = vor.u32 %v5761_v7, %v4545_v6 }
 0x110   :  { %1393 = vmatmul.bf16.vlgmr.msra.gmra.mxu1 %v6401_v53  ;;  %v4465_v53 = vld [vmem:[#allocation12 + $0x60] sm:$0xf]  ;;  %v4486_v5 = vor.u32 %v5743_v2, %v4483_v3  ;;  %v6423_v2 = vld [vmem:[#allocation11] sm:$0xf]  ;;  %v5763_v7 = vld [vmem:[#allocation12 + $0x124] sm:$0xf] }
 0x111   :  { %1405 = vmatpush.bf16.msra.mxu2 %v4174_v18  ;;  %v4466_v38 = vor.u32 %v5741_v34, %v4465_v53  ;;  %v4659_v18 = vld [vmem:[#allocation12 + $0x1f0] sm:$0xf0]  ;;  %v4881_v3 = vld [vmem:[#allocation12 + $0x3a0] sm:$0xf] }
 0x112   :  { %2211 = vmatpush.bf16.msrb.mxu0 %v4514_v15  ;;  %1418 = vmatpush.bf16.msra.mxu3 %v4302_v21  ;;  %v5787_v15 = vld [vmem:[#allocation12 + $0x1e4] sm:$0xf]  ;;  %v4627_v34 = vld [vmem:[#allocation12 + $0x1b0] sm:$0xf0] }
 0x113   :  { %2224 = vmatpush.bf16.msrb.mxu1 %v4642_v16  ;;  %v4470_v16 = vor.u32 %v5739_v13, %v4467_v14  ;;  %v4662_v21 = vor.u32 %v5787_v15, %v4659_v18  ;;  %v4755_v13 = vld [vmem:[#allocation12 + $0x2b0] sm:$0xf0]  ;;  %v568_v14 = vperm.slane %v6423_v2, 0  ;;  %v5841_v18 = vld [vmem:[#allocation12 + $0x38c] sm:$0xf0] }
 0x114   :  { %1406 = vmatmul.bf16.vlgmr.msra.gmra.mxu2 %v6405_v11  ;;  %v4450_v11 = vor.u32 %v5737_v40, %v4449_v39  ;;  %v5727_v39 = vld [vmem:[#allocation12 + $0x4] sm:$0xf]  ;;  %v4419_v40 = vld [vmem:[#allocation12 + $0x10] sm:$0xf0] }
 0x115   :  { %2236 = vmatpush.bf16.msrb.mxu2 %v4786_v24  ;;  %1419 = vmatmul.bf16.vlgmr.msra.gmra.mxu3 %v6407_v17  ;;  %v4578_v17 = vor.u32 %v5769_v43, %v4577_v42  ;;  %v4451_v24 = vld [vmem:[#allocation12 + $0x50] sm:$0xf0]  ;;  %v4422_v42 = vor.u32 %v5727_v39, %v4419_v40 }
 0x116   :  { %2212 = vmatpush.bf16.msrb.mxu0 %v4498_v27  ;;  %v4454_v26 = vor.u32 %v5735_v23, %v4451_v24  ;;  %v4643_v27 = vld [vmem:[#allocation12 + $0x1d0] sm:$0xf0] }
 0x117   :  { %2225 = vmatpush.bf16.msrb.mxu1 %v4626_v30  ;;  %v4646_v28 = vor.u32 %v5783_v25, %v4643_v27  ;;  %v5801_v30 = vld [vmem:[#allocation12 + $0x24c] sm:$0xf0]  ;;  %v4611_v43 = vld [vmem:[#allocation12 + $0x190] sm:$0xf0]  ;;  %v4849_v27 = vld [vmem:[#allocation12 + $0x360] sm:$0xf] }
 0x118   :  { %v4706_v31 = vor.u32 %v5801_v30, %v4705_v29  ;;  %v4739_v24 = vld [vmem:[#allocation12 + $0x290] sm:$0xf0] }
 0x119   :  { %2237 = vmatpush.bf16.msrb.mxu2 %v4770_v48  ;;  %v4435_v48 = vld [vmem:[#allocation12 + $0x30] sm:$0xf0] }
 0x11a   :  { %2213 = vmatpush.bf16.msrb.mxu0 %v4482_v33  ;;  %v5779_v33 = vld [vmem:[#allocation12 + $0x1a4] sm:$0xf]  ;;  %v4438_v53 = vor.u32 %v5731_v32, %v4435_v48  ;;  %v4723_v32 = vld [vmem:[#allocation12 + $0x270] sm:$0xf0] }
 0x11b   :  { %2226 = vmatpush.bf16.msrb.mxu1 %v4610_v35  ;;  %v4630_v35 = vor.u32 %v5779_v33, %v4627_v34  ;;  %v4833_v34 = vld [vmem:[#allocation12 + $0x340] sm:$0xf] }
 0x11d   :  { %2238 = vmatpush.bf16.msrb.mxu2 %v4754_v4  ;;  %v5845_v4 = vld [vmem:[#allocation12 + $0x3ac] sm:$0xf0] }
 0x11e   :  { %2214 = vmatpush.bf16.msrb.mxu0 %v4466_v38  ;;  %v4690_v38 = vor.u32 %v5797_v37, %v4689_v36  ;;  %v4882_v6 = vor.u32 %v5845_v4, %v4881_v3  ;;  %v5799_v37 = vld [vmem:[#allocation12 + $0x244] sm:$0xf] }
 0x11f   :  { %2227 = vmatpush.bf16.msrb.mxu1 %v4594_v41  ;;  %v5775_v41 = vld [vmem:[#allocation12 + $0x184] sm:$0xf] }
 0x121   :  { %2239 = vmatpush.bf16.msrb.mxu2 %v4738_v12  ;;  %v4566_v12 = vor.u32 %v5763_v7, %v4563_v8 }
 0x122   :  { %2215 = vmatpush.bf16.msrb.mxu0 %v4450_v11  ;;  %v4614_v11 = vor.u32 %v5775_v41, %v4611_v43  ;;  %v4537_v43 = vld [vmem:[#allocation12 + $0xe8] sm:$0xf] }
 0x123   :  { %2228 = vmatpush.bf16.msrb.mxu1 %v4578_v17  ;;  %v4913_v17 = vld [vmem:[#allocation12 + $0x3e0] sm:$0xf] }
 0x124   :  { %v4914_v51 = vor.u32 %v5853_v47, %v4913_v17 }
 0x125   :  { %2240 = vmatpush.bf16.msrb.mxu2 %v4722_v22  ;;  %v5807_v22 = vld [vmem:[#allocation12 + $0x284] sm:$0xf] }
 0x126   :  { %2216 = vmatpush.bf16.msrb.mxu0 %v4434_v46  ;;  %v4674_v46 = vor.u32 %v5793_v45, %v4673_v44  ;;  %2249 = vmatpush.bf16.msrb.mxu3 %v4914_v51  ;;  %v5829_v44 = vld [vmem:[#allocation12 + $0x32c] sm:$0xf0] }
 0x127   :  { %2229 = vmatpush.bf16.msrb.mxu1 %v4562_v0  ;;  %v4771_v0 = vld [vmem:[#allocation12 + $0x2d0] sm:$0xf0] }
 0x128   :  { %v4774_v1 = vor.u32 %v5815_v62, %v4771_v0  ;;  %v4675_v0 = vld [vmem:[#allocation12 + $0x210] sm:$0xf0] }
 0x129   :  { %2241 = vmatpush.bf16.msrb.mxu2 %v4706_v31  ;;  %v5803_v31 = vld [vmem:[#allocation12 + $0x264] sm:$0xf] }
 0x12a   :  { %2217 = vmatpush.bf16.msrb.mxu0 %v4418_v52  ;;  %v4598_v52 = vor.u32 %v5771_v49, %v4595_v50  ;;  %v4726_v33 = vor.u32 %v5803_v31, %v4723_v32  ;;  %v5795_v49 = vld [vmem:[#allocation12 + $0x224] sm:$0xf]  ;;  %v4691_v50 = vld [vmem:[#allocation12 + $0x230] sm:$0xf0]  ;;  %v5742_v31 = vld [vmem:[#allocation12 + $0x74] sm:$0xf0] }
 0x12b   :  { %2230 = vmatpush.bf16.msrb.mxu1 %v4546_v9  ;;  %v5811_v9 = vld [vmem:[#allocation12 + $0x2a4] sm:$0xf]  ;;  %v4665_v32 = vld [vmem:[#allocation12 + $0x1e8] sm:$0xf] }
 0x12c   :  { %v4758_v15 = vor.u32 %v5811_v9, %v4755_v13  ;;  %v4505_v9 = vld [vmem:[#allocation12 + $0xa8] sm:$0xf]  ;;  %v5750_v13 = vld [vmem:[#allocation12 + $0xb4] sm:$0xf0] }
 0x12d   :  { %2242 = vmatpush.bf16.msrb.mxu2 %v4690_v38  ;;  %v4707_v38 = vld [vmem:[#allocation12 + $0x250] sm:$0xf0] }
 0x12e   :  { %2262 = vmatpush.bf16.msra.mxu0 %v4534_v54  ;;  %v5819_v54 = vld [vmem:[#allocation12 + $0x2e4] sm:$0xf]  ;;  %v4710_v40 = vor.u32 %v5799_v37, %v4707_v38 }
 0x12f   :  { %2275 = vmatpush.bf16.msra.mxu1 %v4662_v21  ;;  %v4790_v56 = vor.u32 %v5819_v54, %v4787_v55  ;;  %v4547_v21 = vld [vmem:[#allocation12 + $0x110] sm:$0xf0]  ;;  %v569_v55 = vperm.slane %v6423_v2, 1 }
 0x130   :  { %v4550_v23 = vor.u32 %v5759_v20, %v4547_v21  ;;  %v4489_v20 = vld [vmem:[#allocation12 + $0x88] sm:$0xf] }
 0x131   :  { %2243 = vmatpush.bf16.msrb.mxu2 %v4674_v46  ;;  %v5758_v46 = vld [vmem:[#allocation12 + $0xf4] sm:$0xf0] }
 0x132   :  { %2263 = vmatpush.bf16.msra.mxu0 %v4518_v57  ;;  %v4897_v57 = vld [vmem:[#allocation12 + $0x3c0] sm:$0xf] }
 0x133   :  { %2276 = vmatpush.bf16.msra.mxu1 %v4646_v28  ;;  %v4898_v59 = vor.u32 %v5849_v58, %v4897_v57  ;;  %v5837_v28 = vld [vmem:[#allocation12 + $0x36c] sm:$0xf0]  ;;  %v4538_v57 = vor.u32 %v5758_v46, %v4537_v43  ;;  %v5754_v58 = vld [vmem:[#allocation12 + $0xd4] sm:$0xf0]  ;;  %v4649_v43 = vld [vmem:[#allocation12 + $0x1c8] sm:$0xf] }
 0x134   :  { %v4850_v30 = vor.u32 %v5837_v28, %v4849_v27  ;;  %v570_v46 = vperm.slane %v6423_v2, 2 }
 0x135   :  { %2288 = vmatpush.bf16.msra.mxu2 %v4790_v56  ;;  %2250 = vmatpush.bf16.msrb.mxu3 %v4898_v59  ;;  %v4521_v56 = vld [vmem:[#allocation12 + $0xc8] sm:$0xf]  ;;  %v4801_v59 = vld [vmem:[#allocation12 + $0x300] sm:$0xf] }
 0x136   :  { %2264 = vmatpush.bf16.msra.mxu0 %v4502_v60  ;;  %v5767_v60 = vld [vmem:[#allocation12 + $0x144] sm:$0xf]  ;;  %v4522_v8 = vor.u32 %v5754_v58, %v4521_v56  ;;  %v4633_v56 = vld [vmem:[#allocation12 + $0x1a8] sm:$0xf] }
 0x137   :  { %2277 = vmatpush.bf16.msra.mxu1 %v4630_v35  ;;  %v4582_v63 = vor.u32 %v5767_v60, %v4579_v61  ;;  %v5833_v35 = vld [vmem:[#allocation12 + $0x34c] sm:$0xf0]  ;;  %v5831_v58 = vld [vmem:[#allocation12 + $0x344] sm:$0xf] }
 0x138   :  { %v4834_v36 = vor.u32 %v5833_v35, %v4833_v34  ;;  %v5825_v60 = vld [vmem:[#allocation12 + $0x30c] sm:$0xf0]  ;;  %v4867_v34 = vld [vmem:[#allocation12 + $0x390] sm:$0xf0] }
 0x139   :  { %2289 = vmatpush.bf16.msra.mxu2 %v4774_v1  ;;  %2251 = vmatpush.bf16.msrb.mxu3 %v4882_v6  ;;  %v4802_v62 = vor.u32 %v5825_v60, %v4801_v59  ;;  %v5851_v1 = vld [vmem:[#allocation12 + $0x3e4] sm:$0xf]  ;;  %v4835_v59 = vld [vmem:[#allocation12 + $0x350] sm:$0xf0] }
 0x13a   :  { %2265 = vmatpush.bf16.msra.mxu0 %v4486_v5 }
 0x13b   :  { %2278 = vmatpush.bf16.msra.mxu1 %v4614_v11  ;;  %v4817_v11 = vld [vmem:[#allocation12 + $0x320] sm:$0xf] }
 0x13c   :  { %v4818_v47 = vor.u32 %v5829_v44, %v4817_v11  ;;  %v5786_v44 = vld [vmem:[#allocation12 + $0x1d4] sm:$0xf0] }
 0x13d   :  { %2290 = vmatpush.bf16.msra.mxu2 %v4758_v15  ;;  %v4899_v15 = vld [vmem:[#allocation12 + $0x3d0] sm:$0xf0] }
 0x13e   :  { %2266 = vmatpush.bf16.msra.mxu0 %v4470_v16  ;;  %v4865_v16 = vld [vmem:[#allocation12 + $0x380] sm:$0xf] }
 0x13f   :  { %2279 = vmatpush.bf16.msra.mxu1 %v4598_v52  ;;  %v4866_v19 = vor.u32 %v5841_v18, %v4865_v16  ;;  %v4694_v52 = vor.u32 %v5795_v49, %v4691_v50 }
 0x141   :  { %2252 = vmatpush.bf16.msrb.mxu3 %v4866_v19  ;;  %v4506_v19 = vor.u32 %v5750_v13, %v4505_v9  ;;  %v4819_v9 = vld [vmem:[#allocation12 + $0x330] sm:$0xf0]  ;;  %v4539_v13 = vld [vmem:[#allocation12 + $0xf8] sm:$0xf0] }
 0x142   :  { %2267 = vmatpush.bf16.msra.mxu0 %v4454_v26  ;;  %v4742_v26 = vor.u32 %v5807_v22, %v4739_v24  ;;  %v5746_v22 = vld [vmem:[#allocation12 + $0x94] sm:$0xf0]  ;;  %v4883_v24 = vld [vmem:[#allocation12 + $0x3b0] sm:$0xf0] }
 0x143   :  { %2280 = vmatpush.bf16.msra.mxu1 %v4582_v63  ;;  %v5791_v63 = vld [vmem:[#allocation12 + $0x204] sm:$0xf] }
 0x144   :  { %2291 = vmatpush.bf16.msra.mxu2 %v4742_v26  ;;  %v4678_v4 = vor.u32 %v5791_v63, %v4675_v0  ;;  %v4838_v63 = vor.u32 %v5831_v58, %v4835_v59  ;;  %v4745_v58 = vld [vmem:[#allocation12 + $0x288] sm:$0xf]  ;;  %v5810_v59 = vld [vmem:[#allocation12 + $0x294] sm:$0xf0] }
 0x145   :  { %2253 = vmatpush.bf16.msrb.mxu3 %v4850_v30  ;;  %v4473_v30 = vld [vmem:[#allocation12 + $0x68] sm:$0xf] }
 0x146   :  { %2268 = vmatpush.bf16.msra.mxu0 %v4438_v53 }
 0x147   :  { %2281 = vmatpush.bf16.msra.mxu1 %v4566_v12 }
 0x148   :  { %2292 = vmatpush.bf16.msra.mxu2 %v4726_v33  ;;  %v5790_v33 = vld [vmem:[#allocation12 + $0x1f4] sm:$0xf0] }
 0x149   :  { %v1225_v5 = vpop.f32.mrf.mxu0  ;;  %2254 = vmatpush.bf16.msrb.mxu3 %v4834_v36 }
 0x14a   :  { %2269 = vmatpush.bf16.msra.mxu0 %v4422_v42  ;;  %v1238_v10 = vpop.f32.mrf.mxu1  ;;  %v1226_v25 = vadd.f32 %v1225_v5, %v568_v14  ;;  %v4915_v5 = vld [vmem:[#allocation12 + $0x3f0] sm:$0xf0]  ;;  %v5847_v14 = vld [vmem:[#allocation12 + $0x3c4] sm:$0xf] }
 0x14b   :  { %2282 = vmatpush.bf16.msra.mxu1 %v4550_v23  ;;  %v4918_v7 = vor.u32 %v5851_v1, %v4915_v5  ;;  %v4902_v18 = vor.u32 %v5847_v14, %v4899_v15  ;;  %v5843_v23 = vld [vmem:[#allocation12 + $0x3a4] sm:$0xf]  ;;  %v5730_v5 = vld [vmem:[#allocation12 + $0x14] sm:$0xf0] }
 0x14c   :  { %v1239_v53 = vadd.f32 %v1238_v10, %v1226_v25  ;;  %2293 = vmatpush.bf16.msra.mxu2 %v4710_v40  ;;  %v4886_v26 = vor.u32 %v5843_v23, %v4883_v24  ;;  %v4666_v40 = vor.u32 %v5790_v33, %v4665_v32  ;;  %v4793_v24 = vld [vmem:[#allocation12 + $0x2e8] sm:$0xf] }
 0x14d   :  { %2255 = vmatpush.bf16.msrb.mxu3 %v4818_v47 }
 0x150   :  { %2294 = vmatpush.bf16.msra.mxu2 %v4694_v52  ;;  %v4650_v52 = vor.u32 %v5786_v44, %v4649_v43 }
 0x151   :  { %v1227_v29 = vpop.f32.mrf.mxu0  ;;  %2256 = vmatpush.bf16.msrb.mxu3 %v4802_v62 }
 0x152   :  { %v1240_v48 = vpop.f32.mrf.mxu1  ;;  %v4490_v29 = vor.u32 %v5746_v22, %v4489_v20  ;;  %v5774_v22 = vld [vmem:[#allocation12 + $0x174] sm:$0xf0] }
 0x154   :  { %2295 = vmatpush.bf16.msra.mxu2 %v4678_v4  ;;  %v4425_v4 = vld [vmem:[#allocation12 + $0x8] sm:$0xf] }
 0x155   :  { %2301 = vmatpush.bf16.msra.mxu3 %v4918_v7  ;;  %v5778_v7 = vld [vmem:[#allocation12 + $0x194] sm:$0xf0] }
 0x157   :  { %v1251_v39 = vpop.f32.mrf.mxu2 }
 0x158   :  { %v1252_v41 = vadd.f32 %v1251_v39, %v1239_v53  ;;  %v1264_v42 = vpop.f32.mrf.mxu3  ;;  %v5839_v53 = vld [vmem:[#allocation12 + $0x384] sm:$0xf]  ;;  %v4474_v39 = vor.u32 %v5742_v31, %v4473_v30  ;;  %v4523_v30 = vld [vmem:[#allocation12 + $0xd8] sm:$0xf0] }
 0x159   :  { %v1277_v17 = vpop.f32.mrf.mxu0  ;;  %2302 = vmatpush.bf16.msra.mxu3 %v4902_v18  ;;  %v4870_v36 = vor.u32 %v5839_v53, %v4867_v34  ;;  %v4585_v34 = vld [vmem:[#allocation12 + $0x148] sm:$0xf] }
 0x15a   :  { %v1265_v45 = vadd.f32 %v1264_v42, %v1252_v41  ;;  %v1290_v51 = vpop.f32.mrf.mxu1  ;;  %v1278_v10 = vadd.f32 %v1277_v17, %v569_v55  ;;  %v4457_v41 = vld [vmem:[#allocation12 + $0x48] sm:$0xf]  ;;  %v5738_v42 = vld [vmem:[#allocation12 + $0x54] sm:$0xf0]  ;;  %v4851_v17 = vld [vmem:[#allocation12 + $0x370] sm:$0xf0] }
 0x15b   :  { %v5734_v55 = vld [vmem:[#allocation12 + $0x34] sm:$0xf0] }
 0x15c   :  { %v1424_v54 = vmax.f32 %v1265_v45, 0.0  ;;  %v1291_v21 = vadd.f32 %v1290_v51, %v1278_v10  ;;  %v5835_v45 = vld [vmem:[#allocation12 + $0x364] sm:$0xf]  ;;  %v4458_v51 = vor.u32 %v5738_v42, %v4457_v41 }
 0x15d   :  { %2303 = vmatpush.bf16.msra.mxu3 %v4886_v26  ;;  %v4854_v49 = vor.u32 %v5835_v45, %v4851_v17  ;;  %v4803_v26 = vld [vmem:[#allocation12 + $0x310] sm:$0xf0]  ;;  %v4569_v17 = vld [vmem:[#allocation12 + $0x128] sm:$0xf] }
 0x15e   :  { %v6427_v61 = vpack.c.bf16 %v1424_v54, %v1424_v54  ;;  %v4441_v54 = vld [vmem:[#allocation12 + $0x28] sm:$0xf] }
 0x15f   :  { %v1253_v3 = vpop.f32.mrf.mxu2  ;;  %v4442_v1 = vor.u32 %v5734_v55, %v4441_v54 }
 0x160   :  { %v1266_v6 = vpop.f32.mrf.mxu3  ;;  %2218 = vmatmul.bf16.vlgmr.msrb.gmra.mxu0 %v6427_v61 }
 0x161   :  { %2314 = vmatpush.bf16.msrb.mxu0 %v4538_v57  ;;  %v1279_v12 = vpop.f32.mrf.mxu0  ;;  %2304 = vmatpush.bf16.msra.mxu3 %v4870_v36  ;;  %v5782_v57 = vld [vmem:[#allocation12 + $0x1b4] sm:$0xf0]  ;;  %v4617_v6 = vld [vmem:[#allocation12 + $0x188] sm:$0xf] }
 0x162   :  { %v1292_v16 = vpop.f32.mrf.mxu1  ;;  %v4634_v3 = vor.u32 %v5782_v57, %v4633_v56  ;;  %v5756_v12 = vld [vmem:[#allocation12 + $0xec] sm:$0xf]  ;;  %v4618_v20 = vor.u32 %v5778_v7, %v4617_v6  ;;  %v4777_v36 = vld [vmem:[#allocation12 + $0x2c8] sm:$0xf]  ;;  %v5762_v57 = vld [vmem:[#allocation12 + $0x114] sm:$0xf0]  ;;  %v4746_v6 = vor.u32 %v5810_v59, %v4745_v58 }
 0x163   :  { %v4542_v23 = vor.u32 %v5756_v12, %v4539_v13  ;;  %v4553_v56 = vld [vmem:[#allocation12 + $0x108] sm:$0xf]  ;;  %v5736_v12 = vld [vmem:[#allocation12 + $0x4c] sm:$0xf]  ;;  %v4459_v13 = vld [vmem:[#allocation12 + $0x58] sm:$0xf0] }
 0x164   :  { %v4905_v59 = vld [vmem:[#allocation12 + $0x3c8] sm:$0xf] }
 0x165   :  { %2315 = vmatpush.bf16.msrb.mxu0 %v4522_v8  ;;  %2305 = vmatpush.bf16.msra.mxu3 %v4854_v49  ;;  %v5827_v8 = vld [vmem:[#allocation12 + $0x324] sm:$0xf]  ;;  %v5814_v49 = vld [vmem:[#allocation12 + $0x2b4] sm:$0xf0] }
 0x166   :  { %v4822_v14 = vor.u32 %v5827_v8, %v4819_v9  ;;  %v4729_v8 = vld [vmem:[#allocation12 + $0x268] sm:$0xf] }
 0x167   :  { %v1303_v25 = vpop.f32.mrf.mxu2 }
 0x168   :  { %v1304_v27 = vadd.f32 %v1303_v25, %v1291_v21  ;;  %v1316_v28 = vpop.f32.mrf.mxu3  ;;  %v4601_v21 = vld [vmem:[#allocation12 + $0x168] sm:$0xf]  ;;  %v5823_v25 = vld [vmem:[#allocation12 + $0x304] sm:$0xf] }
 0x169   :  { %2316 = vmatpush.bf16.msrb.mxu0 %v4506_v19  ;;  %2306 = vmatpush.bf16.msra.mxu3 %v4838_v63  ;;  %v4426_v19 = vor.u32 %v5730_v5, %v4425_v4  ;;  %v4806_v31 = vor.u32 %v5823_v25, %v4803_v26  ;;  %v4554_v4 = vor.u32 %v5762_v57, %v4553_v56  ;;  %v571_v5 = vperm.slane %v6423_v2, 3  ;;  %v5780_v25 = vld [vmem:[#allocation12 + $0x1ac] sm:$0xf]  ;;  %v4635_v26 = vld [vmem:[#allocation12 + $0x1b8] sm:$0xf0] }
 0x16a   :  { %v1317_v48 = vadd.f32 %v1316_v28, %v1304_v27  ;;  %v1329_v35 = vpop.f32.mrf.mxu0  ;;  %v5822_v28 = vld [vmem:[#allocation12 + $0x2f4] sm:$0xf0] }
 0x16b   :  { %v1330_v60 = vadd.f32 %v1329_v35, %v570_v46  ;;  %v4794_v33 = vor.u32 %v5822_v28, %v4793_v24  ;;  %v5770_v35 = vld [vmem:[#allocation12 + $0x154] sm:$0xf0] }
 0x16c   :  { %v1425_v37 = vmax.f32 %v1317_v48, 0.0  ;;  %v4602_v48 = vor.u32 %v5774_v22, %v4601_v21  ;;  %v4586_v43 = vor.u32 %v5770_v35, %v4585_v34  ;;  %v5766_v46 = vld [vmem:[#allocation12 + $0x134] sm:$0xf0]  ;;  %v5732_v22 = vld [vmem:[#allocation12 + $0x2c] sm:$0xf] }
 0x16d   :  { %v1342_v38 = vpop.f32.mrf.mxu1  ;;  %2317 = vmatpush.bf16.msrb.mxu0 %v4490_v29  ;;  %2307 = vmatpush.bf16.msra.mxu3 %v4822_v14  ;;  %v5752_v29 = vld [vmem:[#allocation12 + $0xcc] sm:$0xf]  ;;  %v5802_v21 = vld [vmem:[#allocation12 + $0x254] sm:$0xf0] }
 0x16e   :  { %v6430_v11 = vpack.c.bf16 %v1425_v37, %v1425_v37  ;;  %v1343_v10 = vadd.f32 %v1342_v38, %v1330_v60  ;;  %v4526_v53 = vor.u32 %v5752_v29, %v4523_v30  ;;  %v5818_v38 = vld [vmem:[#allocation12 + $0x2d4] sm:$0xf0]  ;;  %v5740_v60 = vld [vmem:[#allocation12 + $0x6c] sm:$0xf]  ;;  %v4697_v30 = vld [vmem:[#allocation12 + $0x228] sm:$0xf] }
 0x16f   :  { %v1305_v47 = vpop.f32.mrf.mxu2  ;;  %v4778_v44 = vor.u32 %v5818_v38, %v4777_v36  ;;  %v5784_v14 = vld [vmem:[#allocation12 + $0x1cc] sm:$0xf]  ;;  %v4619_v36 = vld [vmem:[#allocation12 + $0x198] sm:$0xf0] }
 0x170   :  { %v1318_v50 = vpop.f32.mrf.mxu3  ;;  %2231 = vmatmul.bf16.vlgmr.msrb.gmra.mxu1 %v6430_v11  ;;  %2270 = vmatmul.bf16.vlgmr.msra.gmra.mxu0 %v6427_v61  ;;  %v4761_v47 = vld [vmem:[#allocation12 + $0x2a8] sm:$0xf]  ;;  %v5776_v35 = vld [vmem:[#allocation12 + $0x18c] sm:$0xf] }
 0x171   :  { %2318 = vmatpush.bf16.msrb.mxu0 %v4474_v39  ;;  %2327 = vmatpush.bf16.msrb.mxu1 %v4666_v40  ;;  %v5748_v39 = vld [vmem:[#allocation12 + $0xac] sm:$0xf]  ;;  %v4507_v40 = vld [vmem:[#allocation12 + $0xb8] sm:$0xf0]  ;;  %v4762_v54 = vor.u32 %v5814_v49, %v4761_v47 }
 0x172   :  { %v1331_v62 = vpop.f32.mrf.mxu0  ;;  %2308 = vmatpush.bf16.msra.mxu3 %v4806_v31  ;;  %v4510_v45 = vor.u32 %v5748_v39, %v4507_v40  ;;  %v5744_v50 = vld [vmem:[#allocation12 + $0x8c] sm:$0xf]  ;;  %v4603_v49 = vld [vmem:[#allocation12 + $0x178] sm:$0xf0] }
 0x173   :  { %v4475_v62 = vld [vmem:[#allocation12 + $0x78] sm:$0xf0]  ;;  %v5772_v47 = vld [vmem:[#allocation12 + $0x16c] sm:$0xf] }
 0x174   :  { %v4478_v7 = vor.u32 %v5740_v60, %v4475_v62  ;;  %v4606_v57 = vor.u32 %v5772_v47, %v4603_v49  ;;  %v5850_v60 = vld [vmem:[#allocation12 + $0x3d4] sm:$0xf0]  ;;  %v5768_v62 = vld [vmem:[#allocation12 + $0x14c] sm:$0xf]  ;;  %v4923_v47 = vld [vmem:[#allocation12 + $0x3f8] sm:$0xf0] }
 0x175   :  { %v1344_v0 = vpop.f32.mrf.mxu1  ;;  %2319 = vmatpush.bf16.msrb.mxu0 %v4458_v51  ;;  %2328 = vmatpush.bf16.msrb.mxu1 %v4650_v52  ;;  %v4491_v51 = vld [vmem:[#allocation12 + $0x98] sm:$0xf0]  ;;  %v4570_v52 = vor.u32 %v5766_v46, %v4569_v17  ;;  %v4921_v17 = vld [vmem:[#allocation12 + $0x3e8] sm:$0xf]  ;;  %v5854_v46 = vld [vmem:[#allocation12 + $0x3f4] sm:$0xf0] }
 0x176   :  { %v4494_v55 = vor.u32 %v5744_v50, %v4491_v51  ;;  %v5788_v0 = vld [vmem:[#allocation12 + $0x1ec] sm:$0xf]  ;;  %v4795_v51 = vld [vmem:[#allocation12 + $0x2f8] sm:$0xf0] }
 0x177   :  { %v1355_v15 = vpop.f32.mrf.mxu2  ;;  %v5820_v50 = vld [vmem:[#allocation12 + $0x2ec] sm:$0xf] }
 0x178   :  { %v1368_v16 = vpop.f32.mrf.mxu3  ;;  %v1356_v18 = vadd.f32 %v1355_v15, %v1343_v10  ;;  %v5806_v10 = vld [vmem:[#allocation12 + $0x274] sm:$0xf0]  ;;  %v4651_v15 = vld [vmem:[#allocation12 + $0x1d8] sm:$0xf0]  ;;  %v4798_v58 = vor.u32 %v5820_v50, %v4795_v51  ;;  %v5848_v51 = vld [vmem:[#allocation12 + $0x3cc] sm:$0xf] }
 0x179   :  { %2320 = vmatpush.bf16.msrb.mxu0 %v4442_v1  ;;  %2329 = vmatpush.bf16.msrb.mxu1 %v4634_v3  ;;  %v4667_v1 = vld [vmem:[#allocation12 + $0x1f8] sm:$0xf0]  ;;  %v4654_v2 = vor.u32 %v5784_v14, %v4651_v15 }
 0x17a   :  { %v1369_v27 = vadd.f32 %v1368_v16, %v1356_v18  ;;  %v4670_v9 = vor.u32 %v5788_v0, %v4667_v1  ;;  %v4730_v16 = vor.u32 %v5806_v10, %v4729_v8  ;;  %v4462_v18 = vor.u32 %v5736_v12, %v4459_v13  ;;  %v4587_v0 = vld [vmem:[#allocation12 + $0x158] sm:$0xf0]  ;;  %v5816_v1 = vld [vmem:[#allocation12 + $0x2cc] sm:$0xf]  ;;  %v4889_v8 = vld [vmem:[#allocation12 + $0x3a8] sm:$0xf] }
 0x17b   :  { %v5764_v10 = vld [vmem:[#allocation12 + $0x12c] sm:$0xf]  ;;  %v4571_v12 = vld [vmem:[#allocation12 + $0x138] sm:$0xf0] }
 0x17c   :  { %v1426_v32 = vmax.f32 %v1369_v27, 0.0  ;;  %v5812_v13 = vld [vmem:[#allocation12 + $0x2ac] sm:$0xf]  ;;  %v4763_v14 = vld [vmem:[#allocation12 + $0x2b8] sm:$0xf0] }
 0x17d   :  { %2321 = vmatpush.bf16.msrb.mxu0 %v4426_v19  ;;  %2330 = vmatpush.bf16.msrb.mxu1 %v4618_v20  ;;  %v4713_v19 = vld [vmem:[#allocation12 + $0x248] sm:$0xf] }
 0x17e   :  { %v6435_v37 = vpack.c.bf16 %v1426_v32, %v1426_v32  ;;  %v4714_v28 = vor.u32 %v5802_v21, %v4713_v19  ;;  %v4638_v32 = vor.u32 %v5780_v25, %v4635_v26  ;;  %v5842_v19 = vld [vmem:[#allocation12 + $0x394] sm:$0xf0]  ;;  %v5808_v21 = vld [vmem:[#allocation12 + $0x28c] sm:$0xf]  ;;  %v4857_v26 = vld [vmem:[#allocation12 + $0x368] sm:$0xf] }
 0x17f   :  { %v1357_v41 = vpop.f32.mrf.mxu2 }
 0x180   :  { %v1370_v42 = vpop.f32.mrf.mxu3  ;;  %2283 = vmatmul.bf16.vlgmr.msra.gmra.mxu1 %v6430_v11  ;;  %2322 = vmatmul.bf16.vlgmr.msrb.gmra.mxu0 %v6427_v61 }
 0x181   :  { %2366 = vmatpush.bf16.msra.mxu0 %v4542_v23  ;;  %2244 = vmatmul.bf16.vlgmr.msrb.gmra.mxu2 %v6435_v37  ;;  %v4443_v23 = vld [vmem:[#allocation12 + $0x38] sm:$0xf0]  ;;  %v4681_v42 = vld [vmem:[#allocation12 + $0x208] sm:$0xf] }
 0x182   :  { %2331 = vmatpush.bf16.msrb.mxu1 %v4602_v48  ;;  %2340 = vmatpush.bf16.msrb.mxu2 %v4794_v33  ;;  %v4446_v29 = vor.u32 %v5732_v22, %v4443_v23  ;;  %v5798_v48 = vld [vmem:[#allocation12 + $0x234] sm:$0xf0]  ;;  %v5728_v33 = vld [vmem:[#allocation12 + $0xc] sm:$0xf]  ;;  %v4747_v22 = vld [vmem:[#allocation12 + $0x298] sm:$0xf0] }
 0x183   :  { %v4698_v40 = vor.u32 %v5798_v48, %v4697_v30  ;;  %v4750_v25 = vor.u32 %v5808_v21, %v4747_v22  ;;  %v5834_v48 = vld [vmem:[#allocation12 + $0x354] sm:$0xf0]  ;;  %v5873_v21 = vld [vmem:[#allocation14 + $0x8c] sm:$0xf0]  ;;  %v4977_v22 = vld [vmem:[#allocation14 + $0x60] sm:$0xf] }
 0x185   :  { %2367 = vmatpush.bf16.msra.mxu0 %v4526_v53  ;;  %v4427_v53 = vld [vmem:[#allocation12 + $0x18] sm:$0xf0] }
 0x186   :  { %2332 = vmatpush.bf16.msrb.mxu1 %v4586_v43  ;;  %2341 = vmatpush.bf16.msrb.mxu2 %v4778_v44  ;;  %v4430_v41 = vor.u32 %v5728_v33, %v4427_v53  ;;  %v5794_v43 = vld [vmem:[#allocation12 + $0x214] sm:$0xf0]  ;;  %v5800_v33 = vld [vmem:[#allocation12 + $0x24c] sm:$0xf]  ;;  %v4715_v53 = vld [vmem:[#allocation12 + $0x258] sm:$0xf0] }
 0x189   :  { %2368 = vmatpush.bf16.msra.mxu0 %v4510_v45  ;;  %v4622_v45 = vor.u32 %v5776_v35, %v4619_v36  ;;  %v4718_v35 = vor.u32 %v5800_v33, %v4715_v53  ;;  %v4825_v36 = vld [vmem:[#allocation12 + $0x328] sm:$0xf]  ;;  %v5913_v33 = vld [vmem:[#allocation14 + $0x1cc] sm:$0xf0] }
 0x18a   :  { %v1381_v63 = vpop.f32.mrf.mxu0  ;;  %2333 = vmatpush.bf16.msrb.mxu1 %v4570_v52  ;;  %2342 = vmatpush.bf16.msrb.mxu2 %v4762_v54  ;;  %v4682_v54 = vor.u32 %v5794_v43, %v4681_v42  ;;  %v4809_v43 = vld [vmem:[#allocation12 + $0x308] sm:$0xf] }
 0x18b   :  { %v1382_v20 = vadd.f32 %v1381_v63, %v571_v5  ;;  %v4906_v5 = vor.u32 %v5850_v60, %v4905_v59  ;;  %v5840_v59 = vld [vmem:[#allocation12 + $0x38c] sm:$0xf]  ;;  %v4875_v60 = vld [vmem:[#allocation12 + $0x398] sm:$0xf0] }
 0x18d   :  { %v1394_v3 = vpop.f32.mrf.mxu1  ;;  %2369 = vmatpush.bf16.msra.mxu0 %v4494_v55  ;;  %v4922_v55 = vor.u32 %v5854_v46, %v4921_v17  ;;  %v4683_v17 = vld [vmem:[#allocation12 + $0x218] sm:$0xf0]  ;;  %v5852_v46 = vld [vmem:[#allocation12 + $0x3ec] sm:$0xf] }
 0x18e   :  { %2334 = vmatpush.bf16.msrb.mxu1 %v4554_v4  ;;  %2343 = vmatpush.bf16.msrb.mxu2 %v4746_v6  ;;  %v1395_v31 = vadd.f32 %v1394_v3, %v1382_v20  ;;  %v4779_v3 = vld [vmem:[#allocation12 + $0x2d8] sm:$0xf0]  ;;  %v4590_v6 = vor.u32 %v5768_v62, %v4587_v0  ;;  %v5760_v20 = vld [vmem:[#allocation12 + $0x10c] sm:$0xf]  ;;  %v4926_v50 = vor.u32 %v5852_v46, %v4923_v47  ;;  %v5043_v46 = vld [vmem:[#allocation14 + $0xf0] sm:$0xf0] }
 0x18f   :  { %v4878_v62 = vor.u32 %v5840_v59, %v4875_v60  ;;  %v4859_v0 = vld [vmem:[#allocation12 + $0x378] sm:$0xf0] }
 0x191   :  { %2370 = vmatpush.bf16.msra.mxu0 %v4478_v7  ;;  %2335 = vmatmul.bf16.vlgmr.msrb.gmra.mxu1 %v6430_v11  ;;  %v4782_v7 = vor.u32 %v5816_v1, %v4779_v3  ;;  %v5041_v1 = vld [vmem:[#allocation14 + $0xe0] sm:$0xf]  ;;  %v5885_v3 = vld [vmem:[#allocation14 + $0xec] sm:$0xf0] }
 0x192   :  { %2379 = vmatpush.bf16.msra.mxu1 %v4670_v9  ;;  %v1383_v24 = vpop.f32.mrf.mxu0  ;;  %2296 = vmatmul.bf16.vlgmr.msra.gmra.mxu2 %v6435_v37  ;;  %v5846_v9 = vld [vmem:[#allocation12 + $0x3b4] sm:$0xf0] }
 0x193   :  { %2344 = vmatpush.bf16.msrb.mxu2 %v4730_v16  ;;  %v4890_v15 = vor.u32 %v5846_v9, %v4889_v8  ;;  %v4766_v16 = vor.u32 %v5812_v13, %v4763_v14  ;;  %v5828_v9 = vld [vmem:[#allocation12 + $0x32c] sm:$0xf] }
 0x195   :  { %v1396_v27 = vpop.f32.mrf.mxu1  ;;  %2371 = vmatpush.bf16.msra.mxu0 %v4462_v18  ;;  %v4873_v18 = vld [vmem:[#allocation12 + $0x388] sm:$0xf] }
 0x196   :  { %2380 = vmatpush.bf16.msra.mxu1 %v4654_v2  ;;  %v4555_v2 = vld [vmem:[#allocation12 + $0x118] sm:$0xf0]  ;;  %v4874_v23 = vor.u32 %v5842_v19, %v4873_v18  ;;  %v5838_v27 = vld [vmem:[#allocation12 + $0x374] sm:$0xf0] }
 0x197   :  { %v1407_v34 = vpop.f32.mrf.mxu2  ;;  %2345 = vmatpush.bf16.msrb.mxu2 %v4714_v28  ;;  %v4558_v24 = vor.u32 %v5760_v20, %v4555_v2  ;;  %v5804_v28 = vld [vmem:[#allocation12 + $0x26c] sm:$0xf]  ;;  %v4858_v30 = vor.u32 %v5838_v27, %v4857_v26  ;;  %v4811_v18 = vld [vmem:[#allocation12 + $0x318] sm:$0xf0]  ;;  %v4993_v2 = vld [vmem:[#allocation14 + $0x80] sm:$0xf] }
 0x198   :  { %v1408_v38 = vadd.f32 %v1407_v34, %v1395_v31  ;;  %v1420_v39 = vpop.f32.mrf.mxu3  ;;  %v5917_v26 = vld [vmem:[#allocation14 + $0x1ec] sm:$0xf0] }
 0x199   :  { %2372 = vmatpush.bf16.msra.mxu0 %v4446_v29  ;;  %v4731_v29 = vld [vmem:[#allocation12 + $0x278] sm:$0xf0] }
 0x19a   :  { %v1421_v44 = vadd.f32 %v1420_v39, %v1408_v38  ;;  %2381 = vmatpush.bf16.msra.mxu1 %v4638_v32  ;;  %v4734_v31 = vor.u32 %v5804_v28, %v4731_v29  ;;  %v4841_v32 = vld [vmem:[#allocation12 + $0x348] sm:$0xf]  ;;  %v5830_v38 = vld [vmem:[#allocation12 + $0x334] sm:$0xf0]  ;;  %v5796_v39 = vld [vmem:[#allocation12 + $0x22c] sm:$0xf] }
 0x19b   :  { %2346 = vmatpush.bf16.msrb.mxu2 %v4698_v40  ;;  %v4842_v34 = vor.u32 %v5834_v48, %v4841_v32  ;;  %v4699_v40 = vld [vmem:[#allocation12 + $0x238] sm:$0xf0]  ;;  %v5153_v48 = vld [vmem:[#allocation14 + $0x1c0] sm:$0xf] }
 0x19c   :  { %v1427_v52 = vmax.f32 %v1421_v44, 0.0  ;;  %v4702_v42 = vor.u32 %v5796_v39, %v4699_v40  ;;  %v5826_v44 = vld [vmem:[#allocation12 + $0x314] sm:$0xf0]  ;;  %v5154_v53 = vor.u32 %v5913_v33, %v5153_v48  ;;  %v5909_v39 = vld [vmem:[#allocation14 + $0x1ac] sm:$0xf0] }
 0x19d   :  { %2373 = vmatpush.bf16.msra.mxu0 %v4430_v41  ;;  %v4826_v41 = vor.u32 %v5830_v38, %v4825_v36  ;;  %v4810_v49 = vor.u32 %v5826_v44, %v4809_v43  ;;  %v5137_v36 = vld [vmem:[#allocation14 + $0x1a0] sm:$0xf]  ;;  %v5933_v48 = vld [vmem:[#allocation14 + $0x26c] sm:$0xf0] }
 0x19e   :  { %v6443_v56 = vpack.c.bf16 %v1427_v52, %v1427_v52  ;;  %2382 = vmatpush.bf16.msra.mxu1 %v4622_v45  ;;  %v5792_v45 = vld [vmem:[#allocation12 + $0x20c] sm:$0xf]  ;;  %v4907_v52 = vld [vmem:[#allocation12 + $0x3d8] sm:$0xf0]  ;;  %v5121_v43 = vld [vmem:[#allocation14 + $0x180] sm:$0xf] }
 0x19f   :  { %v1409_v63 = vpop.f32.mrf.mxu2  ;;  %2347 = vmatpush.bf16.msrb.mxu2 %v4682_v54  ;;  %v4910_v54 = vor.u32 %v5848_v51, %v4907_v52  ;;  %v5297_v51 = vld [vmem:[#allocation14 + $0x2e0] sm:$0xf] }
 0x1a0   :  { %v1422_v4 = vpop.f32.mrf.mxu3  ;;  %2257 = vmatmul.bf16.vlgmr.msrb.gmra.mxu3 %v6443_v56  ;;  %2374 = vmatmul.bf16.vlgmr.msra.gmra.mxu0 %v6427_v61  ;;  %v4574_v61 = vor.u32 %v5764_v10, %v4571_v12  ;;  %v5836_v63 = vld [vmem:[#allocation12 + $0x36c] sm:$0xf]  ;;  %v5025_v10 = vld [vmem:[#allocation14 + $0xc0] sm:$0xf]  ;;  %v5881_v12 = vld [vmem:[#allocation14 + $0xcc] sm:$0xf0] }
 0x1a1   :  { %2353 = vmatpush.bf16.msrb.mxu3 %v4922_v55  ;;  %v5844_v55 = vld [vmem:[#allocation12 + $0x3ac] sm:$0xf]  ;;  %v5042_v4 = vor.u32 %v5885_v3, %v5041_v1  ;;  %v5026_v14 = vor.u32 %v5881_v12, %v5025_v10  ;;  %v5281_v1 = vld [vmem:[#allocation14 + $0x2c0] sm:$0xf] }
 0x1a2   :  { %2383 = vmatpush.bf16.msra.mxu1 %v4606_v57  ;;  %2348 = vmatmul.bf16.vlgmr.msrb.gmra.mxu2 %v6435_v37  ;;  %v4891_v57 = vld [vmem:[#allocation12 + $0x3b8] sm:$0xf0]  ;;  %v5265_v10 = vld [vmem:[#allocation14 + $0x2a0] sm:$0xf] }
 0x1a3   :  { %2392 = vmatpush.bf16.msra.mxu2 %v4798_v58  ;;  %v4894_v58 = vor.u32 %v5844_v55, %v4891_v57  ;;  %3204 = vmatpush.bf16.msrb.mxu0 %v5042_v4  ;;  %v5879_v55 = vld [vmem:[#allocation14 + $0xc4] sm:$0xf]  ;;  %v5027_v57 = vld [vmem:[#allocation14 + $0xd0] sm:$0xf0]  ;;  %v5945_v4 = vld [vmem:[#allocation14 + $0x2cc] sm:$0xf0] }
 0x1a5   :  { %2354 = vmatpush.bf16.msrb.mxu3 %v4906_v5  ;;  %v4862_v5 = vor.u32 %v5836_v63, %v4859_v0  ;;  %v5089_v63 = vld [vmem:[#allocation14 + $0x140] sm:$0xf]  ;;  %v5897_v0 = vld [vmem:[#allocation14 + $0x14c] sm:$0xf0] }
 0x1a6   :  { %2384 = vmatpush.bf16.msra.mxu1 %v4590_v6  ;;  %v5832_v6 = vld [vmem:[#allocation12 + $0x34c] sm:$0xf]  ;;  %v5090_v3 = vor.u32 %v5897_v0, %v5089_v63  ;;  %v5123_v0 = vld [vmem:[#allocation14 + $0x190] sm:$0xf0] }
 0x1a7   :  { %2393 = vmatpush.bf16.msra.mxu2 %v4782_v7  ;;  %v4843_v7 = vld [vmem:[#allocation12 + $0x358] sm:$0xf0]  ;;  %3205 = vmatpush.bf16.msrb.mxu0 %v5026_v14  ;;  %v5871_v14 = vld [vmem:[#allocation14 + $0x84] sm:$0xf] }
 0x1a8   :  { %v4846_v8 = vor.u32 %v5832_v6, %v4843_v7  ;;  %v5011_v6 = vld [vmem:[#allocation14 + $0xb0] sm:$0xf0]  ;;  %v5282_v7 = vor.u32 %v5945_v4, %v5281_v1  ;;  %v5921_v4 = vld [vmem:[#allocation14 + $0x20c] sm:$0xf0] }
 0x1a9   :  { %2355 = vmatpush.bf16.msrb.mxu3 %v4890_v15  ;;  %v5009_v15 = vld [vmem:[#allocation14 + $0xa0] sm:$0xf] }
 0x1aa   :  { %2385 = vmatpush.bf16.msra.mxu1 %v4574_v61  ;;  %v5877_v61 = vld [vmem:[#allocation14 + $0xac] sm:$0xf0] }
 0x1ab   :  { %2394 = vmatpush.bf16.msra.mxu2 %v4766_v16  ;;  %v5824_v16 = vld [vmem:[#allocation12 + $0x30c] sm:$0xf]  ;;  %v5010_v19 = vor.u32 %v5877_v61, %v5009_v15  ;;  %v4995_v15 = vld [vmem:[#allocation14 + $0x90] sm:$0xf0] }
 0x1ac   :  { %v4814_v20 = vor.u32 %v5824_v16, %v4811_v18 }
 0x1ad   :  { %2356 = vmatpush.bf16.msrb.mxu3 %v4874_v23  ;;  %3206 = vmatpush.bf16.msrb.mxu0 %v5010_v19  ;;  %v4994_v23 = vor.u32 %v5873_v21, %v4993_v2  ;;  %v4998_v19 = vor.u32 %v5871_v14, %v4995_v15  ;;  %v5889_v2 = vld [vmem:[#allocation14 + $0x10c] sm:$0xf0]  ;;  %v5249_v21 = vld [vmem:[#allocation14 + $0x280] sm:$0xf] }
 0x1ae   :  { %2386 = vmatpush.bf16.msra.mxu1 %v4558_v24  ;;  %v5869_v24 = vld [vmem:[#allocation14 + $0x6c] sm:$0xf0]  ;;  %v5409_v15 = vld [vmem:[#allocation14 + $0x3c0] sm:$0xf] }
 0x1af   :  { %2395 = vmatpush.bf16.msra.mxu2 %v4750_v25  ;;  %v5169_v25 = vld [vmem:[#allocation14 + $0x1e0] sm:$0xf]  ;;  %v4978_v28 = vor.u32 %v5869_v24, %v4977_v22  ;;  %v5937_v22 = vld [vmem:[#allocation14 + $0x28c] sm:$0xf0] }
 0x1b0   :  { %2309 = vmatmul.bf16.vlgmr.msra.gmra.mxu3 %v6443_v56  ;;  %v5170_v27 = vor.u32 %v5917_v26, %v5169_v25  ;;  %v5250_v24 = vor.u32 %v5937_v22, %v5249_v21  ;;  %v5867_v25 = vld [vmem:[#allocation14 + $0x64] sm:$0xf]  ;;  %v4979_v26 = vld [vmem:[#allocation14 + $0x70] sm:$0xf0] }
 0x1b1   :  { %2357 = vmatpush.bf16.msrb.mxu3 %v4858_v30  ;;  %2387 = vmatmul.bf16.vlgmr.msra.gmra.mxu1 %v6430_v11  ;;  %v4686_v11 = vor.u32 %v5792_v45, %v4683_v17  ;;  %v4961_v30 = vld [vmem:[#allocation14 + $0x40] sm:$0xf]  ;;  %v5905_v45 = vld [vmem:[#allocation14 + $0x18c] sm:$0xf0]  ;;  %v5883_v17 = vld [vmem:[#allocation14 + $0xe4] sm:$0xf] }
 0x1b2   :  { %3207 = vmatpush.bf16.msrb.mxu0 %v4994_v23  ;;  %3217 = vmatpush.bf16.msrb.mxu1 %v5170_v27  ;;  %v5122_v47 = vor.u32 %v5905_v45, %v5121_v43  ;;  %v5915_v27 = vld [vmem:[#allocation14 + $0x1e4] sm:$0xf]  ;;  %v4947_v45 = vld [vmem:[#allocation14 + $0x30] sm:$0xf0] }
 0x1b3   :  { %2396 = vmatpush.bf16.msra.mxu2 %v4734_v31  ;;  %v5865_v31 = vld [vmem:[#allocation14 + $0x4c] sm:$0xf0] }
 0x1b4   :  { %v4962_v32 = vor.u32 %v5865_v31, %v4961_v30  ;;  %v5171_v30 = vld [vmem:[#allocation14 + $0x1f0] sm:$0xf0] }
 0x1b5   :  { %2358 = vmatpush.bf16.msrb.mxu3 %v4842_v34  ;;  %v4945_v34 = vld [vmem:[#allocation14 + $0x20] sm:$0xf]  ;;  %v5174_v31 = vor.u32 %v5915_v27, %v5171_v30  ;;  %v5075_v30 = vld [vmem:[#allocation14 + $0x130] sm:$0xf0] }
 0x1b6   :  { %3208 = vmatpush.bf16.msrb.mxu0 %v4978_v28  ;;  %3218 = vmatpush.bf16.msrb.mxu1 %v5154_v53  ;;  %v4982_v28 = vor.u32 %v5867_v25, %v4979_v26  ;;  %v5863_v53 = vld [vmem:[#allocation14 + $0x44] sm:$0xf]  ;;  %v5393_v25 = vld [vmem:[#allocation14 + $0x3a0] sm:$0xf]  ;;  %v5973_v26 = vld [vmem:[#allocation14 + $0x3ac] sm:$0xf0] }
 0x1b7   :  { %2397 = vmatpush.bf16.msra.mxu2 %v4718_v35  ;;  %v5861_v35 = vld [vmem:[#allocation14 + $0x2c] sm:$0xf0]  ;;  %v5394_v27 = vor.u32 %v5973_v26, %v5393_v25  ;;  %v5033_v25 = vld [vmem:[#allocation14 + $0xc8] sm:$0xf]  ;;  %v5882_v26 = vld [vmem:[#allocation14 + $0xd4] sm:$0xf0] }
 0x1b8   :  { %v4946_v38 = vor.u32 %v5861_v35, %v4945_v34  ;;  %v4963_v34 = vld [vmem:[#allocation14 + $0x50] sm:$0xf0]  ;;  %v5911_v35 = vld [vmem:[#allocation14 + $0x1c4] sm:$0xf] }
 0x1b9   :  { %2359 = vmatpush.bf16.msrb.mxu3 %v4826_v41  ;;  %v5138_v41 = vor.u32 %v5909_v39, %v5137_v36  ;;  %v4966_v39 = vor.u32 %v5863_v53, %v4963_v34  ;;  %v6470_v53 = vld [vmem:[%s6555_s6] sm:$0xf]  ;;  %v5377_v34 = vld [vmem:[#allocation14 + $0x380] sm:$0xf] }
 0x1ba   :  { %3209 = vmatpush.bf16.msrb.mxu0 %v4962_v32  ;;  %v5233_v32 = vld [vmem:[#allocation14 + $0x260] sm:$0xf] }
 0x1bb   :  { %2398 = vmatpush.bf16.msra.mxu2 %v4702_v42  ;;  %v4929_v42 = vld [vmem:[#allocation14] sm:$0xf]  ;;  %3219 = vmatpush.bf16.msrb.mxu1 %v5138_v41  ;;  %v5234_v33 = vor.u32 %v5933_v48, %v5233_v32  ;;  %v5267_v48 = vld [vmem:[#allocation14 + $0x2b0] sm:$0xf0] }
 0x1bd   :  { %2360 = vmatpush.bf16.msrb.mxu3 %v4810_v49  ;;  %v5046_v49 = vor.u32 %v5883_v17, %v5043_v46  ;;  %v5907_v17 = vld [vmem:[#allocation14 + $0x1a4] sm:$0xf] }
 0x1be   :  { %3210 = vmatpush.bf16.msrb.mxu0 %v4946_v38 }
 0x1bf   :  { %2399 = vmatpush.bf16.msra.mxu2 %v4686_v11  ;;  %3220 = vmatpush.bf16.msrb.mxu1 %v5122_v47  ;;  %v5105_v11 = vld [vmem:[#allocation14 + $0x160] sm:$0xf]  ;;  %v5139_v47 = vld [vmem:[#allocation14 + $0x1b0] sm:$0xf0] }
 0x1c0   :  { %2361 = vmatmul.bf16.vlgmr.msrb.gmra.mxu3 %v6443_v56 }
 0x1c1   :  { %2405 = vmatpush.bf16.msra.mxu3 %v4926_v50  ;;  %v5901_v50 = vld [vmem:[#allocation14 + $0x16c] sm:$0xf0] }
 0x1c2   :  { %2400 = vmatmul.bf16.vlgmr.msra.gmra.mxu2 %v6435_v37  ;;  %v4827_v37 = vld [vmem:[#allocation12 + $0x338] sm:$0xf0]  ;;  %v5106_v52 = vor.u32 %v5901_v50, %v5105_v11  ;;  %v5201_v11 = vld [vmem:[#allocation14 + $0x220] sm:$0xf]  ;;  %v5925_v50 = vld [vmem:[#allocation14 + $0x22c] sm:$0xf0] }
 0x1c3   :  { %v4830_v13 = vor.u32 %v5828_v9, %v4827_v37  ;;  %v5073_v9 = vld [vmem:[#allocation14 + $0x120] sm:$0xf]  ;;  %v5893_v37 = vld [vmem:[#allocation14 + $0x12c] sm:$0xf0] }
 0x1c4   :  { %3221 = vmatpush.bf16.msrb.mxu1 %v5106_v52  ;;  %v5074_v12 = vor.u32 %v5893_v37, %v5073_v9  ;;  %v5202_v52 = vor.u32 %v5925_v50, %v5201_v11  ;;  %v5107_v9 = vld [vmem:[#allocation14 + $0x170] sm:$0xf0]  ;;  %v5931_v50 = vld [vmem:[#allocation14 + $0x264] sm:$0xf] }
 0x1c5   :  { %2406 = vmatpush.bf16.msra.mxu3 %v4910_v54  ;;  %v5949_v54 = vld [vmem:[#allocation14 + $0x2ec] sm:$0xf0] }
 0x1c6   :  { %v5298_v60 = vor.u32 %v5949_v54, %v5297_v51  ;;  %v5855_v54 = vld [vmem:[#allocation14 + $0x4] sm:$0xf] }
 0x1c8   :  { %3230 = vmatpush.bf16.msrb.mxu2 %v5298_v60  ;;  %3222 = vmatpush.bf16.msrb.mxu1 %v5090_v3  ;;  %v5185_v3 = vld [vmem:[#allocation14 + $0x200] sm:$0xf] }
 0x1c9   :  { %2407 = vmatpush.bf16.msra.mxu3 %v4894_v58 }
 0x1cc   :  { %3231 = vmatpush.bf16.msrb.mxu2 %v5282_v7  ;;  %3223 = vmatpush.bf16.msrb.mxu1 %v5074_v12  ;;  %v5981_v7 = vld [vmem:[#allocation14 + $0x3ec] sm:$0xf0]  ;;  %v5947_v12 = vld [vmem:[#allocation14 + $0x2e4] sm:$0xf] }
 0x1cd   :  { %2408 = vmatpush.bf16.msra.mxu3 %v4878_v62  ;;  %v5030_v62 = vor.u32 %v5879_v55, %v5027_v57  ;;  %v4931_v55 = vld [vmem:[#allocation14 + $0x10] sm:$0xf0]  ;;  %v5903_v57 = vld [vmem:[#allocation14 + $0x184] sm:$0xf] }
 0x1ce   :  { %v4934_v63 = vor.u32 %v5855_v54, %v4931_v55  ;;  %v5126_v1 = vor.u32 %v5903_v57, %v5123_v0 }
 0x1d1   :  { %2409 = vmatpush.bf16.msra.mxu3 %v4862_v5  ;;  %v5875_v5 = vld [vmem:[#allocation14 + $0xa4] sm:$0xf] }
 0x1d5   :  { %2410 = vmatpush.bf16.msra.mxu3 %v4846_v8  ;;  %v5014_v8 = vor.u32 %v5875_v5, %v5011_v6  ;;  %v5425_v5 = vld [vmem:[#allocation14 + $0x3e0] sm:$0xf]  ;;  %v5186_v6 = vor.u32 %v5921_v4, %v5185_v3  ;;  %v5219_v3 = vld [vmem:[#allocation14 + $0x250] sm:$0xf0] }
 0x1d6   :  { %v5426_v37 = vor.u32 %v5981_v7, %v5425_v5  ;;  %v5329_v7 = vld [vmem:[#allocation14 + $0x320] sm:$0xf] }
 0x1d9   :  { %2411 = vmatpush.bf16.msra.mxu3 %v4830_v13  ;;  %v5941_v13 = vld [vmem:[#allocation14 + $0x2ac] sm:$0xf0] }
 0x1da   :  { %v5266_v18 = vor.u32 %v5941_v13, %v5265_v10  ;;  %v5299_v13 = vld [vmem:[#allocation14 + $0x2f0] sm:$0xf0] }
 0x1db   :  { %v5302_v14 = vor.u32 %v5947_v12, %v5299_v13  ;;  %v5049_v13 = vld [vmem:[#allocation14 + $0xe8] sm:$0xf] }
 0x1dc   :  { %3232 = vmatpush.bf16.msrb.mxu2 %v5266_v18 }
 0x1dd   :  { %2412 = vmatpush.bf16.msra.mxu3 %v4814_v20  ;;  %v6453_v29 = vpop.f32.mrf.mxu0  ;;  %v5057_v20 = vld [vmem:[#allocation14 + $0x100] sm:$0xf] }
 0x1de   :  { %v5058_v23 = vor.u32 %v5889_v2, %v5057_v20  ;;  %v5091_v20 = vld [vmem:[#allocation14 + $0x150] sm:$0xf0]  ;;  %v5943_v2 = vld [vmem:[#allocation14 + $0x2c4] sm:$0xf] }
 0x1e0   :  { %2413 = vmatmul.bf16.vlgmr.msra.gmra.mxu3 %v6443_v56  ;;  %v5857_v56 = vld [vmem:[#allocation14 + $0xc] sm:$0xf0]  ;;  %3224 = vmatpush.bf16.msrb.mxu1 %v5058_v23  ;;  %v5283_v23 = vld [vmem:[#allocation14 + $0x2d0] sm:$0xf0] }
 0x1e1   :  { %v4930_v44 = vor.u32 %v5857_v56, %v4929_v42  ;;  %3233 = vmatpush.bf16.msrb.mxu2 %v5250_v24  ;;  %v5217_v42 = vld [vmem:[#allocation14 + $0x240] sm:$0xf]  ;;  %v5929_v56 = vld [vmem:[#allocation14 + $0x24c] sm:$0xf0]  ;;  %3243 = vmatpush.bf16.msrb.mxu3 %v5426_v37  ;;  %v5286_v24 = vor.u32 %v5943_v2, %v5283_v23  ;;  %v5919_v2 = vld [vmem:[#allocation14 + $0x204] sm:$0xf] }
 0x1e2   :  { %v5218_v43 = vor.u32 %v5929_v56, %v5217_v42  ;;  %v5059_v42 = vld [vmem:[#allocation14 + $0x110] sm:$0xf0]  ;;  %v5935_v56 = vld [vmem:[#allocation14 + $0x284] sm:$0xf] }
 0x1e3   :  { %3211 = vmatpush.bf16.msrb.mxu0 %v4930_v44  ;;  %v5859_v44 = vld [vmem:[#allocation14 + $0x24] sm:$0xf] }
 0x1e4   :  { %3269 = vmatpush.bf16.msra.mxu1 %v5174_v31  ;;  %v4950_v46 = vor.u32 %v5859_v44, %v4947_v45  ;;  %v5939_v31 = vld [vmem:[#allocation14 + $0x2a4] sm:$0xf]  ;;  %v5251_v45 = vld [vmem:[#allocation14 + $0x290] sm:$0xf0] }
 0x1e5   :  { %v2221_v40 = vpop.f32.mrf.mxu0  ;;  %3234 = vmatpush.bf16.msrb.mxu2 %v5234_v33  ;;  %v5270_v33 = vor.u32 %v5939_v31, %v5267_v48  ;;  %v5979_v23 = vld [vmem:[#allocation14 + $0x3e4] sm:$0xf]  ;;  %v1563_v31 = vperm.slane %v6470_v53, 1  ;;  %v5034_v48 = vor.u32 %v5882_v26, %v5033_v25 }
 0x1e6   :  { %v5155_v40 = vld [vmem:[#allocation14 + $0x1d0] sm:$0xf0] }
 0x1e7   :  { %3256 = vmatpush.bf16.msra.mxu0 %v5046_v49  ;;  %v5158_v41 = vor.u32 %v5911_v35, %v5155_v40  ;;  %v5142_v49 = vor.u32 %v5907_v17, %v5139_v47  ;;  %v5969_v35 = vld [vmem:[#allocation14 + $0x38c] sm:$0xf0]  ;;  %v5254_v17 = vor.u32 %v5935_v56, %v5251_v45  ;;  %v5361_v47 = vld [vmem:[#allocation14 + $0x360] sm:$0xf]  ;;  %v5001_v45 = vld [vmem:[#allocation14 + $0x88] sm:$0xf] }
 0x1e8   :  { %v5378_v40 = vor.u32 %v5969_v35, %v5377_v34  ;;  %v5878_v34 = vld [vmem:[#allocation14 + $0xb4] sm:$0xf0]  ;;  %v5975_v35 = vld [vmem:[#allocation14 + $0x3c4] sm:$0xf] }
 0x1e9   :  { %3270 = vmatpush.bf16.msra.mxu1 %v5158_v41  ;;  %3235 = vmatpush.bf16.msrb.mxu2 %v5218_v43  ;;  %v5887_v41 = vld [vmem:[#allocation14 + $0x104] sm:$0xf] }
 0x1ea   :  { %v5062_v44 = vor.u32 %v5887_v41, %v5059_v42 }
 0x1eb   :  { %3257 = vmatpush.bf16.msra.mxu0 %v5030_v62 }
 0x1ed   :  { %v6455_v58 = vpop.f32.mrf.mxu1  ;;  %v6457_v59 = vpop.f32.mrf.mxu0  ;;  %3271 = vmatpush.bf16.msra.mxu1 %v5142_v49  ;;  %3236 = vmatpush.bf16.msrb.mxu2 %v5202_v52  ;;  %v5965_v49 = vld [vmem:[#allocation14 + $0x36c] sm:$0xf0]  ;;  %v5235_v52 = vld [vmem:[#allocation14 + $0x270] sm:$0xf0] }
 0x1ee   :  { %v5362_v11 = vor.u32 %v5965_v49, %v5361_v47  ;;  %v5238_v54 = vor.u32 %v5931_v50, %v5235_v52  ;;  %v2272_v42 = vadd.f32 %v6457_v59, %v1563_v31  ;;  %v5971_v47 = vld [vmem:[#allocation14 + $0x3a4] sm:$0xf]  ;;  %v5395_v49 = vld [vmem:[#allocation14 + $0x3b0] sm:$0xf0]  ;;  %v5870_v59 = vld [vmem:[#allocation14 + $0x74] sm:$0xf0] }
 0x1ef   :  { %3258 = vmatpush.bf16.msra.mxu0 %v5014_v8  ;;  %v5899_v8 = vld [vmem:[#allocation14 + $0x164] sm:$0xf] }
 0x1f0   :  { %v5110_v10 = vor.u32 %v5899_v8, %v5107_v9  ;;  %v5957_v8 = vld [vmem:[#allocation14 + $0x32c] sm:$0xf0] }
 0x1f1   :  { %3272 = vmatpush.bf16.msra.mxu1 %v5126_v1  ;;  %3237 = vmatpush.bf16.msrb.mxu2 %v5186_v6  ;;  %v5927_v1 = vld [vmem:[#allocation14 + $0x244] sm:$0xf]  ;;  %v5330_v37 = vor.u32 %v5957_v8, %v5329_v7  ;;  %v4969_v7 = vld [vmem:[#allocation14 + $0x48] sm:$0xf]  ;;  %v5866_v8 = vld [vmem:[#allocation14 + $0x54] sm:$0xf0] }
 0x1f2   :  { %v5222_v5 = vor.u32 %v5927_v1, %v5219_v3  ;;  %v5379_v1 = vld [vmem:[#allocation14 + $0x390] sm:$0xf0] }
 0x1f3   :  { %3259 = vmatpush.bf16.msra.mxu0 %v4998_v19  ;;  %v5895_v19 = vld [vmem:[#allocation14 + $0x144] sm:$0xf] }
 0x1f4   :  { %v5094_v22 = vor.u32 %v5895_v19, %v5091_v20 }
 0x1f5   :  { %v2234_v61 = vpop.f32.mrf.mxu1  ;;  %v2273_v16 = vpop.f32.mrf.mxu0  ;;  %3273 = vmatpush.bf16.msra.mxu1 %v5110_v10  ;;  %3282 = vmatpush.bf16.msra.mxu2 %v5302_v14  ;;  %v5203_v10 = vld [vmem:[#allocation14 + $0x230] sm:$0xf0]  ;;  %v5886_v14 = vld [vmem:[#allocation14 + $0xf4] sm:$0xf0] }
 0x1f6   :  { %v5977_v61 = vld [vmem:[#allocation14 + $0x3cc] sm:$0xf0] }
 0x1f7   :  { %3260 = vmatpush.bf16.msra.mxu0 %v4982_v28  ;;  %v5410_v18 = vor.u32 %v5977_v61, %v5409_v15  ;;  %v5891_v28 = vld [vmem:[#allocation14 + $0x124] sm:$0xf] }
 0x1f8   :  { %v5078_v32 = vor.u32 %v5891_v28, %v5075_v30  ;;  %v5427_v28 = vld [vmem:[#allocation14 + $0x3f0] sm:$0xf0] }
 0x1f9   :  { %3244 = vmatpush.bf16.msrb.mxu3 %v5410_v18  ;;  %3274 = vmatpush.bf16.msra.mxu1 %v5094_v22  ;;  %v5313_v18 = vld [vmem:[#allocation14 + $0x300] sm:$0xf]  ;;  %v5187_v22 = vld [vmem:[#allocation14 + $0x210] sm:$0xf0]  ;;  %v5430_v30 = vor.u32 %v5979_v23, %v5427_v28  ;;  %v5858_v28 = vld [vmem:[#allocation14 + $0x14] sm:$0xf0] }
 0x1fa   :  { %3283 = vmatpush.bf16.msra.mxu2 %v5286_v24 }
 0x1fb   :  { %3261 = vmatpush.bf16.msra.mxu0 %v4966_v39 }
 0x1fd   :  { %v6459_v36 = vpop.f32.mrf.mxu1  ;;  %v6461_v38 = vpop.f32.mrf.mxu0  ;;  %3245 = vmatpush.bf16.msrb.mxu3 %v5394_v27  ;;  %3275 = vmatpush.bf16.msra.mxu1 %v5078_v32  ;;  %v5190_v27 = vor.u32 %v5919_v2, %v5187_v22  ;;  %v5347_v2 = vld [vmem:[#allocation14 + $0x350] sm:$0xf0] }
 0x1fe   :  { %3284 = vmatpush.bf16.msra.mxu2 %v5270_v33  ;;  %v5017_v33 = vld [vmem:[#allocation14 + $0xa8] sm:$0xf] }
 0x1ff   :  { %3262 = vmatpush.bf16.msra.mxu0 %v4950_v46  ;;  %v1562_v46 = vperm.slane %v6470_v53, 0 }
 0x201   :  { %3246 = vmatpush.bf16.msrb.mxu3 %v5378_v40  ;;  %3276 = vmatpush.bf16.msra.mxu1 %v5062_v44  ;;  %v2220_v57 = vadd.f32 %v6453_v29, %v1562_v46  ;;  %v5923_v29 = vld [vmem:[#allocation14 + $0x224] sm:$0xf]  ;;  %v5411_v40 = vld [vmem:[#allocation14 + $0x3d0] sm:$0xf0]  ;;  %v5018_v44 = vor.u32 %v5878_v34, %v5017_v33  ;;  %v5874_v46 = vld [vmem:[#allocation14 + $0x94] sm:$0xf0] }
 0x202   :  { %3285 = vmatpush.bf16.msra.mxu2 %v5254_v17  ;;  %v5206_v15 = vor.u32 %v5923_v29, %v5203_v10  ;;  %v5414_v41 = vor.u32 %v5975_v35, %v5411_v40  ;;  %v2285_v17 = vadd.f32 %v6459_v36, %v2272_v42  ;;  %v5963_v29 = vld [vmem:[#allocation14 + $0x364] sm:$0xf]  ;;  %v5363_v10 = vld [vmem:[#allocation14 + $0x370] sm:$0xf0]  ;;  %v5884_v34 = vld [vmem:[#allocation14 + $0xec] sm:$0xf] }
 0x203   :  { %3263 = vmatpush.bf16.msra.mxu0 %v4934_v63  ;;  %v2233_v4 = vadd.f32 %v6455_v58, %v2220_v57  ;;  %v5953_v58 = vld [vmem:[#allocation14 + $0x30c] sm:$0xf0]  ;;  %v4985_v57 = vld [vmem:[#allocation14 + $0x68] sm:$0xf]  ;;  %v5331_v33 = vld [vmem:[#allocation14 + $0x330] sm:$0xf0] }
 0x204   :  { %v6463_v51 = vpop.f32.mrf.mxu2  ;;  %v5314_v20 = vor.u32 %v5953_v58, %v5313_v18  ;;  %v5862_v18 = vld [vmem:[#allocation14 + $0x34] sm:$0xf0]  ;;  %v5145_v58 = vld [vmem:[#allocation14 + $0x1a8] sm:$0xf]  ;;  %v5051_v35 = vld [vmem:[#allocation14 + $0xf8] sm:$0xf0] }
 0x205   :  { %v2286_v60 = vpop.f32.mrf.mxu1  ;;  %v2325_v62 = vpop.f32.mrf.mxu0  ;;  %3247 = vmatpush.bf16.msrb.mxu3 %v5362_v11  ;;  %v2246_v6 = vadd.f32 %v6463_v51, %v2233_v4  ;;  %v5050_v51 = vor.u32 %v5886_v14, %v5049_v13  ;;  %v5398_v11 = vor.u32 %v5971_v47, %v5395_v49  ;;  %v1564_v13 = vperm.slane %v6470_v53, 2  ;;  %v5305_v47 = vld [vmem:[#allocation14 + $0x2e8] sm:$0xf]  ;;  %v5951_v49 = vld [vmem:[#allocation14 + $0x304] sm:$0xf] }
 0x206   :  { %v5345_v60 = vld [vmem:[#allocation14 + $0x340] sm:$0xf]  ;;  %v5961_v62 = vld [vmem:[#allocation14 + $0x34c] sm:$0xf0]  ;;  %3286 = vmatpush.bf16.msra.mxu2 %v5238_v54  ;;  %v5002_v54 = vor.u32 %v5874_v46, %v5001_v45  ;;  %v5902_v45 = vld [vmem:[#allocation14 + $0x174] sm:$0xf0] }
 0x207   :  { %v5346_v0 = vor.u32 %v5961_v62, %v5345_v60  ;;  %v5177_v60 = vld [vmem:[#allocation14 + $0x1e8] sm:$0xf]  ;;  %v2324_v23 = vadd.f32 %v6461_v38, %v1564_v13  ;;  %v5942_v13 = vld [vmem:[#allocation14 + $0x2b4] sm:$0xf0] }
 0x209   :  { %3248 = vmatpush.bf16.msrb.mxu3 %v5346_v0  ;;  %v5967_v0 = vld [vmem:[#allocation14 + $0x384] sm:$0xf] }
 0x20a   :  { %3287 = vmatpush.bf16.msra.mxu2 %v5222_v5  ;;  %v5382_v3 = vor.u32 %v5967_v0, %v5379_v1  ;;  %v4986_v5 = vor.u32 %v5870_v59, %v4985_v57  ;;  %v5097_v0 = vld [vmem:[#allocation14 + $0x148] sm:$0xf]  ;;  %v5898_v1 = vld [vmem:[#allocation14 + $0x154] sm:$0xf0] }
 0x20c   :  { %v2247_v16 = vpop.f32.mrf.mxu2 }
 0x20d   :  { %3249 = vmatpush.bf16.msrb.mxu3 %v5330_v37  ;;  %v5914_v37 = vld [vmem:[#allocation14 + $0x1d4] sm:$0xf0] }
 0x20e   :  { %v6465_v21 = vpop.f32.mrf.mxu1  ;;  %3288 = vmatpush.bf16.msra.mxu2 %v5206_v15  ;;  %v4970_v15 = vor.u32 %v5866_v8, %v4969_v7  ;;  %v5098_v7 = vor.u32 %v5898_v1, %v5097_v0  ;;  %v5131_v0 = vld [vmem:[#allocation14 + $0x198] sm:$0xf0] }
 0x20f   :  { %v2337_v31 = vadd.f32 %v6465_v21, %v2324_v23  ;;  %v5054_v21 = vor.u32 %v5884_v34, %v5051_v35  ;;  %v4987_v23 = vld [vmem:[#allocation14 + $0x78] sm:$0xf0]  ;;  %v5912_v35 = vld [vmem:[#allocation14 + $0x1cc] sm:$0xf] }
 0x210   :  { %v4971_v34 = vld [vmem:[#allocation14 + $0x58] sm:$0xf0] }
 0x211   :  { %3250 = vmatpush.bf16.msrb.mxu3 %v5314_v20  ;;  %v5959_v20 = vld [vmem:[#allocation14 + $0x344] sm:$0xf] }
 0x212   :  { %3289 = vmatpush.bf16.msra.mxu2 %v5190_v27  ;;  %v5350_v22 = vor.u32 %v5959_v20, %v5347_v2  ;;  %v4937_v27 = vld [vmem:[#allocation14 + $0x8] sm:$0xf]  ;;  %v5938_v2 = vld [vmem:[#allocation14 + $0x294] sm:$0xf0] }
 0x213   :  { %v4938_v42 = vor.u32 %v5858_v28, %v4937_v27  ;;  %v5257_v20 = vld [vmem:[#allocation14 + $0x288] sm:$0xf] }
 0x214   :  { %v5258_v28 = vor.u32 %v5938_v2, %v5257_v20  ;;  %v5944_v20 = vld [vmem:[#allocation14 + $0x2cc] sm:$0xf]  ;;  %v5291_v2 = vld [vmem:[#allocation14 + $0x2d8] sm:$0xf0] }
 0x215   :  { %v6472_v39 = vpop.f32.mrf.mxu2  ;;  %3295 = vmatpush.bf16.msra.mxu3 %v5430_v30  ;;  %v5129_v30 = vld [vmem:[#allocation14 + $0x188] sm:$0xf] }
 0x216   :  { %v2338_v43 = vpop.f32.mrf.mxu1  ;;  %v2298_v50 = vadd.f32 %v6472_v39, %v2285_v17  ;;  %v5161_v39 = vld [vmem:[#allocation14 + $0x1c8] sm:$0xf] }
 0x219   :  { %3296 = vmatpush.bf16.msra.mxu3 %v5414_v41 }
 0x21d   :  { %v6475_v55 = vpop.f32.mrf.mxu0  ;;  %v2299_v63 = vpop.f32.mrf.mxu2  ;;  %3297 = vmatpush.bf16.msra.mxu3 %v5398_v11  ;;  %v5315_v11 = vld [vmem:[#allocation14 + $0x310] sm:$0xf0] }
 0x21e   :  { %v5918_v63 = vld [vmem:[#allocation14 + $0x1f4] sm:$0xf0]  ;;  %v5318_v57 = vor.u32 %v5951_v49, %v5315_v11  ;;  %v5147_v49 = vld [vmem:[#allocation14 + $0x1b8] sm:$0xf0] }
 0x221   :  { %3298 = vmatpush.bf16.msra.mxu3 %v5382_v3  ;;  %v5289_v3 = vld [vmem:[#allocation14 + $0x2c8] sm:$0xf] }
 0x223   :  { %v2258_v9 = vpop.f32.mrf.mxu3 }
 0x224   :  { %v2259_v12 = vadd.f32 %v2258_v9, %v2246_v6  ;;  %v5178_v6 = vor.u32 %v5918_v63, %v5177_v60 }
 0x225   :  { %v2377_v61 = vpop.f32.mrf.mxu0  ;;  %v6480_v19 = vpop.f32.mrf.mxu2 }
 0x226   :  { %v2418_v16 = vmax.f32 %v2259_v12, 0.0  ;;  %v5366_v12 = vor.u32 %v5963_v29, %v5363_v10  ;;  %v5162_v61 = vor.u32 %v5914_v37, %v5161_v39  ;;  %v2350_v41 = vadd.f32 %v6480_v19, %v2337_v31  ;;  %v5081_v29 = vld [vmem:[#allocation14 + $0x128] sm:$0xf]  ;;  %v5894_v10 = vld [vmem:[#allocation14 + $0x134] sm:$0xf0] }
 0x227   :  { %v5241_v31 = vld [vmem:[#allocation14 + $0x268] sm:$0xf] }
 0x228   :  { %v6482_v24 = vpack.c.bf16 %v2418_v16, %v2418_v16  ;;  %v4953_v16 = vld [vmem:[#allocation14 + $0x28] sm:$0xf]  ;;  %3299 = vmatpush.bf16.msra.mxu3 %v5366_v12 }
 0x229   :  { %v4954_v25 = vor.u32 %v5862_v18, %v4953_v16  ;;  %v5273_v12 = vld [vmem:[#allocation14 + $0x2a8] sm:$0xf] }
 0x22a   :  { %3212 = vmatmul.bf16.vlgmr.msrb.gmra.mxu0 %v6482_v24  ;;  %v5274_v16 = vor.u32 %v5942_v13, %v5273_v12 }
 0x22b   :  { %3308 = vmatpush.bf16.msrb.mxu0 %v5050_v51  ;;  %v2260_v32 = vpop.f32.mrf.mxu3  ;;  %v5910_v51 = vld [vmem:[#allocation14 + $0x1b4] sm:$0xf0] }
 0x22c   :  { %v5146_v26 = vor.u32 %v5910_v51, %v5145_v58  ;;  %v5906_v32 = vld [vmem:[#allocation14 + $0x194] sm:$0xf0]  ;;  %3300 = vmatpush.bf16.msra.mxu3 %v5350_v22  ;;  %v5065_v58 = vld [vmem:[#allocation14 + $0x108] sm:$0xf]  ;;  %v5868_v22 = vld [vmem:[#allocation14 + $0x6c] sm:$0xf] }
 0x22d   :  { %v2351_v43 = vpop.f32.mrf.mxu2  ;;  %v5890_v51 = vld [vmem:[#allocation14 + $0x114] sm:$0xf0] }
 0x22e   :  { %v6487_v56 = vpop.f32.mrf.mxu1  ;;  %v5130_v43 = vor.u32 %v5906_v32, %v5129_v30  ;;  %v5066_v27 = vor.u32 %v5890_v51, %v5065_v58  ;;  %v4990_v30 = vor.u32 %v5868_v22, %v4987_v23  ;;  %v5896_v58 = vld [vmem:[#allocation14 + $0x14c] sm:$0xf]  ;;  %v5099_v51 = vld [vmem:[#allocation14 + $0x158] sm:$0xf0] }
 0x22f   :  { %3309 = vmatpush.bf16.msrb.mxu0 %v5034_v48  ;;  %v5955_v48 = vld [vmem:[#allocation14 + $0x324] sm:$0xf] }
 0x230   :  { %v5334_v40 = vor.u32 %v5955_v48, %v5331_v33  ;;  %v5934_v48 = vld [vmem:[#allocation14 + $0x274] sm:$0xf0]  ;;  %v5864_v33 = vld [vmem:[#allocation14 + $0x4c] sm:$0xf] }
 0x232   :  { %3301 = vmatpush.bf16.msra.mxu3 %v5334_v40  ;;  %v5163_v40 = vld [vmem:[#allocation14 + $0x1d8] sm:$0xf0] }
 0x233   :  { %3310 = vmatpush.bf16.msrb.mxu0 %v5018_v44  ;;  %v2310_v52 = vpop.f32.mrf.mxu3  ;;  %v5113_v44 = vld [vmem:[#allocation14 + $0x168] sm:$0xf] }
 0x234   :  { %v2311_v62 = vadd.f32 %v2310_v52, %v2298_v50  ;;  %v5950_v50 = vld [vmem:[#allocation14 + $0x2f4] sm:$0xf0]  ;;  %v5880_v52 = vld [vmem:[#allocation14 + $0xcc] sm:$0xf]  ;;  %v5114_v59 = vor.u32 %v5902_v45, %v5113_v44  ;;  %v5166_v44 = vor.u32 %v5912_v35, %v5163_v40  ;;  %v5385_v35 = vld [vmem:[#allocation14 + $0x388] sm:$0xf] }
 0x235   :  { %v5930_v45 = vld [vmem:[#allocation14 + $0x254] sm:$0xf0] }
 0x236   :  { %v2419_v36 = vmax.f32 %v2311_v62, 0.0  ;;  %v2390_v4 = vpop.f32.mrf.mxu1  ;;  %v5306_v62 = vor.u32 %v5950_v50, %v5305_v47  ;;  %3302 = vmatpush.bf16.msra.mxu3 %v5318_v57  ;;  %v5908_v47 = vld [vmem:[#allocation14 + $0x1ac] sm:$0xf]  ;;  %v5970_v40 = vld [vmem:[#allocation14 + $0x394] sm:$0xf0] }
 0x237   :  { %3311 = vmatpush.bf16.msrb.mxu0 %v5002_v54  ;;  %v5035_v54 = vld [vmem:[#allocation14 + $0xd8] sm:$0xf0]  ;;  %v5876_v4 = vld [vmem:[#allocation14 + $0xac] sm:$0xf]  ;;  %v5150_v57 = vor.u32 %v5908_v47, %v5147_v49  ;;  %v5966_v47 = vld [vmem:[#allocation14 + $0x374] sm:$0xf0] }
 0x238   :  { %v6491_v9 = vpack.c.bf16 %v2419_v36, %v2419_v36  ;;  %v5038_v63 = vor.u32 %v5880_v52, %v5035_v54  ;;  %v5946_v36 = vld [vmem:[#allocation14 + $0x2d4] sm:$0xf0]  ;;  %v5209_v52 = vld [vmem:[#allocation14 + $0x228] sm:$0xf]  ;;  %v5932_v49 = vld [vmem:[#allocation14 + $0x26c] sm:$0xf] }
 0x239   :  { %v5290_v39 = vor.u32 %v5946_v36, %v5289_v3 }
 0x23a   :  { %3225 = vmatmul.bf16.vlgmr.msrb.gmra.mxu1 %v6491_v9  ;;  %3264 = vmatmul.bf16.vlgmr.msra.gmra.mxu0 %v6482_v24 }
 0x23b   :  { %3312 = vmatpush.bf16.msrb.mxu0 %v4986_v5  ;;  %3321 = vmatpush.bf16.msrb.mxu1 %v5178_v6  ;;  %v2312_v14 = vpop.f32.mrf.mxu3  ;;  %v5019_v5 = vld [vmem:[#allocation14 + $0xb8] sm:$0xf0] }
 0x23c   :  { %v5022_v37 = vor.u32 %v5876_v4, %v5019_v5  ;;  %v5872_v14 = vld [vmem:[#allocation14 + $0x8c] sm:$0xf]  ;;  %v5193_v4 = vld [vmem:[#allocation14 + $0x208] sm:$0xf]  ;;  %v5922_v5 = vld [vmem:[#allocation14 + $0x214] sm:$0xf0] }
 0x23f   :  { %3313 = vmatpush.bf16.msrb.mxu0 %v4970_v15  ;;  %3322 = vmatpush.bf16.msrb.mxu1 %v5162_v61  ;;  %v5003_v15 = vld [vmem:[#allocation14 + $0x98] sm:$0xf0]  ;;  %v5082_v61 = vor.u32 %v5894_v10, %v5081_v29  ;;  %v5948_v29 = vld [vmem:[#allocation14 + $0x2ec] sm:$0xf] }
 0x240   :  { %v5006_v18 = vor.u32 %v5872_v14, %v5003_v15  ;;  %v5307_v10 = vld [vmem:[#allocation14 + $0x2f8] sm:$0xf0] }
 0x243   :  { %3314 = vmatpush.bf16.msrb.mxu0 %v4954_v25  ;;  %3323 = vmatpush.bf16.msrb.mxu1 %v5146_v26  ;;  %v2362_v38 = vpop.f32.mrf.mxu3  ;;  %v5916_v25 = vld [vmem:[#allocation14 + $0x1ec] sm:$0xf]  ;;  %v5179_v26 = vld [vmem:[#allocation14 + $0x1f8] sm:$0xf0] }
 0x244   :  { %v2363_v17 = vadd.f32 %v2362_v38, %v2350_v41  ;;  %v5182_v32 = vor.u32 %v5916_v25, %v5179_v26  ;;  %v1565_v41 = vperm.slane %v6470_v53, 3  ;;  %v5242_v38 = vor.u32 %v5934_v48, %v5241_v31  ;;  %v5083_v31 = vld [vmem:[#allocation14 + $0x138] sm:$0xf0] }
 0x245   :  { %v6499_v46 = vpop.f32.mrf.mxu2  ;;  %v5102_v25 = vor.u32 %v5896_v58, %v5099_v51  ;;  %v5294_v26 = vor.u32 %v5944_v20, %v5291_v2  ;;  %v5275_v48 = vld [vmem:[#allocation14 + $0x2b8] sm:$0xf0]  ;;  %v5964_v58 = vld [vmem:[#allocation14 + $0x36c] sm:$0xf] }
 0x246   :  { %v2420_v19 = vmax.f32 %v2363_v17, 0.0  ;;  %v5860_v17 = vld [vmem:[#allocation14 + $0x2c] sm:$0xf]  ;;  %v2376_v11 = vadd.f32 %v6475_v55, %v1565_v41  ;;  %v5371_v51 = vld [vmem:[#allocation14 + $0x378] sm:$0xf0] }
 0x247   :  { %3315 = vmatpush.bf16.msrb.mxu0 %v4938_v42  ;;  %3324 = vmatpush.bf16.msrb.mxu1 %v5130_v43  ;;  %v4974_v42 = vor.u32 %v5864_v33, %v4971_v34  ;;  %v5225_v43 = vld [vmem:[#allocation14 + $0x248] sm:$0xf]  ;;  %v5888_v41 = vld [vmem:[#allocation14 + $0x10c] sm:$0xf]  ;;  %v5374_v20 = vor.u32 %v5964_v58, %v5371_v51 }
 0x248   :  { %v6501_v60 = vpack.c.bf16 %v2420_v19, %v2420_v19  ;;  %v5226_v53 = vor.u32 %v5930_v45, %v5225_v43  ;;  %v2389_v54 = vadd.f32 %v6487_v56, %v2376_v11  ;;  %v5926_v19 = vld [vmem:[#allocation14 + $0x234] sm:$0xf0]  ;;  %v5433_v56 = vld [vmem:[#allocation14 + $0x3e8] sm:$0xf]  ;;  %v5259_v43 = vld [vmem:[#allocation14 + $0x298] sm:$0xf0] }
 0x249   :  { %v5210_v55 = vor.u32 %v5926_v19, %v5209_v52  ;;  %v5243_v11 = vld [vmem:[#allocation14 + $0x278] sm:$0xf0]  ;;  %v5353_v52 = vld [vmem:[#allocation14 + $0x348] sm:$0xf]  ;;  %v5960_v2 = vld [vmem:[#allocation14 + $0x34c] sm:$0xf] }
 0x24a   :  { %3238 = vmatmul.bf16.vlgmr.msrb.gmra.mxu2 %v6501_v60  ;;  %3277 = vmatmul.bf16.vlgmr.msra.gmra.mxu1 %v6491_v9  ;;  %v2402_v1 = vadd.f32 %v6499_v46, %v2389_v54  ;;  %v5194_v46 = vor.u32 %v5922_v5, %v5193_v4  ;;  %v5962_v54 = vld [vmem:[#allocation14 + $0x354] sm:$0xf0]  ;;  %v5227_v19 = vld [vmem:[#allocation14 + $0x258] sm:$0xf0]  ;;  %v5321_v4 = vld [vmem:[#allocation14 + $0x308] sm:$0xf] }
 0x24b   :  { %3360 = vmatpush.bf16.msra.mxu0 %v5054_v21  ;;  %3325 = vmatpush.bf16.msrb.mxu1 %v5114_v59  ;;  %v2364_v6 = vpop.f32.mrf.mxu3  ;;  %v4955_v21 = vld [vmem:[#allocation14 + $0x38] sm:$0xf0]  ;;  %v5856_v59 = vld [vmem:[#allocation14 + $0xc] sm:$0xf]  ;;  %v5954_v5 = vld [vmem:[#allocation14 + $0x314] sm:$0xf0] }
 0x24c   :  { %3316 = vmatmul.bf16.vlgmr.msrb.gmra.mxu0 %v6482_v24  ;;  %3334 = vmatpush.bf16.msrb.mxu2 %v5306_v62  ;;  %v4958_v50 = vor.u32 %v5860_v17, %v4955_v21  ;;  %v4939_v62 = vld [vmem:[#allocation14 + $0x18] sm:$0xf0]  ;;  %v5369_v21 = vld [vmem:[#allocation14 + $0x368] sm:$0xf] }
 0x24d   :  { %v2403_v8 = vpop.f32.mrf.mxu2  ;;  %v4942_v36 = vor.u32 %v5856_v59, %v4939_v62  ;;  %v5354_v59 = vor.u32 %v5962_v54, %v5353_v52  ;;  %v5986_v52 = vld [vmem:[#allocation17 + $0x18] sm:$0xff] }
 0x24e   :  { %v5982_v8 = vld [vmem:[#allocation14 + $0x3f4] sm:$0xf0]  ;;  %v5994_v54 = vld [vmem:[#allocation17 + $0x58] sm:$0xff] }
 0x24f   :  { %3361 = vmatpush.bf16.msra.mxu0 %v5038_v63  ;;  %3326 = vmatpush.bf16.msrb.mxu1 %v5098_v7  ;;  %v5904_v63 = vld [vmem:[#allocation14 + $0x18c] sm:$0xf]  ;;  %v5434_v13 = vor.u32 %v5982_v8, %v5433_v56  ;;  %v5435_v8 = vld [vmem:[#allocation14 + $0x3f8] sm:$0xf0] }
 0x250   :  { %3335 = vmatpush.bf16.msrb.mxu2 %v5290_v39  ;;  %v5134_v7 = vor.u32 %v5904_v63, %v5131_v0  ;;  %v5900_v39 = vld [vmem:[#allocation14 + $0x16c] sm:$0xf]  ;;  %v5337_v63 = vld [vmem:[#allocation14 + $0x328] sm:$0xf]  ;;  %v5958_v0 = vld [vmem:[#allocation14 + $0x334] sm:$0xf0] }
 0x251   :  { %v5980_v56 = vld [vmem:[#allocation14 + $0x3ec] sm:$0xf] }
 0x253   :  { %3362 = vmatpush.bf16.msra.mxu0 %v5022_v37  ;;  %3327 = vmatpush.bf16.msrb.mxu1 %v5082_v61  ;;  %v5115_v37 = vld [vmem:[#allocation14 + $0x178] sm:$0xf0]  ;;  %v5310_v61 = vor.u32 %v5948_v29, %v5307_v10  ;;  %v5976_v29 = vld [vmem:[#allocation14 + $0x3cc] sm:$0xf] }
 0x254   :  { %3336 = vmatpush.bf16.msrb.mxu2 %v5274_v16  ;;  %v5118_v15 = vor.u32 %v5900_v39, %v5115_v37  ;;  %v5417_v16 = vld [vmem:[#allocation14 + $0x3c8] sm:$0xf]  ;;  %v5322_v39 = vor.u32 %v5954_v5, %v5321_v4  ;;  %v5438_v37 = vor.u32 %v5980_v56, %v5435_v8  ;;  %v5419_v10 = vld [vmem:[#allocation14 + $0x3d8] sm:$0xf0] }
 0x255   :  { %v5991_v4 = vld [vmem:[#allocation17 + $0x40] sm:$0xff] }
 0x257   :  { %3363 = vmatpush.bf16.msra.mxu0 %v5006_v18  ;;  %3328 = vmatpush.bf16.msrb.mxu1 %v5066_v27  ;;  %v5978_v18 = vld [vmem:[#allocation14 + $0x3d4] sm:$0xf0]  ;;  %v5401_v27 = vld [vmem:[#allocation14 + $0x3a8] sm:$0xf] }
 0x258   :  { %3337 = vmatpush.bf16.msrb.mxu2 %v5258_v28  ;;  %v5418_v23 = vor.u32 %v5978_v18, %v5417_v16  ;;  %v5974_v28 = vld [vmem:[#allocation14 + $0x3b4] sm:$0xf0]  ;;  %v5387_v16 = vld [vmem:[#allocation14 + $0x398] sm:$0xf0] }
 0x259   :  { %v5402_v33 = vor.u32 %v5974_v28, %v5401_v27  ;;  %v5952_v28 = vld [vmem:[#allocation14 + $0x30c] sm:$0xf] }
 0x25a   :  { %3290 = vmatmul.bf16.vlgmr.msra.gmra.mxu2 %v6501_v60  ;;  %3329 = vmatmul.bf16.vlgmr.msrb.gmra.mxu1 %v6491_v9 }
 0x25b   :  { %3364 = vmatpush.bf16.msra.mxu0 %v4990_v30  ;;  %3373 = vmatpush.bf16.msra.mxu1 %v5182_v32  ;;  %v5892_v30 = vld [vmem:[#allocation14 + $0x12c] sm:$0xf] }
 0x25c   :  { %3338 = vmatpush.bf16.msrb.mxu2 %v5242_v38  ;;  %v5940_v32 = vld [vmem:[#allocation14 + $0x2ac] sm:$0xf]  ;;  %v5067_v38 = vld [vmem:[#allocation14 + $0x118] sm:$0xf0] }
 0x25d   :  { %v5278_v34 = vor.u32 %v5940_v32, %v5275_v48  ;;  %v5070_v45 = vor.u32 %v5888_v41, %v5067_v38 }
 0x25f   :  { %3365 = vmatpush.bf16.msra.mxu0 %v4974_v42  ;;  %3374 = vmatpush.bf16.msra.mxu1 %v5166_v44  ;;  %v5936_v42 = vld [vmem:[#allocation14 + $0x28c] sm:$0xf]  ;;  %v5386_v44 = vor.u32 %v5970_v40, %v5385_v35  ;;  %v5990_v35 = vld [vmem:[#allocation17 + $0x38] sm:$0xff] }
 0x260   :  { %3339 = vmatpush.bf16.msrb.mxu2 %v5226_v53  ;;  %v5262_v17 = vor.u32 %v5936_v42, %v5259_v43  ;;  %v5370_v53 = vor.u32 %v5966_v47, %v5369_v21  ;;  %v5998_v40 = vld [vmem:[#allocation17 + $0x78] sm:$0xff]  ;;  %v5989_v42 = vld [vmem:[#allocation17 + $0x30] sm:$0xff] }
 0x261   :  { %v5997_v43 = vld [vmem:[#allocation17 + $0x70] sm:$0xff]  ;;  %v6526_v47 = vld [vmem:[#allocation15] sm:$0xf] }
 0x263   :  { %v2414_v3 = vpop.f32.mrf.mxu3  ;;  %3366 = vmatpush.bf16.msra.mxu0 %v4958_v50  ;;  %3375 = vmatpush.bf16.msra.mxu1 %v5150_v57  ;;  %v5246_v50 = vor.u32 %v5932_v49, %v5243_v11  ;;  %v5928_v57 = vld [vmem:[#allocation14 + $0x24c] sm:$0xf]  ;;  %v5987_v49 = vld [vmem:[#allocation17 + $0x20] sm:$0xff] }
 0x264   :  { %v2415_v6 = vadd.f32 %v2414_v3, %v2402_v1  ;;  %3340 = vmatpush.bf16.msrb.mxu2 %v5210_v55  ;;  %v5230_v62 = vor.u32 %v5928_v57, %v5227_v19  ;;  %v5924_v1 = vld [vmem:[#allocation14 + $0x22c] sm:$0xf]  ;;  %v5211_v3 = vld [vmem:[#allocation14 + $0x238] sm:$0xf0]  ;;  %v5338_v55 = vor.u32 %v5958_v0, %v5337_v63  ;;  %v5995_v11 = vld [vmem:[#allocation17 + $0x60] sm:$0xff] }
 0x265   :  { %v5993_v63 = vld [vmem:[#allocation17 + $0x50] sm:$0xff] }
 0x266   :  { %v2421_v12 = vmax.f32 %v2415_v6, 0.0  ;;  %v5920_v6 = vld [vmem:[#allocation14 + $0x20c] sm:$0xf] }
 0x267   :  { %3367 = vmatpush.bf16.msra.mxu0 %v4942_v36  ;;  %3376 = vmatpush.bf16.msra.mxu1 %v5134_v7  ;;  %v5214_v36 = vor.u32 %v5924_v1, %v5211_v3  ;;  %v5195_v7 = vld [vmem:[#allocation14 + $0x218] sm:$0xf0]  ;;  %v5984_v1 = vld [vmem:[#allocation17 + $0x8] sm:$0xff] }
 0x268   :  { %v6512_v14 = vpack.c.bf16 %v2421_v12, %v2421_v12  ;;  %3341 = vmatpush.bf16.msrb.mxu2 %v5194_v46  ;;  %v5422_v12 = vor.u32 %v5976_v29, %v5419_v10  ;;  %v5972_v46 = vld [vmem:[#allocation14 + $0x3ac] sm:$0xf]  ;;  %v6014_v29 = vld [vmem:[#allocation17 + $0xf8] sm:$0xff] }
 0x269   :  { %v5992_v3 = vld [vmem:[#allocation17 + $0x48] sm:$0xff] }
 0x26a   :  { %3251 = vmatmul.bf16.vlgmr.msrb.gmra.mxu3 %v6512_v14  ;;  %3368 = vmatmul.bf16.vlgmr.msra.gmra.mxu0 %v6482_v24  ;;  %v5086_v24 = vor.u32 %v5892_v30, %v5083_v31 }
 0x26b   :  { %3347 = vmatpush.bf16.msrb.mxu3 %v5434_v13  ;;  %v2416_v22 = vpop.f32.mrf.mxu3  ;;  %3377 = vmatpush.bf16.msra.mxu1 %v5118_v15  ;;  %v5403_v13 = vld [vmem:[#allocation14 + $0x3b8] sm:$0xf0] }
 0x26c   :  { %3386 = vmatpush.bf16.msra.mxu2 %v5310_v61  ;;  %v5406_v15 = vor.u32 %v5972_v46, %v5403_v13  ;;  %v5968_v61 = vld [vmem:[#allocation14 + $0x38c] sm:$0xf]  ;;  %v5355_v22 = vld [vmem:[#allocation14 + $0x358] sm:$0xf0]  ;;  %3696 = vmatpush.bf16.msrb.mxu0 %v5990_v35  ;;  %v6005_v46 = vld [vmem:[#allocation17 + $0xb0] sm:$0xff] }
 0x26d   :  { %3342 = vmatmul.bf16.vlgmr.msrb.gmra.mxu2 %v6501_v60  ;;  %v5390_v18 = vor.u32 %v5968_v61, %v5387_v16  ;;  %v6013_v13 = vld [vmem:[#allocation17 + $0xf0] sm:$0xff] }
 0x26f   :  { %3348 = vmatpush.bf16.msrb.mxu3 %v5418_v23  ;;  %3378 = vmatpush.bf16.msra.mxu1 %v5102_v25  ;;  %v5358_v23 = vor.u32 %v5960_v2, %v5355_v22  ;;  %v5956_v25 = vld [vmem:[#allocation14 + $0x32c] sm:$0xf] }
 0x270   :  { %3387 = vmatpush.bf16.msra.mxu2 %v5294_v26  ;;  %v5339_v26 = vld [vmem:[#allocation14 + $0x338] sm:$0xf0]  ;;  %3697 = vmatpush.bf16.msrb.mxu0 %v5989_v42  ;;  %v6012_v2 = vld [vmem:[#allocation17 + $0xe8] sm:$0xff]  ;;  %v6009_v42 = vld [vmem:[#allocation17 + $0xd0] sm:$0xff] }
 0x271   :  { %v5342_v27 = vor.u32 %v5956_v25, %v5339_v26 }
 0x273   :  { %3349 = vmatpush.bf16.msrb.mxu3 %v5402_v33  ;;  %3379 = vmatpush.bf16.msra.mxu1 %v5086_v24 }
 0x274   :  { %3388 = vmatpush.bf16.msra.mxu2 %v5278_v34 }
 0x277   :  { %3350 = vmatpush.bf16.msrb.mxu3 %v5386_v44  ;;  %3380 = vmatpush.bf16.msra.mxu1 %v5070_v45  ;;  %v5996_v45 = vld [vmem:[#allocation17 + $0x68] sm:$0xff] }
 0x278   :  { %3389 = vmatpush.bf16.msra.mxu2 %v5262_v17 }
 0x27a   :  { %3303 = vmatmul.bf16.vlgmr.msra.gmra.mxu3 %v6512_v14  ;;  %3381 = vmatmul.bf16.vlgmr.msra.gmra.mxu1 %v6491_v9  ;;  %v5198_v9 = vor.u32 %v5920_v6, %v5195_v7 }
 0x27b   :  { %3351 = vmatpush.bf16.msrb.mxu3 %v5370_v53  ;;  %3709 = vmatpush.bf16.msrb.mxu1 %v5998_v40  ;;  %v2558_v53 = vperm.slane %v6526_v47, 2 }
 0x27c   :  { %3390 = vmatpush.bf16.msra.mxu2 %v5246_v50 }
 0x27f   :  { %3352 = vmatpush.bf16.msrb.mxu3 %v5354_v59  ;;  %3710 = vmatpush.bf16.msrb.mxu1 %v5997_v43  ;;  %v6000_v43 = vld [vmem:[#allocation17 + $0x88] sm:$0xff] }
 0x280   :  { %3391 = vmatpush.bf16.msra.mxu2 %v5230_v62  ;;  %v5985_v62 = vld [vmem:[#allocation17 + $0x10] sm:$0xff] }
 0x283   :  { %3353 = vmatpush.bf16.msrb.mxu3 %v5338_v55  ;;  %3711 = vmatpush.bf16.msrb.mxu1 %v5996_v45 }
 0x284   :  { %3392 = vmatpush.bf16.msra.mxu2 %v5214_v36  ;;  %v5983_v36 = vld [vmem:[#allocation17] sm:$0xff] }
 0x287   :  { %3354 = vmatpush.bf16.msrb.mxu3 %v5322_v39  ;;  %3712 = vmatpush.bf16.msrb.mxu1 %v5995_v11  ;;  %v2556_v39 = vperm.slane %v6526_v47, 0 }
 0x288   :  { %3393 = vmatpush.bf16.msra.mxu2 %v5198_v9  ;;  %v2557_v9 = vperm.slane %v6526_v47, 1 }
 0x28a   :  { %3355 = vmatmul.bf16.vlgmr.msrb.gmra.mxu3 %v6512_v14 }
 0x28b   :  { %3399 = vmatpush.bf16.msra.mxu3 %v5438_v37  ;;  %3394 = vmatmul.bf16.vlgmr.msra.gmra.mxu2 %v6501_v60  ;;  %v5323_v60 = vld [vmem:[#allocation14 + $0x318] sm:$0xf0] }
 0x28c   :  { %v5326_v30 = vor.u32 %v5952_v28, %v5323_v60  ;;  %3713 = vmatpush.bf16.msrb.mxu1 %v5994_v54  ;;  %v6006_v37 = vld [vmem:[#allocation17 + $0xb8] sm:$0xff]  ;;  %v6011_v28 = vld [vmem:[#allocation17 + $0xe0] sm:$0xff] }
 0x28d   :  { %3722 = vmatpush.bf16.msrb.mxu2 %v6006_v37 }
 0x28f   :  { %3400 = vmatpush.bf16.msra.mxu3 %v5422_v12 }
 0x290   :  { %3714 = vmatpush.bf16.msrb.mxu1 %v5993_v63 }
 0x291   :  { %3723 = vmatpush.bf16.msrb.mxu2 %v6005_v46 }
 0x293   :  { %3401 = vmatpush.bf16.msra.mxu3 %v5406_v15 }
 0x294   :  { %3715 = vmatpush.bf16.msrb.mxu1 %v5992_v3 }
 0x297   :  { %3402 = vmatpush.bf16.msra.mxu3 %v5390_v18 }
 0x298   :  { %3716 = vmatpush.bf16.msrb.mxu1 %v5991_v4 }
 0x29b   :  { %3403 = vmatpush.bf16.msra.mxu3 %v5374_v20  ;;  %v6004_v20 = vld [vmem:[#allocation17 + $0xa8] sm:$0xff] }
 0x29c   :  { %3724 = vmatpush.bf16.msrb.mxu2 %v6004_v20 }
 0x29f   :  { %3404 = vmatpush.bf16.msra.mxu3 %v5358_v23 }
 0x2a3   :  { %3405 = vmatpush.bf16.msra.mxu3 %v5342_v27  ;;  %v6003_v27 = vld [vmem:[#allocation17 + $0xa0] sm:$0xff] }
 0x2a4   :  { %3725 = vmatpush.bf16.msrb.mxu2 %v6003_v27 }
 0x2a7   :  { %3406 = vmatpush.bf16.msra.mxu3 %v5326_v30  ;;  %v3213_v31 = vpop.f32.mrf.mxu0 }
 0x2a8   :  { %v3214_v12 = vadd.f32 %v3213_v31, %v2556_v39 }
 0x2aa   :  { %3407 = vmatmul.bf16.vlgmr.msra.gmra.mxu3 %v6512_v14  ;;  %v5988_v14 = vld [vmem:[#allocation17 + $0x28] sm:$0xff] }
 0x2ab   :  { %3698 = vmatpush.bf16.msrb.mxu0 %v5988_v14  ;;  %3735 = vmatpush.bf16.msrb.mxu3 %v6014_v29 }
 0x2af   :  { %v3215_v32 = vpop.f32.mrf.mxu0  ;;  %3699 = vmatpush.bf16.msrb.mxu0 %v5987_v49  ;;  %3736 = vmatpush.bf16.msrb.mxu3 %v6013_v13 }
 0x2b3   :  { %3700 = vmatpush.bf16.msrb.mxu0 %v5986_v52  ;;  %3737 = vmatpush.bf16.msrb.mxu3 %v6012_v2 }
 0x2b7   :  { %v6522_v48 = vpop.f32.mrf.mxu1  ;;  %v6524_v33 = vpop.f32.mrf.mxu0  ;;  %3701 = vmatpush.bf16.msrb.mxu0 %v5985_v62  ;;  %3738 = vmatpush.bf16.msrb.mxu3 %v6011_v28 }
 0x2b8   :  { %v3227_v15 = vadd.f32 %v6522_v48, %v3214_v12  ;;  %v3266_v61 = vadd.f32 %v6524_v33, %v2557_v9  ;;  %v6002_v48 = vld [vmem:[#allocation17 + $0x98] sm:$0xff] }
 0x2b9   :  { %v6010_v33 = vld [vmem:[#allocation17 + $0xd8] sm:$0xff]  ;;  %3726 = vmatpush.bf16.msrb.mxu2 %v6002_v48 }
 0x2bb   :  { %3702 = vmatpush.bf16.msrb.mxu0 %v5984_v1  ;;  %3739 = vmatpush.bf16.msrb.mxu3 %v6010_v33 }
 0x2bf   :  { %v3228_v24 = vpop.f32.mrf.mxu1  ;;  %v3267_v34 = vpop.f32.mrf.mxu0  ;;  %3703 = vmatpush.bf16.msrb.mxu0 %v5983_v36  ;;  %3740 = vmatpush.bf16.msrb.mxu3 %v6009_v42 }
 0x2c7   :  { %v3278_v41 = vpop.f32.mrf.mxu1 }
 0x2c8   :  { %v3279_v58 = vadd.f32 %v3278_v41, %v3266_v61 }
 0x2c9   :  { %v3317_v38 = vpop.f32.mrf.mxu0 }
 0x2ca   :  { %v3318_v57 = vadd.f32 %v3317_v38, %v2558_v53  ;;  %v6001_v38 = vld [vmem:[#allocation17 + $0x90] sm:$0xff]  ;;  %v2559_v53 = vperm.slane %v6526_v47, 3 }
 0x2cb   :  { %3727 = vmatpush.bf16.msrb.mxu2 %v6001_v38 }
 0x2cd   :  { %v3239_v44 = vpop.f32.mrf.mxu2 }
 0x2ce   :  { %v3240_v51 = vadd.f32 %v3239_v44, %v3227_v15  ;;  %v6008_v44 = vld [vmem:[#allocation17 + $0xc8] sm:$0xff] }
 0x2cf   :  { %v3280_v17 = vpop.f32.mrf.mxu1  ;;  %3728 = vmatpush.bf16.msrb.mxu2 %v6000_v43  ;;  %3741 = vmatpush.bf16.msrb.mxu3 %v6008_v44 }
 0x2d0   :  { %v5999_v17 = vld [vmem:[#allocation17 + $0x80] sm:$0xff] }
 0x2d1   :  { %v3319_v21 = vpop.f32.mrf.mxu0 }
 0x2d2   :  { %v6007_v21 = vld [vmem:[#allocation17 + $0xc0] sm:$0xff] }
 0x2d3   :  { %3729 = vmatpush.bf16.msrb.mxu2 %v5999_v17  ;;  %3742 = vmatpush.bf16.msrb.mxu3 %v6007_v21 }
 0x2d5   :  { %v3241_v50 = vpop.f32.mrf.mxu2 }
 0x2d7   :  { %v3330_v19 = vpop.f32.mrf.mxu1 }
 0x2d8   :  { %v6529_v59 = vadd.f32 %v3330_v19, %v3318_v57 }
 0x2dd   :  { %v3291_v0 = vpop.f32.mrf.mxu2 }
 0x2de   :  { %v3292_v22 = vadd.f32 %v3291_v0, %v3279_v58 }
 0x2df   :  { %v3332_v55 = vpop.f32.mrf.mxu1 }
 0x2e5   :  { %v3293_v6 = vpop.f32.mrf.mxu2 }
 0x2e7   :  { %v6531_v5 = vpop.f32.mrf.mxu0 }
 0x2e8   :  { %v3370_v50 = vadd.f32 %v6531_v5, %v2559_v53 }
 0x2ed   :  { %v3252_v7 = vpop.f32.mrf.mxu3 }
 0x2ee   :  { %v3253_v23 = vadd.f32 %v3252_v7, %v3240_v51 }
 0x2ef   :  { %v3371_v56 = vpop.f32.mrf.mxu0 }
 0x2f0   :  { %v6533_v8 = vpop.f32.mrf.mxu2  ;;  %v3412_v60 = vmax.f32 %v3253_v23, 0.0 }
 0x2f1   :  { %v3344_v52 = vadd.f32 %v6533_v8, %v6529_v59  ;;  %v6029_v59 = vld [vmem:[%s6559_s10] ss:$0 sm:$0xff]  ;;  %s3761_s10 = sshll.u32 %s6560_s11, 4  ;;  %s3762_s10 = int_to_ptr.hbm [resolvable:$true] %s3761_s10 }
 0x2f5   :  { %v3254_v10 = vpop.f32.mrf.mxu3 }
 0x2f7   :  { %v3382_v16 = vpop.f32.mrf.mxu1 }
 0x2f8   :  { %v3345_v18 = vpop.f32.mrf.mxu2  ;;  %v3383_v54 = vadd.f32 %v3382_v16, %v3370_v50 }
 0x2fd   :  { %v3304_v25 = vpop.f32.mrf.mxu3 }
 0x2fe   :  { %v3305_v26 = vadd.f32 %v3304_v25, %v3292_v22 }
 0x2ff   :  { %v3384_v31 = vpop.f32.mrf.mxu1 }
 0x300   :  { %v3413_v30 = vmax.f32 %v3305_v26, 0.0 }
 0x302   :  { %v3416_v32 = vpack.c.bf16 %v3413_v30, %v3412_v60 }
 0x304   :  { %v3492_v24 = vunpack.c.l.b16 %v3416_v32  ;;  %v3493_v34 = vunpack.c.h.b16 %v3416_v32 }
 0x305   :  { %v3306_v35 = vpop.f32.mrf.mxu3 }
 0x306   :  { %v3496_v40 = vpack.c.b16 %v3492_v24, %v3492_v24  ;;  %v3497_v41 = vpack.c.b16 %v3493_v34, %v3493_v34 }
 0x308   :  { %3704 = vmatmul.bf16.vlgmr.msrb.gmra.mxu0 %v3496_v40  ;;  %3717 = vmatmul.bf16.vlgmr.msrb.gmra.mxu1 %v3497_v41 }
 0x30d   :  { %v3356_v14 = vpop.f32.mrf.mxu3 }
 0x30e   :  { %v3395_v45 = vpop.f32.mrf.mxu2  ;;  %v3357_v57 = vadd.f32 %v3356_v14, %v3344_v52 }
 0x30f   :  { %v3396_v19 = vadd.f32 %v3395_v45, %v3383_v54 }
 0x310   :  { %v3414_v0 = vmax.f32 %v3357_v57, 0.0 }
 0x315   :  { %v3358_v49 = vpop.f32.mrf.mxu3 }
 0x316   :  { %v3397_v11 = vpop.f32.mrf.mxu2 }
 0x32d   :  { %v3408_v62 = vpop.f32.mrf.mxu3 }
 0x32e   :  { %v3409_v63 = vadd.f32 %v3408_v62, %v3396_v19 }
 0x330   :  { %v3415_v1 = vmax.f32 %v3409_v63, 0.0 }
 0x332   :  { %v3417_v3 = vpack.c.bf16 %v3415_v1, %v3414_v0 }
 0x334   :  { %v3494_v55 = vunpack.c.l.b16 %v3417_v3  ;;  %v3495_v36 = vunpack.c.h.b16 %v3417_v3 }
 0x335   :  { %v3410_v4 = vpop.f32.mrf.mxu3 }
 0x336   :  { %v3498_v6 = vpack.c.b16 %v3494_v55, %v3494_v55  ;;  %v3499_v7 = vpack.c.b16 %v3495_v36, %v3495_v36 }
 0x338   :  { %3730 = vmatmul.bf16.vlgmr.msrb.gmra.mxu2 %v3498_v6  ;;  %3743 = vmatmul.bf16.vlgmr.msrb.gmra.mxu3 %v3499_v7 }
 0x385   :  { %v3705_v47 = vpop.f32.mrf.mxu0  ;;  %v3718_v5 = vpop.f32.mrf.mxu1 }
 0x386   :  { %v3706_v8 = vadd.f32 %v6029_v59, %v3705_v47 }
 0x388   :  { %v3719_v9 = vadd.f32 %v3718_v5, %v3706_v8 }
 0x38d   :  { %v3707_v56 = vpop.f32.mrf.mxu0  ;;  %v3720_v39 = vpop.f32.mrf.mxu1 }
 0x3bb   :  { %v3731_v37 = vpop.f32.mrf.mxu2  ;;  %v3744_v29 = vpop.f32.mrf.mxu3 }
 0x3bc   :  { %v3732_v10 = vadd.f32 %v3731_v37, %v3719_v9 }
 0x3be   :  { %v3745_v12 = vadd.f32 %v3744_v29, %v3732_v10 }
 0x3c0   :  { %v3748_v46 = vsub.f32 0.0, %v3745_v12 }
 0x3c2   :  { %v3749_v13 = vmul.f32 1.442695, %v3748_v46 }
 0x3c3   :  { %v3733_v15 = vpop.f32.mrf.mxu2  ;;  %v3746_v61 = vpop.f32.mrf.mxu3 }
 0x3c4   :  { %6030 = vpow2.f32 %v3749_v13 }
 0x3ca   :  { %v6031_v16 = vpop.eup %6030 }
 0x3cb   :  { %v3751_v18 = vadd.f32 1.0, %v6031_v16 }
 0x3cd   :  { %6032 = vrcp.f32 %v3751_v18 }
 0x3d3   :  { %v6033_v58 = vpop.eup %6032 }
 0x3d4   :  { %3753 = vst [vmem:[#allocation18] sm:$0xff] %v6033_v58 }
 0x3d5   :  { %3764 = dma.vmem_to_hbm [thread:$0]  %s3760_s20, 128, %s3762_s10, [#allocation5]  }
 0x3d6   :  { %6284 = dma.done.wait [#allocation5], 128  }
 0x3d7   :  { %6285 = vsyncadd [#allocation5], 4294967168 }
 0x3d8   :  { %3769 = vsyncpa [#allocation4], 1 }
 0x3d9   :  { %3770 = vsyncpa [#allocation7], 1 }
 0x3da   :  { %3771 = vsyncpa [#allocation10], 1 }
 0x3db   :  { %3772 = vsyncpa [#allocation13], 1 }
 0x3dc   :  { %3773 = vsyncpa [#allocation16], 1 }
 0x3dd   :  { %3774 = vsyncpa [#allocation5], 1 }

</bundles_post_ra>
